<compile_context>
chip_gen: v7x
topology: tpu7x:2x2x1
jax: 0.10.0
libtpu: 0.0.40
codegen_flags: <defaults>
</compile_context>

<pallas_src>
import jax
import jax.numpy as jnp
from jax.experimental import pallas as pl
from jax.experimental.pallas import tpu as pltpu

# Logical (PyTorch) sizes.
INPUT_SIZE = 57
HIDDEN = 250          # hidden_size in the PyTorch module
H1 = HIDDEN * 2       # 500
H2 = HIDDEN * 2       # 500
H3 = HIDDEN           # 250

# Padded, TPU-friendly sizes (multiples of 128/256 for lane/MXU alignment).
IN_PAD = 128          # 57  -> 128
H1_PAD = 512          # 500 -> 512
H2_PAD = 512          # 500 -> 512
H3_PAD = 256          # 250 -> 256
OUT_LANES = 128       # lane-dense output tile; real result lives in lane 0


def mlp_kernel(x_ref,
               w1_ref, b1_ref,
               w2_ref, b2_ref,
               w3_ref, b3_ref,
               w4_ref, b4_ref,
               o_ref):
    # Layer 1: Linear(57 -> 500) + ReLU  (bf16 MXU matmul, f32 accumulate)
    h = jnp.dot(x_ref[...], w1_ref[...], preferred_element_type=jnp.float32)
    h = jnp.maximum(h + b1_ref[...], 0.0)
    # Layer 2: Linear(500 -> 500) + ReLU
    h = jnp.dot(h.astype(jnp.bfloat16), w2_ref[...],
                preferred_element_type=jnp.float32)
    h = jnp.maximum(h + b2_ref[...], 0.0)
    # Layer 3: Linear(500 -> 250) + ReLU
    h = jnp.dot(h.astype(jnp.bfloat16), w3_ref[...],
                preferred_element_type=jnp.float32)
    h = jnp.maximum(h + b3_ref[...], 0.0)
    # Layer 4: Linear(250 -> 1). An N=1 matmul wastes an MXU pass, so use a
    # VPU broadcast-multiply + lane reduction in f32 instead.
    out = jnp.sum(h * w4_ref[...], axis=-1, keepdims=True) + b4_ref[...]
    # Lane-dense store: broadcast the (tile, 1) column across the 128-lane
    # output tile so the store is an unmasked vst; the wrapper slices lane 0.
    o_ref[...] = jnp.broadcast_to(out, o_ref.shape).astype(o_ref.dtype)


def prepare_params(params):
    """Zero-pad params to MXU-friendly shapes; cast matmul weights to bf16."""
    def pad2(a, shape):
        return jnp.pad(a, ((0, shape[0] - a.shape[0]),
                           (0, shape[1] - a.shape[1])))
    w1 = pad2(params["w1"], (IN_PAD, H1_PAD)).astype(jnp.bfloat16)
    w2 = pad2(params["w2"], (H1_PAD, H2_PAD)).astype(jnp.bfloat16)
    w3 = pad2(params["w3"], (H2_PAD, H3_PAD)).astype(jnp.bfloat16)
    # w4 is (250, 1): present it as a (1, 256) f32 row for the VPU reduction.
    w4 = pad2(params["w4"].reshape(1, H3), (1, H3_PAD)).astype(jnp.float32)
    b1 = pad2(params["b1"], (1, H1_PAD)).astype(jnp.float32)
    b2 = pad2(params["b2"], (1, H2_PAD)).astype(jnp.float32)
    b3 = pad2(params["b3"], (1, H3_PAD)).astype(jnp.float32)
    b4 = params["b4"].astype(jnp.float32)          # (1, 1)
    return w1, b1, w2, b2, w3, b3, w4, b4


def neural_network_forward(x, params, *, batch_tile=256):
    """x: (B, 57) float32.  params: dict of (in,out) weights and (1,out) biases."""
    B, F = x.shape
    assert F == INPUT_SIZE
    assert batch_tile % 8 == 0

    n_tiles = pl.cdiv(B, batch_tile)
    B_pad = n_tiles * batch_tile

    # Pad batch to a tile multiple and features to 128 lanes; cast to bf16.
    x_p = jnp.pad(x, ((0, B_pad - B), (0, IN_PAD - F))).astype(jnp.bfloat16)
    w1, b1, w2, b2, w3, b3, w4, b4 = prepare_params(params)

    def resident(arr):
        # Weights/biases are small (<1 MB bf16): keep the full array resident
        # in VMEM every grid step (constant index map => fetched once).
        return pl.BlockSpec(arr.shape, lambda i: (0, 0))

    out_full = pl.pallas_call(
        mlp_kernel,
        out_shape=jax.ShapeDtypeStruct((B_pad, OUT_LANES), jnp.float32),
        grid_spec=pltpu.PrefetchScalarGridSpec(
            num_scalar_prefetch=0,
            grid=(n_tiles,),
            in_specs=[
                pl.BlockSpec((batch_tile, IN_PAD), lambda i: (i, 0)),
                resident(w1), resident(b1),
                resident(w2), resident(b2),
                resident(w3), resident(b3),
                resident(w4), resident(b4),
            ],
            out_specs=pl.BlockSpec((batch_tile, OUT_LANES), lambda i: (i, 0)),
        ),
        compiler_params=pltpu.CompilerParams(
            dimension_semantics=("parallel",),        # shards tiles over TCs (v7x)
            vmem_limit_bytes=32 * 1024 * 1024,        # explicit budget, safe on v5e/v6e/v7x
        ),
    )(x_p, w1, b1, w2, b2, w3, b3, w4, b4)

    return out_full[:B, :1]


def init_params(key):
    """Deterministic init matching PyTorch Linear's U(-1/sqrt(fan_in), +1/sqrt(fan_in))."""
    dims = [(INPUT_SIZE, H1),   # Linear(57, 500)
            (H1, H2),           # Linear(500, 500)
            (H2, H3),           # Linear(500, 250)
            (H3, 1)]            # Linear(250, 1)
    params = {}
    for idx, (fan_in, fan_out) in enumerate(dims, start=1):
        key, kw, kb = jax.random.split(key, 3)
        bound = 1.0 / jnp.sqrt(float(fan_in))
        params[f"w{idx}"] = jax.random.uniform(
            kw, (fan_in, fan_out), jnp.float32, minval=-bound, maxval=bound)
        params[f"b{idx}"] = jax.random.uniform(
            kb, (1, fan_out), jnp.float32, minval=-bound, maxval=bound)
    return params


def reference_forward(x, p):
    """Pure-JAX reference using the same bf16-matmul / f32-accumulate recipe."""
    def lin(h, w, b):
        return jnp.dot(h.astype(jnp.bfloat16), w.astype(jnp.bfloat16),
                       preferred_element_type=jnp.float32) + b
    h = jnp.maximum(lin(x, p["w1"], p["b1"]), 0.0)
    h = jnp.maximum(lin(h, p["w2"], p["b2"]), 0.0)
    h = jnp.maximum(lin(h, p["w3"], p["b3"]), 0.0)
    # Final layer in f32 elementwise (matches the kernel's VPU reduction).
    return jnp.sum(h * p["w4"].reshape(1, -1), axis=-1, keepdims=True) + p["b4"]


if __name__ == "__main__":
    key = jax.random.PRNGKey(0)
    key, kx = jax.random.split(key)
    # Small demo batch that is NOT a tile multiple: exercises batch padding and
    # gives a 2-step grid at batch_tile=256 (keeps both v7x TensorCores busy).
    B = 300
    x = jax.random.normal(kx, (B, INPUT_SIZE), jnp.float32)
    params = init_params(key)

    out = neural_network_forward(x, params, batch_tile=256)
    out = jax.block_until_ready(out)

    ref = reference_forward(x, params)
    assert out.shape == (B, 1)
    assert jnp.allclose(out, ref, atol=1e-3, rtol=1e-3), "mismatch vs JAX reference"

    print("KERNEL_OK")
</pallas_src>

<mosaic_0001>
module attributes {stable_mosaic.version = 11 : i64} {
  func.func @mlp_kernel(%arg0: i32, %arg1: memref<256x128xbf16, #tpu.memory_space<vmem>>, %arg2: memref<128x512xbf16, #tpu.memory_space<vmem>>, %arg3: memref<1x512xf32, #tpu.memory_space<vmem>>, %arg4: memref<512x512xbf16, #tpu.memory_space<vmem>>, %arg5: memref<1x512xf32, #tpu.memory_space<vmem>>, %arg6: memref<512x256xbf16, #tpu.memory_space<vmem>>, %arg7: memref<1x256xf32, #tpu.memory_space<vmem>>, %arg8: memref<1x256xf32, #tpu.memory_space<vmem>>, %arg9: memref<1x1xf32, #tpu.memory_space<vmem>>, %arg10: memref<256x128xf32, #tpu.memory_space<vmem>>) attributes {dimension_semantics = [#tpu.dimension_semantics<parallel>], iteration_bounds = array<i64: 2>, scalar_prefetch = 0 : i64, scratch_operands = 0 : i64, tpu.core_type = #tpu.core_type<tc>, window_params = [{transform_indices = @transform_0, window_bounds = array<i64: 256, 128>}, {pipeline_mode = #tpu.pipeline_mode<synchronous>, transform_indices = @transform_1, window_bounds = array<i64: 128, 512>}, {pipeline_mode = #tpu.pipeline_mode<synchronous>, transform_indices = @transform_2, window_bounds = array<i64: 1, 512>}, {pipeline_mode = #tpu.pipeline_mode<synchronous>, transform_indices = @transform_3, window_bounds = array<i64: 512, 512>}, {pipeline_mode = #tpu.pipeline_mode<synchronous>, transform_indices = @transform_4, window_bounds = array<i64: 1, 512>}, {pipeline_mode = #tpu.pipeline_mode<synchronous>, transform_indices = @transform_5, window_bounds = array<i64: 512, 256>}, {pipeline_mode = #tpu.pipeline_mode<synchronous>, transform_indices = @transform_6, window_bounds = array<i64: 1, 256>}, {pipeline_mode = #tpu.pipeline_mode<synchronous>, transform_indices = @transform_7, window_bounds = array<i64: 1, 256>}, {pipeline_mode = #tpu.pipeline_mode<synchronous>, transform_indices = @transform_8, window_bounds = array<i64: 1, 1>}, {transform_indices = @transform_9, window_bounds = array<i64: 256, 128>}]} {
    %c0 = arith.constant 0 : index
    %c0_0 = arith.constant 0 : index
    %0 = vector.load %arg1[%c0, %c0_0] : memref<256x128xbf16, #tpu.memory_space<vmem>>, vector<256x128xbf16>
    %c0_1 = arith.constant 0 : index
    %c0_2 = arith.constant 0 : index
    %1 = vector.load %arg2[%c0_1, %c0_2] : memref<128x512xbf16, #tpu.memory_space<vmem>>, vector<128x512xbf16>
    %cst = arith.constant dense<0.000000e+00> : vector<256x512xf32>
    %2 = tpu.matmul %0, %1, %cst {dimension_numbers = #tpu.dot_dimension_numbers<[1], [0], [0], [1], [0, 0, 1, 1], [], []>} : vector<256x128xbf16>, vector<128x512xbf16>, vector<256x512xf32> -> vector<256x512xf32>
    %c0_3 = arith.constant 0 : index
    %c0_4 = arith.constant 0 : index
    %3 = vector.load %arg3[%c0_3, %c0_4] : memref<1x512xf32, #tpu.memory_space<vmem>>, vector<1x512xf32>
    %4 = vector.broadcast %3 : vector<1x512xf32> to vector<256x512xf32>
    %5 = arith.addf %2, %4 : vector<256x512xf32>
    %cst_5 = arith.constant 0.000000e+00 : f32
    %6 = vector.broadcast %cst_5 : f32 to vector<256x512xf32>
    %7 = arith.maximumf %5, %6 : vector<256x512xf32>
    %8 = arith.truncf %7 : vector<256x512xf32> to vector<256x512xbf16>
    %c0_6 = arith.constant 0 : index
    %c0_7 = arith.constant 0 : index
    %9 = vector.load %arg4[%c0_6, %c0_7] : memref<512x512xbf16, #tpu.memory_space<vmem>>, vector<512x512xbf16>
    %cst_8 = arith.constant dense<0.000000e+00> : vector<256x512xf32>
    %10 = tpu.matmul %8, %9, %cst_8 {dimension_numbers = #tpu.dot_dimension_numbers<[1], [0], [0], [1], [0, 0, 1, 1], [], []>} : vector<256x512xbf16>, vector<512x512xbf16>, vector<256x512xf32> -> vector<256x512xf32>
    %c0_9 = arith.constant 0 : index
    %c0_10 = arith.constant 0 : index
    %11 = vector.load %arg5[%c0_9, %c0_10] : memref<1x512xf32, #tpu.memory_space<vmem>>, vector<1x512xf32>
    %12 = vector.broadcast %11 : vector<1x512xf32> to vector<256x512xf32>
    %13 = arith.addf %10, %12 : vector<256x512xf32>
    %cst_11 = arith.constant 0.000000e+00 : f32
    %14 = vector.broadcast %cst_11 : f32 to vector<256x512xf32>
    %15 = arith.maximumf %13, %14 : vector<256x512xf32>
    %16 = arith.truncf %15 : vector<256x512xf32> to vector<256x512xbf16>
    %c0_12 = arith.constant 0 : index
    %c0_13 = arith.constant 0 : index
    %17 = vector.load %arg6[%c0_12, %c0_13] : memref<512x256xbf16, #tpu.memory_space<vmem>>, vector<512x256xbf16>
    %cst_14 = arith.constant dense<0.000000e+00> : vector<256x256xf32>
    %18 = tpu.matmul %16, %17, %cst_14 {dimension_numbers = #tpu.dot_dimension_numbers<[1], [0], [0], [1], [0, 0, 1, 1], [], []>} : vector<256x512xbf16>, vector<512x256xbf16>, vector<256x256xf32> -> vector<256x256xf32>
    %c0_15 = arith.constant 0 : index
    %c0_16 = arith.constant 0 : index
    %19 = vector.load %arg7[%c0_15, %c0_16] : memref<1x256xf32, #tpu.memory_space<vmem>>, vector<1x256xf32>
    %20 = vector.broadcast %19 : vector<1x256xf32> to vector<256x256xf32>
    %21 = arith.addf %18, %20 : vector<256x256xf32>
    %cst_17 = arith.constant 0.000000e+00 : f32
    %22 = vector.broadcast %cst_17 : f32 to vector<256x256xf32>
    %23 = arith.maximumf %21, %22 : vector<256x256xf32>
    %c0_18 = arith.constant 0 : index
    %c0_19 = arith.constant 0 : index
    %24 = vector.load %arg8[%c0_18, %c0_19] : memref<1x256xf32, #tpu.memory_space<vmem>>, vector<1x256xf32>
    %25 = vector.broadcast %24 : vector<1x256xf32> to vector<256x256xf32>
    %26 = arith.mulf %23, %25 : vector<256x256xf32>
    %cst_20 = arith.constant dense<0.000000e+00> : vector<256xf32>
    %27 = vector.multi_reduction <add>, %26, %cst_20 [1] : vector<256x256xf32> to vector<256xf32>
    %28 = vector.shape_cast %27 : vector<256xf32> to vector<256x1xf32>
    %c0_21 = arith.constant 0 : index
    %c0_22 = arith.constant 0 : index
    %29 = vector.load %arg9[%c0_21, %c0_22] : memref<1x1xf32, #tpu.memory_space<vmem>>, vector<1x1xf32>
    %30 = vector.broadcast %29 : vector<1x1xf32> to vector<256x1xf32>
    %31 = arith.addf %28, %30 : vector<256x1xf32>
    %32 = vector.shape_cast %31 : vector<256x1xf32> to vector<256x1xf32>
    %33 = vector.broadcast %32 : vector<256x1xf32> to vector<256x128xf32>
    %c0_23 = arith.constant 0 : index
    %c0_24 = arith.constant 0 : index
    %34 = vector.load %arg10[%c0_23, %c0_24] : memref<256x128xf32, #tpu.memory_space<vmem>>, vector<256x128xf32>
    tpu.vector_store %arg10[%c0_23, %c0_24], %33 {strides = array<i32>} : memref<256x128xf32, #tpu.memory_space<vmem>>, vector<256x128xf32>,
    return
  }
  func.func @transform_0(%arg0: i32) -> (i32, i32) {
    %c0_i32 = arith.constant 0 : i32
    %c0_i32_0 = arith.constant 0 : i32
    return %arg0, %c0_i32 : i32, i32
  }
  func.func @transform_1(%arg0: i32) -> (i32, i32) {
    %c0_i32 = arith.constant 0 : i32
    %c0_i32_0 = arith.constant 0 : i32
    %c0_i32_1 = arith.constant 0 : i32
    return %c0_i32, %c0_i32_0 : i32, i32
  }
  func.func @transform_2(%arg0: i32) -> (i32, i32) {
    %c0_i32 = arith.constant 0 : i32
    %c0_i32_0 = arith.constant 0 : i32
    %c0_i32_1 = arith.constant 0 : i32
    return %c0_i32, %c0_i32_0 : i32, i32
  }
  func.func @transform_3(%arg0: i32) -> (i32, i32) {
    %c0_i32 = arith.constant 0 : i32
    %c0_i32_0 = arith.constant 0 : i32
    %c0_i32_1 = arith.constant 0 : i32
    return %c0_i32, %c0_i32_0 : i32, i32
  }
  func.func @transform_4(%arg0: i32) -> (i32, i32) {
    %c0_i32 = arith.constant 0 : i32
    %c0_i32_0 = arith.constant 0 : i32
    %c0_i32_1 = arith.constant 0 : i32
    return %c0_i32, %c0_i32_0 : i32, i32
  }
  func.func @transform_5(%arg0: i32) -> (i32, i32) {
    %c0_i32 = arith.constant 0 : i32
    %c0_i32_0 = arith.constant 0 : i32
    %c0_i32_1 = arith.constant 0 : i32
    return %c0_i32, %c0_i32_0 : i32, i32
  }
  func.func @transform_6(%arg0: i32) -> (i32, i32) {
    %c0_i32 = arith.constant 0 : i32
    %c0_i32_0 = arith.constant 0 : i32
    %c0_i32_1 = arith.constant 0 : i32
    return %c0_i32, %c0_i32_0 : i32, i32
  }
  func.func @transform_7(%arg0: i32) -> (i32, i32) {
    %c0_i32 = arith.constant 0 : i32
    %c0_i32_0 = arith.constant 0 : i32
    %c0_i32_1 = arith.constant 0 : i32
    return %c0_i32, %c0_i32_0 : i32, i32
  }
  func.func @transform_8(%arg0: i32) -> (i32, i32) {
    %c0_i32 = arith.constant 0 : i32
    %c0_i32_0 = arith.constant 0 : i32
    %c0_i32_1 = arith.constant 0 : i32
    return %c0_i32, %c0_i32_0 : i32, i32
  }
  func.func @transform_9(%arg0: i32) -> (i32, i32) {
    %c0_i32 = arith.constant 0 : i32
    %c0_i32_0 = arith.constant 0 : i32
    return %arg0, %c0_i32 : i32, i32
  }
}

</mosaic_0001>

<bundles_post_ra>
// kernel: tpu_custom_call.1
= control target key start
LH: loop header
LB: loop body
LE: loop exit
PB: predicated region body
PF: predicated region fallthrough
CT: control target
= control target key end

     0   :  { %s6872_s0 = inlined_call_operand.hbm [shape: bf16[512,128], index: 0, kind: input, shape index: {}]   ;;  %s6873_s1 = inlined_call_operand.hbm [shape: bf16[128,512], index: 1, kind: input, shape index: {}]   ;;  %s6874_s2 = inlined_call_operand.vmem [shape: f32[1,512], index: 2, kind: input, shape index: {}]   ;;  %s6875_s3 = inlined_call_operand.hbm [shape: bf16[512,512], index: 3, kind: input, shape index: {}]   ;;  %s6876_s4 = inlined_call_operand.vmem [shape: f32[1,512], index: 4, kind: input, shape index: {}]   ;;  %s6877_s5 = inlined_call_operand.hbm [shape: bf16[512,256], index: 5, kind: input, shape index: {}]   ;;  %s6878_s6 = inlined_call_operand.vmem [shape: f32[1,256], index: 6, kind: input, shape index: {}]   ;;  %s6879_s7 = inlined_call_operand.vmem [shape: f32[1,256], index: 7, kind: input, shape index: {}]   ;;  %s6880_s8 = inlined_call_operand.<no memory space> [shape: f32[1,1], index: 8, kind: input, shape index: {}]   ;;  %s6881_s9 = inlined_call_operand.hbm [shape: f32[512,128], index: 9, kind: output, shape index: {}]  }
   0x1   :  { %v14_v0 = vstv %s6880_s8 }
   0x2   :  { %15 = vst [vmem:[#allocation2] sm:$0x1] %v14_v0 }
   0x3   :  { %16 = vsyncpa [#allocation4], 0 }
   0x4   :  { %18 = vsyncpa [#allocation4 + $0x1], 0 }
   0x5   :  { %19 = vsyncpa [#allocation7], 0 }
   0x6   :  { %20 = vsyncpa [#allocation10], 0 }
   0x7   :  { %21 = vsyncpa [#allocation5], 0 }
   0x8   :  { %23 = vsyncpa [#allocation5 + $0x1], 0  ;;  %s5783_s11 = smov 0   ;;  %s5785_s12 = smov 0  }
   0x9   :  { %s5787_s13 = smov 0   ;;  %s5789_s14 = smov 0  }
   0xa LB: > { %6912 = sst [smem:[#allocation16_spill]] %s5702_s11  ;;  %s5804_s8 = sadd.s32 4294967295, %s5714_s14   ;;  %s5714_s14 = sphi %s5789_s14, %s6982_s14   ;;  %s5710_s13 = sphi %s5787_s13, %s6981_s13   ;;  %s5706_s12 = sphi %s5785_s12, %s6980_s12   ;;  %s5702_s11 = sphi %s5783_s11, %s6979_s11  }
   0xb   : > { %s4439_s15 = sadd.s32 4294967294, %s5714_s14   ;;  %p49_p0 = scmp.ne.s32.totalorder %s5706_s12, %s5702_s11 }
   0xc   : > { %p6882_p1 = scmp.eq.s32.totalorder %s5804_s8, 0  ;;  %p247_p3 = scmp.eq.s32.totalorder %s4439_s15, 1 }
   0xd   : > { %p4440_p5 = scmp.ge.s32.totalorder %s5714_s14, 1  ;;  %p254_p7 = scmp.lt.s32.totalorder %s5714_s14, 3 }
   0xe   : > { %p5813_p4 = por %p6882_p1, %p49_p0  ;;  %p5818_p6 = por %p247_p3, %p49_p0 }
   0xf   : > { %p5823_p8 = pnand %p4440_p5, %p254_p7  ;;  %s5716_s19 = smov [#allocation6]  }
  0x10   : > { %s6913_s16 = scalar_select %p5813_p4, 1, 0 }
  0x11   : > { %s6914_s17 = scalar_select %p5818_p6, 1, 0 }
  0x12   : > { %s6916_s18 = scalar_select %p5823_p8, 1, 0 }
  0x13   : > { %6915 = sst [smem:[#allocation17_spill]] %s6914_s17  ;;  %s266_s20 = sshll.u32 %s5716_s19, 4  ;;  %s5827_s20 = int_to_ptr.vmem [resolvable:$true] %s266_s20 }
  0x14   : > { %p5102_p9 = pneg %p5823_p8  ;;  %s5717_s22 = smov [#allocation8]  }
  0x15   : > { %s282_s23 = sshll.u32 %s5717_s22, 4  ;;  %s5718_s24 = smov [#allocation9]   ;;  %s5838_s23 = int_to_ptr.vmem [resolvable:$true] %s282_s23 }
  0x16   : > { %p5834_p11 = pnand %p5102_p9, %p6882_p1  ;;  %s5840_s25 = sshll.u32 %s5718_s24, 4  ;;  %s299_s25 = int_to_ptr.vmem [resolvable:$true] %s5840_s25 }
  0x17   : > { %s5526_s28 = scalar_lea.hbm %s6873_s1, 4096 }
  0x18   : > { %p5527_p12 = scmp.ne.s32.totalorder %s6873_s1, %s5526_s28  ;;  %p5850_p13 = pneg %p5834_p11 }
  0x19   : > { %p5533_p5 = scmp.lt.u32.totalorder %s5526_s28, %s6873_s1 }
  0x1a   : > { %p5529_p0 = pnand %p5850_p13, %p5527_p12 }
  0x1c   : > { %p5530_p3 = pneg %p5529_p0 }
  0x1e   : > { %p5535_p7 = pnand %p5533_p5, %p5530_p3 }
  0x20   : > { %5538 = shalt.err (!%p5535_p7)
}
  0x21   : > { %s5539_s22 = scalar_lea.vmem %s5827_s20, 4096  ;;  %p5547_p2 = scmp.lt.s32.totalorder %s5827_s20, %s5827_s20 }
  0x22   : > { %p5540_p9 = scmp.ne.s32.totalorder %s5827_s20, %s5539_s22  ;;  %p5548_p6 = scmp.lt.s32.totalorder %s5539_s22, %s5539_s22 }
  0x24   : > { %p5542_p10 = pnand %p5540_p9, %p5850_p13  ;;  %p5549_p12 = por %p5548_p6, %p5547_p2 }
  0x26   : > { %p5543_p1 = pneg %p5542_p10 }
  0x28   : > { %p5550_p0 = pnand %p5549_p12, %p5543_p1 }
  0x2a   : > { %5553 = shalt.err (!%p5550_p0)
}
  0x2b   : > { %s5719_s24 = smov 256   ;;  %s5720_s26 = smov 16  }
  0x2c   : > { %5105 = dma.hbm_to_vmem [thread:$0]  (!%p5834_p11), %s6873_s1, 4096, %s5827_s20, [#allocation7], %s5719_s24, %s5719_s24, %s5720_s26  }
  0x2d   : > { %s5554_s15 = scalar_lea.hbm %s6875_s3, 16384 }
  0x2e   : > { %p5555_p2 = scmp.ne.s32.totalorder %s6875_s3, %s5554_s15  ;;  %p5561_p10 = scmp.lt.u32.totalorder %s5554_s15, %s6875_s3 }
  0x30   : > { %p5557_p1 = pnand %p5555_p2, %p5850_p13 }
  0x32   : > { %p5558_p6 = pneg %p5557_p1 }
  0x34   : > { %p5563_p3 = pnand %p5561_p10, %p5558_p6 }
  0x36   : > { %5566 = shalt.err (!%p5563_p3)
}
  0x37   : > { %s5567_s20 = scalar_lea.vmem %s5838_s23, 16384  ;;  %p5575_p12 = scmp.lt.s32.totalorder %s5838_s23, %s5838_s23 }
  0x38   : > { %p5568_p5 = scmp.ne.s32.totalorder %s5838_s23, %s5567_s20  ;;  %p5576_p0 = scmp.lt.s32.totalorder %s5567_s20, %s5567_s20 }
  0x3a   : > { %p5570_p7 = pnand %p5568_p5, %p5850_p13  ;;  %p5577_p2 = por %p5576_p0, %p5575_p12 }
  0x3c   : > { %p5571_p9 = pneg %p5570_p7 }
  0x3e   : > { %p5578_p1 = pnand %p5577_p2, %p5571_p9 }
  0x40   : > { %5581 = shalt.err (!%p5578_p1)
}
  0x41   : > { %5108 = dma.hbm_to_vmem [thread:$0]  (!%p5834_p11), %s6875_s3, 16384, %s5838_s23, [#allocation7], %s5719_s24, %s5719_s24, %s5720_s26  }
  0x42   : > { %s5582_s29 = scalar_lea.hbm %s6877_s5, 8192 }
  0x43   : > { %p5583_p6 = scmp.ne.s32.totalorder %s6877_s5, %s5582_s29  ;;  %p5589_p5 = scmp.lt.u32.totalorder %s5582_s29, %s6877_s5 }
  0x45   : > { %p5585_p10 = pnand %p5583_p6, %p5850_p13 }
  0x47   : > { %p5586_p3 = pneg %p5585_p10 }
  0x49   : > { %p5591_p7 = pnand %p5589_p5, %p5586_p3 }
  0x4b   : > { %5594 = shalt.err (!%p5591_p7)
}
  0x4c   : > { %s5595_s20 = scalar_lea.vmem %s299_s25, 8192  ;;  %p5603_p2 = scmp.lt.s32.totalorder %s299_s25, %s299_s25 }
  0x4d   : > { %p5596_p9 = scmp.ne.s32.totalorder %s299_s25, %s5595_s20  ;;  %p5604_p1 = scmp.lt.s32.totalorder %s5595_s20, %s5595_s20 }
  0x4f   : > { %p5598_p12 = pnand %p5596_p9, %p5850_p13  ;;  %p5605_p4 = por %p5604_p1, %p5603_p2 }
  0x51   : > { %p5599_p0 = pneg %p5598_p12 }
  0x53   : > { %p5606_p8 = pnand %p5605_p4, %p5599_p0 }
  0x55   : > { %5609 = shalt.err (!%p5606_p8)
}
  0x56   : > { %s5721_s23 = smov 128   ;;  %s5722_s10 = smov 8  }
  0x57   : > { %5111 = dma.hbm_to_vmem [thread:$0]  (!%p5834_p11), %s6877_s5, 8192, %s299_s25, [#allocation10], %s5721_s23, %s5721_s23, %s5722_s10  }
  0x58   : > { %s5914_s11 = sadd.s32 1, %s5714_s14   ;;  %s36_s27 = sadd.s32 1, %s5710_s13 }
  0x59   : > { %s33_s17 = ssub.s32 %s5714_s14, %s5914_s11  ;;  %p43_p8 = scmp.ne.s32.totalorder %s5710_s13, %s5706_s12 }
  0x5a   : > { %p34_p4 = scmp.eq.s32.totalorder %s33_s17, 0  ;;  %p44_p13 = scmp.eq.s32.totalorder %s5714_s14, 0 }
  0x5b   : > { %p5123_p6 = scmp.lt.s32.totalorder %s5714_s14, 2  ;;  %p6919_p3 = scmp.eq.s32.totalorder %s5804_s8, 1 }
  0x5c   : > { %s5924_s28 = scalar_select %p34_p4, %s5710_s13, %s36_s27  }
  0x5d   : > { %p45_p10 = por %p44_p13, %p43_p8  ;;  %p5928_p5 = por %p6919_p3, %p43_p8 }
  0x5e   : > { %s321_s21 = sand.u32 1, %s5710_s13   ;;  %s4700_s30 = sshll.u32 %s5714_s14, 11 }
  0x5f   : > { %s4445_s25 = sshll.u32 %s321_s21, 7  ;;  %s5937_s22 = scalar_lea.hbm %s6872_s0, %s4700_s30 }
  0x60   : > { %s325_s20 = scalar_lea.vmem [#allocation3], %s4445_s25  ;;  %p5939_p11 = pnand %p5123_p6, %p45_p10 }
  0x61   : > { %s332_s23 = sshll.u32 %s325_s20, 4  ;;  %s5945_s24 = scalar_lea.sflag [#allocation4], %s321_s21  ;;  %s5943_s23 = int_to_ptr.vmem [resolvable:$true] %s332_s23 }
  0x62   : > { %s5610_s26 = scalar_lea.hbm %s5937_s22, 2048  ;;  %p5612_p9 = pneg %p5939_p11 }
  0x63   : > { %p5611_p7 = scmp.ne.s32.totalorder %s5937_s22, %s5610_s26  ;;  %s5615_s30 = scalar_lea.hbm %s6872_s0, 4096 }
  0x64   : > { %p5616_p2 = scmp.lt.u32.totalorder %s5937_s22, %s6872_s0  ;;  %p5617_p1 = scmp.lt.u32.totalorder %s5615_s30, %s5610_s26 }
  0x65   : > { %p5613_p12 = pnand %p5612_p9, %p5611_p7  ;;  %p5619_p8 = scmp.lt.u32.totalorder %s5610_s26, %s5937_s22 }
  0x66   : > { %p5618_p4 = por %p5617_p1, %p5616_p2 }
  0x67   : > { %p5614_p0 = pneg %p5613_p12 }
  0x68   : > { %p5620_p13 = por %p5619_p8, %p5618_p4 }
  0x6a   : > { %p5621_p6 = pnand %p5620_p13, %p5614_p0 }
  0x6c   : > { %5624 = shalt.err (!%p5621_p6)
}
  0x6d   : > { %s5625_s21 = scalar_lea.vmem %s5943_s23, 2048  ;;  %s5723_s19 = smov [#allocation3]  }
  0x6e   : > { %p5626_p10 = scmp.ne.s32.totalorder %s5943_s23, %s5625_s21  ;;  %s5630_s20 = sshll.u32 %s5723_s19, 4  ;;  %s5631_s20 = int_to_ptr.vmem [resolvable:$false] %s5630_s20 }
  0x6f   : > { %s5632_s17 = scalar_lea.vmem %s5631_s20, 4096  ;;  %p5633_p12 = scmp.lt.s32.totalorder %s5943_s23, %s5631_s20 }
  0x70   : > { %p5628_p3 = pnand %p5626_p10, %p5612_p9  ;;  %p5634_p2 = scmp.lt.s32.totalorder %s5632_s17, %s5625_s21 }
  0x72   : > { %p5629_p7 = pneg %p5628_p3  ;;  %p5635_p1 = por %p5634_p2, %p5633_p12 }
  0x74   : > { %p5636_p4 = pnand %p5635_p1, %p5629_p7 }
  0x76   : > { %5639 = shalt.err (!%p5636_p4)
}
  0x77   : > { %s5724_s26 = smov 64   ;;  %s5725_s27 = smov 4  }
  0x78   : > { %5115 = dma.hbm_to_vmem [thread:$0]  (!%p5939_p11), %s5937_s22, 2048, %s5943_s23, %s5945_s24, %s5724_s26, %s5724_s26, %s5725_s27  }
  0x79   : > { %p6922_p9 = scmp.ne.s32.totalorder %s6916_s18, 0 }
  0x7b   : > { %344 = sbr.rel (%p6922_p9) target bundleno = 1506 (0x5e2), region = 56 }
  0x82   : > { %s5976_s30 = sand.u32 1, %s5706_s12   ;;  %p6923_p0 = scmp.ne.s32.totalorder %s6913_s16, 0 }
  0x83   : > { %s4449_s25 = sshll.u32 %s5976_s30, 7  ;;  %s347_s15 = scalar_lea.sflag [#allocation4], %s5976_s30 }
  0x84   : > { %s5980_s21 = scalar_lea.vmem [#allocation3], %s4449_s25 }
  0x85   : > { %5685 = dma.done.wait (%p6923_p0), %s347_s15, 2048  }
  0x86   : > { %5687 = vsyncadd (%p6923_p0), %s347_s15, 4294965248  ;;  %p6924_p11 = scmp.eq.s32.totalorder %s5804_s8, 0 }
  0x88   : > { %5689 = dma.done.wait (%p6924_p11), [#allocation7], 20480   ;;  %p6925_p8 = pmov %p6924_p11 }
  0x8a   : > { %5691 = vsyncadd (%p6925_p8), [#allocation7], 4294946816  ;;  %p6926_p13 = pmov %p6925_p8 }
  0x8b   : > { %p6927_p6 = pmov %p6925_p8 }
  0x8c   : > { %5693 = dma.done.wait (%p6926_p13), [#allocation10], 8192  }
  0x8d   : > { %5695 = vsyncadd (%p6927_p6), [#allocation10], 4294959104  ;;  %v5726_v1 = vmov 0   ;;  %v5174_v2 = vld [vmem:[#allocation6 + $0x4] ss:$16 sps:$4 sm:$0xff]   ;;  %v5223_v39 = vld [vmem:[%s5980_s21 + $0x8] sm:$0xff]  }
  0x8e   : > { %774 = vmatprep.mubr.bf16.mxu0 %v5726_v1  ;;  %967 = vmatprep.mubr.bf16.mxu1 %v5726_v1  ;;  %v5176_v3 = vld [vmem:[#allocation6] ss:$16 sps:$4 sm:$0xff]   ;;  %v5177_v4 = vld [vmem:[#allocation6 + $0xc] ss:$16 sps:$4 sm:$0xff]   ;;  %v5179_v5 = vld [vmem:[#allocation6 + $0x8] ss:$16 sps:$4 sm:$0xff]  }
  0x8f   : > { %5172 = vset.pattern.permute.xlu0 %v5726_v1  ;;  %5173 = vset.pattern.permute.xlu1 %v5726_v1  ;;  %v5180_v6 = vld [vmem:[#allocation6 + $0x24] ss:$16 sps:$4 sm:$0xff]   ;;  %v5182_v7 = vld [vmem:[#allocation6 + $0x20] ss:$16 sps:$4 sm:$0xff]   ;;  %v5183_v8 = vld [vmem:[#allocation6 + $0x2c] ss:$16 sps:$4 sm:$0xff]  }
  0x90   : > { %742 = vmatprep.subr.bf16.mxu0 %v5174_v2  ;;  %935 = vmatprep.subr.bf16.mxu1 %v5177_v4  ;;  %v5185_v9 = vld [vmem:[#allocation6 + $0x28] ss:$16 sps:$4 sm:$0xff]   ;;  %v5186_v10 = vld [vmem:[#allocation6 + $0x44] ss:$16 sps:$4 sm:$0xff]   ;;  %v5188_v11 = vld [vmem:[#allocation6 + $0x40] ss:$16 sps:$4 sm:$0xff]  }
  0x91   : > { %743 = vmatpush1.bf16.msra.mxu0 %v5176_v3  ;;  %936 = vmatpush1.bf16.msra.mxu1 %v5179_v5  ;;  %v5189_v12 = vld [vmem:[#allocation6 + $0x4c] ss:$16 sps:$4 sm:$0xff]   ;;  %v5192_v13 = vld [vmem:[#allocation6 + $0x64] ss:$16 sps:$4 sm:$0xff]   ;;  %v5191_v14 = vld [vmem:[#allocation6 + $0x48] ss:$16 sps:$4 sm:$0xff]  }
  0x92   : > { %744 = vmatprep.subr.bf16.mxu0 %v5180_v6  ;;  %937 = vmatprep.subr.bf16.mxu1 %v5183_v8  ;;  %v5195_v15 = vld [vmem:[#allocation6 + $0x6c] ss:$16 sps:$4 sm:$0xff]   ;;  %v5194_v16 = vld [vmem:[#allocation6 + $0x60] ss:$16 sps:$4 sm:$0xff]   ;;  %v5198_v17 = vld [vmem:[#allocation6 + $0x84] ss:$16 sps:$4 sm:$0xff]  }
  0x93   : > { %v5197_v18 = vld [vmem:[#allocation6 + $0x68] ss:$16 sps:$4 sm:$0xff]   ;;  %v5201_v19 = vld [vmem:[#allocation6 + $0x8c] ss:$16 sps:$4 sm:$0xff]   ;;  %v5200_v20 = vld [vmem:[#allocation6 + $0x80] ss:$16 sps:$4 sm:$0xff]  }
  0x94   : > { %v5204_v21 = vld [vmem:[#allocation6 + $0xa4] ss:$16 sps:$4 sm:$0xff]   ;;  %v5203_v22 = vld [vmem:[#allocation6 + $0x88] ss:$16 sps:$4 sm:$0xff]   ;;  %v5207_v23 = vld [vmem:[#allocation6 + $0xac] ss:$16 sps:$4 sm:$0xff]  }
  0x95   : > { %745 = vmatpush1.bf16.msra.mxu0 %v5182_v7  ;;  %938 = vmatpush1.bf16.msra.mxu1 %v5185_v9  ;;  %v5206_v24 = vld [vmem:[#allocation6 + $0xa0] ss:$16 sps:$4 sm:$0xff]   ;;  %v5210_v25 = vld [vmem:[#allocation6 + $0xc4] ss:$16 sps:$4 sm:$0xff]   ;;  %v5209_v26 = vld [vmem:[#allocation6 + $0xa8] ss:$16 sps:$4 sm:$0xff]  }
  0x96   : > { %746 = vmatprep.subr.bf16.mxu0 %v5186_v10  ;;  %939 = vmatprep.subr.bf16.mxu1 %v5189_v12  ;;  %v5213_v27 = vld [vmem:[#allocation6 + $0xcc] ss:$16 sps:$4 sm:$0xff]   ;;  %v5212_v28 = vld [vmem:[#allocation6 + $0xc0] ss:$16 sps:$4 sm:$0xff]   ;;  %v5216_v29 = vld [vmem:[#allocation6 + $0xe4] ss:$16 sps:$4 sm:$0xff]  }
  0x97   : > { %v5215_v30 = vld [vmem:[#allocation6 + $0xc8] ss:$16 sps:$4 sm:$0xff]   ;;  %v5219_v31 = vld [vmem:[#allocation6 + $0xec] ss:$16 sps:$4 sm:$0xff]   ;;  %v5218_v32 = vld [vmem:[#allocation6 + $0xe0] ss:$16 sps:$4 sm:$0xff]  }
  0x98   : > { %v5221_v33 = vld [vmem:[#allocation6 + $0xe8] ss:$16 sps:$4 sm:$0xff]   ;;  %v5222_v34 = vld [vmem:[%s5980_s21] sm:$0xff]   ;;  %v5224_v44 = vld [vmem:[%s5980_s21 + $0x10] sm:$0xff]   ;;  %s4453_s17 = sshll.u32 %s5976_s30, 8  ;;  %s4701_s27 = sshll.u32 %s5804_s8, 12 }
  0x99   : > { %747 = vmatpush1.bf16.msra.mxu0 %v5188_v11  ;;  %940 = vmatpush1.bf16.msra.mxu1 %v5191_v14  ;;  %v5234_v35 = vld [vmem:[#allocation8] ss:$16 sps:$4 sm:$0xff]   ;;  %v5236_v36 = vld [vmem:[#allocation8 + $0x4] ss:$16 sps:$4 sm:$0xff]   ;;  %v5225_v52 = vld [vmem:[%s5980_s21 + $0x18] sm:$0xff]   ;;  %s6787_s26 = scalar_lea.vmem [#allocation11], %s4453_s17  ;;  %s6824_s16 = scalar_lea.hbm %s6881_s9, %s4701_s27 }
  0x9a   : > { %748 = vmatprep.subr.bf16.mxu0 %v5192_v13  ;;  %941 = vmatprep.subr.bf16.mxu1 %v5195_v15  ;;  %v5240_v37 = vld [vmem:[#allocation8 + $0x24] ss:$16 sps:$4 sm:$0xff]   ;;  %v5238_v38 = vld [vmem:[#allocation8 + $0x20] ss:$16 sps:$4 sm:$0xff]   ;;  %v5227_v7 = vld [vmem:[%s5980_s21 + $0x28] sm:$0xff]   ;;  %s4337_s25 = sshll.u32 %s6787_s26, 4  ;;  %s6826_s25 = int_to_ptr.vmem [resolvable:$true] %s4337_s25 }
  0x9b   : > { %v5244_v40 = vld [vmem:[#allocation8 + $0x44] ss:$16 sps:$4 sm:$0xff]   ;;  %v5242_v41 = vld [vmem:[#allocation8 + $0x40] ss:$16 sps:$4 sm:$0xff]   ;;  %s4324_s18 = scalar_lea.sflag [#allocation5], %s5976_s30  ;;  %s5640_s22 = scalar_lea.vmem %s6826_s25, 4096 }
  0x9c   : > { %v5248_v42 = vld [vmem:[#allocation8 + $0x64] ss:$16 sps:$4 sm:$0xff]   ;;  %v5246_v43 = vld [vmem:[#allocation8 + $0x60] ss:$16 sps:$4 sm:$0xff]   ;;  %p5641_p10 = scmp.ne.s32.totalorder %s6826_s25, %s5640_s22  ;;  %s5727_s8 = smov [#allocation11]  }
  0x9d   : > { %749 = vmatpush1.bf16.msra.mxu0 %v5194_v16  ;;  %942 = vmatpush1.bf16.msra.mxu1 %v5197_v18  ;;  %v5252_v45 = vld [vmem:[#allocation8 + $0x84] ss:$16 sps:$4 sm:$0xff]   ;;  %v5250_v46 = vld [vmem:[#allocation8 + $0x80] ss:$16 sps:$4 sm:$0xff]   ;;  %s5644_s23 = sshll.u32 %s5727_s8, 4  ;;  %s5645_s23 = int_to_ptr.vmem [resolvable:$false] %s5644_s23 }
  0x9e   : > { %750 = vmatprep.subr.bf16.mxu0 %v5198_v17  ;;  %943 = vmatprep.subr.bf16.mxu1 %v5201_v19  ;;  %v5255_v47 = vld [vmem:[#allocation8 + $0xa4] ss:$16 sps:$4 sm:$0xff]   ;;  %v5265_v48 = vld [vmem:[#allocation8 + $0x200] ss:$16 sps:$4 sm:$0xff]   ;;  %p5642_p3 = pnand %p5641_p10, %p5928_p5  ;;  %s5646_s10 = scalar_lea.vmem %s5645_s23, 8192 }
  0x9f   : > { %v5267_v49 = vld [vmem:[#allocation8 + $0x204] ss:$16 sps:$4 sm:$0xff]   ;;  %v5253_v51 = vld [vmem:[#allocation8 + $0xa0] ss:$16 sps:$4 sm:$0xff]   ;;  %p5647_p12 = scmp.lt.s32.totalorder %s6826_s25, %s5645_s23  ;;  %p5648_p2 = scmp.lt.s32.totalorder %s5646_s10, %s5640_s22 }
  0xa0   : > { %v5270_v50 = vld [vmem:[#allocation8 + $0x224] ss:$16 sps:$4 sm:$0xff]   ;;  %v5268_v54 = vld [vmem:[#allocation8 + $0x220] ss:$16 sps:$4 sm:$0xff]   ;;  %p5643_p7 = pneg %p5642_p3 }
  0xa1   : > { %751 = vmatpush1.bf16.msra.mxu0 %v5200_v20  ;;  %944 = vmatpush1.bf16.msra.mxu1 %v5203_v22  ;;  %v5258_v53 = vld [vmem:[#allocation8 + $0xc4] ss:$16 sps:$4 sm:$0xff]   ;;  %v5256_v56 = vld [vmem:[#allocation8 + $0xc0] ss:$16 sps:$4 sm:$0xff]   ;;  %p5649_p1 = por %p5648_p2, %p5647_p12 }
  0xa2   : > { %752 = vmatprep.subr.bf16.mxu0 %v5204_v21  ;;  %945 = vmatprep.subr.bf16.mxu1 %v5207_v23  ;;  %v5276_v55 = vld [vmem:[#allocation8 + $0x244] ss:$16 sps:$4 sm:$0xff]   ;;  %v5274_v58 = vld [vmem:[#allocation8 + $0x240] ss:$16 sps:$4 sm:$0xff]  }
  0xa3   : > { %v5261_v57 = vld [vmem:[#allocation8 + $0xe4] ss:$16 sps:$4 sm:$0xff]   ;;  %v5259_v60 = vld [vmem:[#allocation8 + $0xe0] ss:$16 sps:$4 sm:$0xff]   ;;  %p5650_p4 = pnand %p5649_p1, %p5643_p7 }
  0xa4   : > { %v5279_v59 = vld [vmem:[#allocation8 + $0x264] ss:$16 sps:$4 sm:$0xff]   ;;  %v5277_v63 = vld [vmem:[#allocation8 + $0x260] ss:$16 sps:$4 sm:$0xff]  }
  0xa5   : > { %753 = vmatpush1.bf16.msra.mxu0 %v5206_v24  ;;  %946 = vmatpush1.bf16.msra.mxu1 %v5209_v26  ;;  %v5226_v61 = vld [vmem:[%s5980_s21 + $0x20] sm:$0xff]   ;;  %v5228_v16 = vld [vmem:[%s5980_s21 + $0x30] sm:$0xff]  }
  0xa6   : > { %754 = vmatprep.subr.bf16.mxu0 %v5210_v25  ;;  %947 = vmatprep.subr.bf16.mxu1 %v5213_v27  ;;  %v5264_v62 = vld [vmem:[#allocation8 + $0x104] ss:$16 sps:$4 sm:$0xff]   ;;  %v5262_v2 = vld [vmem:[#allocation8 + $0x100] ss:$16 sps:$4 sm:$0xff]   ;;  %v5229_v25 = vld [vmem:[%s5980_s21 + $0x38] sm:$0xff]  }
  0xa7   : > { %v5285_v0 = vld [vmem:[#allocation8 + $0x284] ss:$16 sps:$4 sm:$0xff]   ;;  %v5283_v4 = vld [vmem:[#allocation8 + $0x280] ss:$16 sps:$4 sm:$0xff]  }
  0xa8   : > { %v5273_v3 = vld [vmem:[#allocation8 + $0x124] ss:$16 sps:$4 sm:$0xff]   ;;  %v5271_v6 = vld [vmem:[#allocation8 + $0x120] ss:$16 sps:$4 sm:$0xff]  }
  0xa9   : > { %755 = vmatpush1.bf16.msra.mxu0 %v5212_v28  ;;  %948 = vmatpush1.bf16.msra.mxu1 %v5215_v30  ;;  %v5288_v5 = vld [vmem:[#allocation8 + $0x2a4] ss:$16 sps:$4 sm:$0xff]   ;;  %v5286_v9 = vld [vmem:[#allocation8 + $0x2a0] ss:$16 sps:$4 sm:$0xff]  }
  0xaa   : > { %756 = vmatprep.subr.bf16.mxu0 %v5216_v29  ;;  %949 = vmatprep.subr.bf16.mxu1 %v5219_v31  ;;  %v5282_v8 = vld [vmem:[#allocation8 + $0x144] ss:$16 sps:$4 sm:$0xff]   ;;  %v5280_v11 = vld [vmem:[#allocation8 + $0x140] ss:$16 sps:$4 sm:$0xff]  }
  0xab   : > { %v5294_v10 = vld [vmem:[#allocation8 + $0x2c4] ss:$16 sps:$4 sm:$0xff]   ;;  %v5292_v13 = vld [vmem:[#allocation8 + $0x2c0] ss:$16 sps:$4 sm:$0xff]  }
  0xac   : > { %v5291_v12 = vld [vmem:[#allocation8 + $0x164] ss:$16 sps:$4 sm:$0xff]   ;;  %v5289_v15 = vld [vmem:[#allocation8 + $0x160] ss:$16 sps:$4 sm:$0xff]  }
  0xad   : > { %757 = vmatpush1.bf16.msra.mxu0 %v5218_v32  ;;  %950 = vmatpush1.bf16.msra.mxu1 %v5221_v33  ;;  %v5297_v14 = vld [vmem:[#allocation8 + $0x2e4] ss:$16 sps:$4 sm:$0xff]   ;;  %v5295_v18 = vld [vmem:[#allocation8 + $0x2e0] ss:$16 sps:$4 sm:$0xff]  }
  0xae   : > { %2110 = vmatprep.subr.bf16.mxu1 %v5236_v36  ;;  %2303 = vmatprep.subr.bf16.mxu0 %v5267_v49  ;;  %v5300_v17 = vld [vmem:[#allocation8 + $0x184] ss:$16 sps:$4 sm:$0xff]   ;;  %v5298_v20 = vld [vmem:[#allocation8 + $0x180] ss:$16 sps:$4 sm:$0xff]   ;;  %v5231_v36 = vld [vmem:[%s5980_s21 + $0x48] sm:$0xff]  }
  0xaf   : > { %v5303_v19 = vld [vmem:[#allocation8 + $0x304] ss:$16 sps:$4 sm:$0xff]   ;;  %v5301_v22 = vld [vmem:[#allocation8 + $0x300] ss:$16 sps:$4 sm:$0xff]   ;;  %v5241_v49 = vld [vmem:[%s5980_s21 + $0x68] sm:$0xff]  }
  0xb0   : > { %775 = vmatmul.mubr.bf16.vlgmr.msra.gmra.mrb[0].mxu0 %v5222_v34  ;;  %968 = vmatmul.mubr.bf16.vlgmr.msra.gmra.mrb[0].mxu1 %v5222_v34  ;;  %v5309_v21 = vld [vmem:[#allocation8 + $0x1a4] ss:$16 sps:$4 sm:$0xff]   ;;  %v5307_v24 = vld [vmem:[#allocation8 + $0x1a0] ss:$16 sps:$4 sm:$0xff]  }
  0xb1   : > { %784 = vmatprep.mubr.bf16.mxu0 %v5726_v1  ;;  %977 = vmatprep.mubr.bf16.mxu1 %v5726_v1  ;;  %v5306_v23 = vld [vmem:[#allocation8 + $0x324] ss:$16 sps:$4 sm:$0xff]   ;;  %v5304_v27 = vld [vmem:[#allocation8 + $0x320] ss:$16 sps:$4 sm:$0xff]  }
  0xb2   : > { %2111 = vmatpush1.bf16.msra.mxu1 %v5234_v35  ;;  %2304 = vmatpush1.bf16.msra.mxu0 %v5265_v48  ;;  %v5318_v26 = vld [vmem:[#allocation8 + $0x1c4] ss:$16 sps:$4 sm:$0xff]   ;;  %v5316_v29 = vld [vmem:[#allocation8 + $0x1c0] ss:$16 sps:$4 sm:$0xff]   ;;  %v5336_v48 = vld [vmem:[#allocation8 + $0xc] ss:$16 sps:$4 sm:$0xff]  }
  0xb3   : > { %2112 = vmatprep.subr.bf16.mxu1 %v5240_v37  ;;  %2305 = vmatprep.subr.bf16.mxu0 %v5270_v50  ;;  %v5312_v28 = vld [vmem:[#allocation8 + $0x344] ss:$16 sps:$4 sm:$0xff]   ;;  %v5310_v30 = vld [vmem:[#allocation8 + $0x340] ss:$16 sps:$4 sm:$0xff]  }
  0xb4   : > { %v5315_v31 = vld [vmem:[#allocation8 + $0x364] ss:$16 sps:$4 sm:$0xff]   ;;  %v5313_v33 = vld [vmem:[#allocation8 + $0x360] ss:$16 sps:$4 sm:$0xff]  }
  0xb5   : > { %v5230_v32 = vld [vmem:[%s5980_s21 + $0x40] sm:$0xff]   ;;  %v5232_v37 = vld [vmem:[%s5980_s21 + $0x50] sm:$0xff]  }
  0xb6   : > { %2113 = vmatpush1.bf16.msra.mxu1 %v5238_v38  ;;  %2306 = vmatpush1.bf16.msra.mxu0 %v5268_v54  ;;  %v5321_v34 = vld [vmem:[#allocation8 + $0x384] ss:$16 sps:$4 sm:$0xff]   ;;  %v5319_v35 = vld [vmem:[#allocation8 + $0x380] ss:$16 sps:$4 sm:$0xff]   ;;  %v5233_v38 = vld [vmem:[%s5980_s21 + $0x58] sm:$0xff]  }
  0xb7   : > { %2114 = vmatprep.subr.bf16.mxu1 %v5244_v40  ;;  %2307 = vmatprep.subr.bf16.mxu0 %v5276_v55  ;;  %v5322_v40 = vld [vmem:[#allocation8 + $0x3a0] ss:$16 sps:$4 sm:$0xff]  }
  0xb8   : > { %785 = vmatmul.mubr.bf16.gmra.mrb[4].mxu0 %v5223_v39  ;;  %978 = vmatmul.mubr.bf16.gmra.mrb[4].mxu1 %v5223_v39  ;;  %v5324_v39 = vld [vmem:[#allocation8 + $0x3a4] ss:$16 sps:$4 sm:$0xff]   ;;  %v464_v55 = vld [vmem:[%s6874_s2] sm:$0xf] }
  0xb9   : > { %794 = vmatprep.mubr.bf16.mxu0 %v5726_v1  ;;  %987 = vmatprep.mubr.bf16.mxu1 %v5726_v1  ;;  %v5245_v50 = vld [vmem:[%s5980_s21 + $0x70] sm:$0xff]  }
  0xba   : > { %2115 = vmatpush1.bf16.msra.mxu1 %v5242_v41  ;;  %2308 = vmatpush1.bf16.msra.mxu0 %v5274_v58  ;;  %v5330_v41 = vld [vmem:[#allocation8 + $0x3c4] ss:$16 sps:$4 sm:$0xff]  }
  0xbb   : > { %2116 = vmatprep.subr.bf16.mxu1 %v5248_v42  ;;  %2309 = vmatprep.subr.bf16.mxu0 %v5279_v59  ;;  %v5328_v42 = vld [vmem:[#allocation8 + $0x3c0] ss:$16 sps:$4 sm:$0xff]  }
  0xbe   : > { %2117 = vmatpush1.bf16.msra.mxu1 %v5246_v43  ;;  %2310 = vmatpush1.bf16.msra.mxu0 %v5277_v63  ;;  %v5327_v43 = vld [vmem:[#allocation8 + $0x1e4] ss:$16 sps:$4 sm:$0xff]  }
  0xbf   : > { %2118 = vmatprep.subr.bf16.mxu1 %v5252_v45  ;;  %2311 = vmatprep.subr.bf16.mxu0 %v5285_v0  ;;  %v5333_v45 = vld [vmem:[#allocation8 + $0x3e4] ss:$16 sps:$4 sm:$0xff]  }
  0xc0   : > { %795 = vmatmul.mubr.bf16.gmra.mrb[8].mxu0 %v5224_v44  ;;  %988 = vmatmul.mubr.bf16.gmra.mrb[8].mxu1 %v5224_v44  ;;  %v5325_v44 = vld [vmem:[#allocation8 + $0x1e0] ss:$16 sps:$4 sm:$0xff]  }
  0xc1   : > { %804 = vmatprep.mubr.bf16.mxu0 %v5726_v1  ;;  %997 = vmatprep.mubr.bf16.mxu1 %v5726_v1 }
  0xc2   : > { %2119 = vmatpush1.bf16.msra.mxu1 %v5250_v46  ;;  %2312 = vmatpush1.bf16.msra.mxu0 %v5283_v4  ;;  %v5331_v46 = vld [vmem:[#allocation8 + $0x3e0] ss:$16 sps:$4 sm:$0xff]  }
  0xc3   : > { %2120 = vmatprep.subr.bf16.mxu1 %v5255_v47  ;;  %2313 = vmatprep.subr.bf16.mxu0 %v5288_v5  ;;  %v5237_v47 = vld [vmem:[%s5980_s21 + $0x60] sm:$0xff]  }
  0xc6   : > { %2121 = vmatpush1.bf16.msra.mxu1 %v5253_v51  ;;  %2314 = vmatpush1.bf16.msra.mxu0 %v5286_v9  ;;  %v5249_v51 = vld [vmem:[%s5980_s21 + $0x78] sm:$0xff]  }
  0xc7   : > { %2122 = vmatprep.subr.bf16.mxu1 %v5258_v53  ;;  %2315 = vmatprep.subr.bf16.mxu0 %v5294_v10 }
  0xc8   : > { %805 = vmatmul.mubr.bf16.gmra.mrb[12].mxu0 %v5225_v52  ;;  %998 = vmatmul.mubr.bf16.gmra.mrb[12].mxu1 %v5225_v52  ;;  %v466_v52 = vlaneseq }
  0xc9   : > { %814 = vmatprep.mubr.bf16.mxu0 %v5726_v1  ;;  %1007 = vmatprep.mubr.bf16.mxu1 %v5726_v1 }
  0xca   : > { %2123 = vmatpush1.bf16.msra.mxu1 %v5256_v56  ;;  %2316 = vmatpush1.bf16.msra.mxu0 %v5292_v13  ;;  %v6044_v53 = vshrl.u32 %v466_v52, 7 }
  0xcb   : > { %2124 = vmatprep.subr.bf16.mxu1 %v5261_v57  ;;  %2317 = vmatprep.subr.bf16.mxu0 %v5297_v14 }
  0xcc   : > { %6928 = vst [vmem:[#allocation18_spill] sm:$0xff] %v6044_v53  ;;  %v6047_v54 = vsub.s32 0, %v6044_v53  ;;  %v6053_v56 = vsub.s32 1, %v6044_v53  ;;  %v6888_v57 = vsub.s32 2, %v6044_v53 }
  0xce   : > { %2125 = vmatpush1.bf16.msra.mxu1 %v5259_v60  ;;  %2318 = vmatpush1.bf16.msra.mxu0 %v5295_v18  ;;  %v6058_v58 = vrot.slane %v464_v55, %v6047_v54  ;;  %v6061_v59 = vrot.slane %v464_v55, %v6053_v56  ;;  %v6065_v60 = vrot.slane %v464_v55, %v6888_v57 }
  0xcf   : > { %2126 = vmatprep.subr.bf16.mxu1 %v5264_v62  ;;  %2319 = vmatprep.subr.bf16.mxu0 %v5303_v19 }
  0xd0   : > { %815 = vmatmul.mubr.bf16.gmra.mrb[16].mxu0 %v5226_v61  ;;  %1008 = vmatmul.mubr.bf16.gmra.mrb[16].mxu1 %v5226_v61 }
  0xd1   : > { %824 = vmatprep.mubr.bf16.mxu0 %v5726_v1  ;;  %1017 = vmatprep.mubr.bf16.mxu1 %v5726_v1 }
  0xd2   : > { %2127 = vmatpush1.bf16.msra.mxu1 %v5262_v2  ;;  %2320 = vmatpush1.bf16.msra.mxu0 %v5301_v22 }
  0xd3   : > { %2128 = vmatprep.subr.bf16.mxu1 %v5273_v3  ;;  %2321 = vmatprep.subr.bf16.mxu0 %v5306_v23 }
  0xd6   : > { %2129 = vmatpush1.bf16.msra.mxu1 %v5271_v6  ;;  %2322 = vmatpush1.bf16.msra.mxu0 %v5304_v27 }
  0xd7   : > { %2130 = vmatprep.subr.bf16.mxu1 %v5282_v8  ;;  %2323 = vmatprep.subr.bf16.mxu0 %v5312_v28 }
  0xd8   : > { %825 = vmatmul.mubr.bf16.gmra.mrb[20].mxu0 %v5227_v7  ;;  %1018 = vmatmul.mubr.bf16.gmra.mrb[20].mxu1 %v5227_v7 }
  0xd9   : > { %834 = vmatprep.mubr.bf16.mxu0 %v5726_v1  ;;  %1027 = vmatprep.mubr.bf16.mxu1 %v5726_v1 }
  0xda   : > { %2131 = vmatpush1.bf16.msra.mxu1 %v5280_v11  ;;  %2324 = vmatpush1.bf16.msra.mxu0 %v5310_v30  ;;  %v5339_v30 = vld [vmem:[#allocation8 + $0x2c] ss:$16 sps:$4 sm:$0xff]  }
  0xdb   : > { %2132 = vmatprep.subr.bf16.mxu1 %v5291_v12  ;;  %2325 = vmatprep.subr.bf16.mxu0 %v5315_v31 }
  0xde   : > { %2133 = vmatpush1.bf16.msra.mxu1 %v5289_v15  ;;  %2326 = vmatpush1.bf16.msra.mxu0 %v5313_v33 }
  0xdf   : > { %2134 = vmatprep.subr.bf16.mxu1 %v5300_v17  ;;  %2327 = vmatprep.subr.bf16.mxu0 %v5321_v34 }
  0xe0   : > { %835 = vmatmul.mubr.bf16.gmra.mrb[24].mxu0 %v5228_v16  ;;  %1028 = vmatmul.mubr.bf16.gmra.mrb[24].mxu1 %v5228_v16 }
  0xe1   : > { %844 = vmatprep.mubr.bf16.mxu0 %v5726_v1  ;;  %1037 = vmatprep.mubr.bf16.mxu1 %v5726_v1 }
  0xe2   : > { %2135 = vmatpush1.bf16.msra.mxu1 %v5298_v20  ;;  %2328 = vmatpush1.bf16.msra.mxu0 %v5319_v35 }
  0xe3   : > { %2136 = vmatprep.subr.bf16.mxu1 %v5309_v21  ;;  %2329 = vmatprep.subr.bf16.mxu0 %v5324_v39 }
  0xe6   : > { %2137 = vmatpush1.bf16.msra.mxu1 %v5307_v24  ;;  %2330 = vmatpush1.bf16.msra.mxu0 %v5322_v40 }
  0xe7   : > { %2138 = vmatprep.subr.bf16.mxu1 %v5318_v26  ;;  %2331 = vmatprep.subr.bf16.mxu0 %v5330_v41  ;;  %v5334_v26 = vld [vmem:[#allocation8 + $0x8] ss:$16 sps:$4 sm:$0xff]  }
  0xe8   : > { %845 = vmatmul.mubr.bf16.gmra.mrb[28].mxu0 %v5229_v25  ;;  %1038 = vmatmul.mubr.bf16.gmra.mrb[28].mxu1 %v5229_v25 }
  0xe9   : > { %854 = vmatprep.mubr.bf16.mxu0 %v5726_v1  ;;  %1047 = vmatprep.mubr.bf16.mxu1 %v5726_v1 }
  0xea   : > { %2139 = vmatpush1.bf16.msra.mxu1 %v5316_v29  ;;  %2332 = vmatpush1.bf16.msra.mxu0 %v5328_v42  ;;  %v5337_v42 = vld [vmem:[#allocation8 + $0x28] ss:$16 sps:$4 sm:$0xff]  }
  0xeb   : > { %2140 = vmatprep.subr.bf16.mxu1 %v5327_v43  ;;  %2333 = vmatprep.subr.bf16.mxu0 %v5333_v45 }
  0xee   : > { %2141 = vmatpush1.bf16.msra.mxu1 %v5325_v44  ;;  %2334 = vmatpush1.bf16.msra.mxu0 %v5331_v46 }
  0xef   : > { %2496 = vmatprep.subr.bf16.mxu1 %v5336_v48  ;;  %v5342_v48 = vld [vmem:[#allocation8 + $0x4c] ss:$16 sps:$4 sm:$0xff]  }
  0xf0   : > { %855 = vmatmul.mubr.bf16.gmra.mrb[32].mxu0 %v5230_v32  ;;  %1048 = vmatmul.mubr.bf16.gmra.mrb[32].mxu1 %v5230_v32 }
  0xf1   : > { %864 = vmatprep.mubr.bf16.mxu0 %v5726_v1  ;;  %1057 = vmatprep.mubr.bf16.mxu1 %v5726_v1 }
  0xf8   : > { %865 = vmatmul.mubr.bf16.gmra.mrb[36].mxu0 %v5231_v36  ;;  %1058 = vmatmul.mubr.bf16.gmra.mrb[36].mxu1 %v5231_v36 }
  0xf9   : > { %874 = vmatprep.mubr.bf16.mxu0 %v5726_v1  ;;  %1067 = vmatprep.mubr.bf16.mxu1 %v5726_v1 }
 0x100   : > { %875 = vmatmul.mubr.bf16.gmra.mrb[40].mxu0 %v5232_v37  ;;  %1068 = vmatmul.mubr.bf16.gmra.mrb[40].mxu1 %v5232_v37 }
 0x101   : > { %884 = vmatprep.mubr.bf16.mxu0 %v5726_v1  ;;  %1077 = vmatprep.mubr.bf16.mxu1 %v5726_v1 }
 0x108   : > { %885 = vmatmul.mubr.bf16.gmra.mrb[44].mxu0 %v5233_v38  ;;  %1078 = vmatmul.mubr.bf16.gmra.mrb[44].mxu1 %v5233_v38 }
 0x109   : > { %894 = vmatprep.mubr.bf16.mxu0 %v5726_v1  ;;  %1087 = vmatprep.mubr.bf16.mxu1 %v5726_v1 }
 0x110   : > { %895 = vmatmul.mubr.bf16.gmra.mrb[48].mxu0 %v5237_v47  ;;  %1088 = vmatmul.mubr.bf16.gmra.mrb[48].mxu1 %v5237_v47 }
 0x111   : > { %904 = vmatprep.mubr.bf16.mxu0 %v5726_v1  ;;  %1097 = vmatprep.mubr.bf16.mxu1 %v5726_v1 }
 0x118   : > { %905 = vmatmul.mubr.bf16.gmra.mrb[52].mxu0 %v5241_v49  ;;  %1098 = vmatmul.mubr.bf16.gmra.mrb[52].mxu1 %v5241_v49 }
 0x119   : > { %914 = vmatprep.mubr.bf16.mxu0 %v5726_v1  ;;  %1107 = vmatprep.mubr.bf16.mxu1 %v5726_v1 }
 0x120   : > { %915 = vmatmul.mubr.bf16.gmra.mrb[56].mxu0 %v5245_v50  ;;  %1108 = vmatmul.mubr.bf16.gmra.mrb[56].mxu1 %v5245_v50 }
 0x121   : > { %924 = vmatprep.mubr.bf16.mxu0 %v5726_v1  ;;  %1117 = vmatprep.mubr.bf16.mxu1 %v5726_v1  ;;  %v6887_v1 = vsub.s32 3, %v6044_v53 }
 0x123   : > { %v6069_v62 = vrot.slane %v464_v55, %v6887_v1 }
 0x128   : > { %925 = vmatmul.mubr.bf16.gmra.mrb[60].mxu0 %v5249_v51  ;;  %1118 = vmatmul.mubr.bf16.gmra.mrb[60].mxu1 %v5249_v51 }
 0x183   : > { %v776_v61 = vpop.f32.mrb[0].mxu0  ;;  %v969_v4 = vpop.f32.mrb[0].mxu1 }
 0x184   : > { %v777_v63 = vadd.f32 %v776_v61, %v6058_v58  ;;  %v778_v0 = vpop.f32.mrb[1].mxu0  ;;  %v970_v6 = vadd.f32 %v969_v4, %v6065_v60  ;;  %v971_v8 = vpop.f32.mrb[1].mxu1 }
 0x185   : > { %v779_v2 = vadd.f32 %v778_v0, %v6061_v59  ;;  %v780_v3 = vpop.f32.mrb[2].mxu0  ;;  %v972_v10 = vadd.f32 %v971_v8, %v6069_v62  ;;  %v973_v11 = vpop.f32.mrb[2].mxu1 }
 0x186   : > { %v781_v5 = vadd.f32 %v780_v3, %v6058_v58  ;;  %v782_v7 = vpop.f32.mrb[3].mxu0  ;;  %v1128_v12 = vmax.f32 %v777_v63, 0.0  ;;  %v1130_v14 = vmax.f32 %v970_v6, 0.0  ;;  %v974_v15 = vadd.f32 %v973_v11, %v6065_v60  ;;  %v975_v16 = vpop.f32.mrb[3].mxu1  ;;  %v5340_v3 = vld [vmem:[#allocation8 + $0x48] ss:$16 sps:$4 sm:$0xff]  }
 0x187   : > { %v783_v9 = vadd.f32 %v782_v7, %v6061_v59  ;;  %v1129_v17 = vmax.f32 %v779_v2, 0.0  ;;  %v1131_v19 = vmax.f32 %v972_v10, 0.0  ;;  %v976_v20 = vadd.f32 %v975_v16, %v6069_v62  ;;  %v5345_v7 = vld [vmem:[#allocation8 + $0x6c] ss:$16 sps:$4 sm:$0xff]  }
 0x188   : > { %v1132_v13 = vmax.f32 %v781_v5, 0.0  ;;  %v1134_v22 = vmax.f32 %v974_v15, 0.0 }
 0x189   : > { %v1133_v18 = vmax.f32 %v783_v9, 0.0  ;;  %v1135_v24 = vmax.f32 %v976_v20, 0.0 }
 0x18a   : > { %v6079_v21 = vpack.c.bf16 %v1132_v13, %v1128_v12  ;;  %v6083_v27 = vpack.c.bf16 %v1134_v22, %v1130_v14 }
 0x18b   : > { %v6081_v23 = vpack.c.bf16 %v1133_v18, %v1129_v17  ;;  %v786_v25 = vpop.f32.mrb[4].mxu0  ;;  %v6086_v31 = vpack.c.bf16 %v1135_v24, %v1131_v19  ;;  %v979_v34 = vpop.f32.mrb[4].mxu1  ;;  %v5343_v19 = vld [vmem:[#allocation8 + $0x68] ss:$16 sps:$4 sm:$0xff]  }
 0x18c   : > { %v787_v28 = vadd.f32 %v786_v25, %v6058_v58  ;;  %v788_v29 = vpop.f32.mrb[5].mxu0  ;;  %v980_v36 = vadd.f32 %v979_v34, %v6065_v60  ;;  %v981_v38 = vpop.f32.mrb[5].mxu1 }
 0x18d   : > { %v789_v32 = vadd.f32 %v788_v29, %v6061_v59  ;;  %v790_v33 = vpop.f32.mrb[6].mxu0  ;;  %2142 = vmatprep.mubr.bf16.mxu1 %v6081_v23  ;;  %v982_v40 = vadd.f32 %v981_v38, %v6069_v62  ;;  %v983_v41 = vpop.f32.mrb[6].mxu1  ;;  %2335 = vmatprep.mubr.bf16.mxu0 %v6086_v31 }
 0x18e   : > { %v791_v35 = vadd.f32 %v790_v33, %v6058_v58  ;;  %v792_v37 = vpop.f32.mrb[7].mxu0  ;;  %2143 = vmatmul.mubr.bf16.vlgmr.msra.gmra.mrb[64].mxu1 %v6079_v21  ;;  %v1136_v43 = vmax.f32 %v787_v28, 0.0  ;;  %v1138_v45 = vmax.f32 %v980_v36, 0.0  ;;  %v984_v46 = vadd.f32 %v983_v41, %v6065_v60  ;;  %v985_v47 = vpop.f32.mrb[7].mxu1  ;;  %2336 = vmatmul.mubr.bf16.vlgmr.msra.gmra.mrb[64].mxu0 %v6083_v27  ;;  %v5348_v28 = vld [vmem:[#allocation8 + $0x8c] ss:$16 sps:$4 sm:$0xff]  }
 0x18f   : > { %v793_v39 = vadd.f32 %v792_v37, %v6061_v59  ;;  %2497 = vmatpush1.bf16.msra.mxu1 %v5334_v26  ;;  %v1137_v49 = vmax.f32 %v789_v32, 0.0  ;;  %v1139_v51 = vmax.f32 %v982_v40, 0.0  ;;  %v986_v52 = vadd.f32 %v985_v47, %v6069_v62 }
 0x190   : > { %v1140_v44 = vmax.f32 %v791_v35, 0.0  ;;  %2498 = vmatprep.subr.bf16.mxu1 %v5339_v30  ;;  %v1142_v61 = vmax.f32 %v984_v46, 0.0 }
 0x191   : > { %v1141_v50 = vmax.f32 %v793_v39, 0.0  ;;  %v1143_v0 = vmax.f32 %v986_v52, 0.0  ;;  %v5346_v39 = vld [vmem:[#allocation8 + $0x88] ss:$16 sps:$4 sm:$0xff]  }
 0x192   : > { %v6099_v55 = vpack.c.bf16 %v1140_v44, %v1136_v43  ;;  %v6103_v4 = vpack.c.bf16 %v1142_v61, %v1138_v45  ;;  %v5351_v43 = vld [vmem:[#allocation8 + $0xac] ss:$16 sps:$4 sm:$0xff]  }
 0x193   : > { %v6101_v63 = vpack.c.bf16 %v1141_v50, %v1137_v49  ;;  %v796_v2 = vpop.f32.mrb[8].mxu0  ;;  %2499 = vmatpush1.bf16.msra.mxu1 %v5337_v42  ;;  %v6106_v8 = vpack.c.bf16 %v1143_v0, %v1139_v51  ;;  %v989_v11 = vpop.f32.mrb[8].mxu1 }
 0x194   : > { %v797_v5 = vadd.f32 %v796_v2, %v6058_v58  ;;  %v798_v6 = vpop.f32.mrb[9].mxu0  ;;  %2500 = vmatprep.subr.bf16.mxu1 %v5342_v48  ;;  %v990_v13 = vadd.f32 %v989_v11, %v6065_v60  ;;  %v991_v15 = vpop.f32.mrb[9].mxu1  ;;  %v5349_v2 = vld [vmem:[#allocation8 + $0xa8] ss:$16 sps:$4 sm:$0xff]  }
 0x195   : > { %v799_v9 = vadd.f32 %v798_v6, %v6061_v59  ;;  %v800_v10 = vpop.f32.mrb[10].mxu0  ;;  %2152 = vmatprep.mubr.bf16.mxu1 %v6101_v63  ;;  %v992_v17 = vadd.f32 %v991_v15, %v6069_v62  ;;  %v993_v18 = vpop.f32.mrb[10].mxu1  ;;  %2345 = vmatprep.mubr.bf16.mxu0 %v6106_v8 }
 0x196   : > { %v801_v12 = vadd.f32 %v800_v10, %v6058_v58  ;;  %v802_v14 = vpop.f32.mrb[11].mxu0  ;;  %2153 = vmatmul.mubr.bf16.gmra.mrb[68].mxu1 %v6099_v55  ;;  %v1144_v20 = vmax.f32 %v797_v5, 0.0  ;;  %v1146_v24 = vmax.f32 %v990_v13, 0.0  ;;  %v994_v25 = vadd.f32 %v993_v18, %v6065_v60  ;;  %v995_v26 = vpop.f32.mrb[11].mxu1  ;;  %2346 = vmatmul.mubr.bf16.gmra.mrb[68].mxu0 %v6103_v4  ;;  %v5354_v10 = vld [vmem:[#allocation8 + $0xcc] ss:$16 sps:$4 sm:$0xff]  }
 0x197   : > { %v803_v16 = vadd.f32 %v802_v14, %v6061_v59  ;;  %2501 = vmatpush1.bf16.msra.mxu1 %v5340_v3  ;;  %v1145_v29 = vmax.f32 %v799_v9, 0.0  ;;  %v1147_v32 = vmax.f32 %v992_v17, 0.0  ;;  %v996_v33 = vadd.f32 %v995_v26, %v6069_v62  ;;  %v5357_v26 = vld [vmem:[#allocation8 + $0xec] ss:$16 sps:$4 sm:$0xff]  }
 0x198   : > { %v1148_v22 = vmax.f32 %v801_v12, 0.0  ;;  %2502 = vmatprep.subr.bf16.mxu1 %v5345_v7  ;;  %v1150_v35 = vmax.f32 %v994_v25, 0.0 }
 0x199   : > { %v1149_v30 = vmax.f32 %v803_v16, 0.0  ;;  %v1151_v37 = vmax.f32 %v996_v33, 0.0 }
 0x19a   : > { %v6119_v34 = vpack.c.bf16 %v1148_v22, %v1144_v20  ;;  %v6123_v40 = vpack.c.bf16 %v1150_v35, %v1146_v24  ;;  %v5352_v20 = vld [vmem:[#allocation8 + $0xc8] ss:$16 sps:$4 sm:$0xff]  }
 0x19b   : > { %v6121_v36 = vpack.c.bf16 %v1149_v30, %v1145_v29  ;;  %v806_v38 = vpop.f32.mrb[12].mxu0  ;;  %2503 = vmatpush1.bf16.msra.mxu1 %v5343_v19  ;;  %v6126_v44 = vpack.c.bf16 %v1151_v37, %v1147_v32  ;;  %v999_v47 = vpop.f32.mrb[12].mxu1 }
 0x19c   : > { %v807_v41 = vadd.f32 %v806_v38, %v6058_v58  ;;  %v808_v42 = vpop.f32.mrb[13].mxu0  ;;  %2504 = vmatprep.subr.bf16.mxu1 %v5348_v28  ;;  %v1000_v49 = vadd.f32 %v999_v47, %v6065_v60  ;;  %v1001_v51 = vpop.f32.mrb[13].mxu1 }
 0x19d   : > { %v809_v45 = vadd.f32 %v808_v42, %v6061_v59  ;;  %v810_v46 = vpop.f32.mrb[14].mxu0  ;;  %2162 = vmatprep.mubr.bf16.mxu1 %v6121_v36  ;;  %v1002_v61 = vadd.f32 %v1001_v51, %v6069_v62  ;;  %v1003_v0 = vpop.f32.mrb[14].mxu1  ;;  %2355 = vmatprep.mubr.bf16.mxu0 %v6126_v44 }
 0x19e   : > { %v811_v48 = vadd.f32 %v810_v46, %v6058_v58  ;;  %v812_v50 = vpop.f32.mrb[15].mxu0  ;;  %2163 = vmatmul.mubr.bf16.gmra.mrb[72].mxu1 %v6119_v34  ;;  %v1152_v3 = vmax.f32 %v807_v41, 0.0  ;;  %v1154_v6 = vmax.f32 %v1000_v49, 0.0  ;;  %v1004_v7 = vadd.f32 %v1003_v0, %v6065_v60  ;;  %v1005_v9 = vpop.f32.mrb[15].mxu1  ;;  %2356 = vmatmul.mubr.bf16.gmra.mrb[72].mxu0 %v6123_v40 }
 0x19f   : > { %v813_v52 = vadd.f32 %v812_v50, %v6061_v59  ;;  %2505 = vmatpush1.bf16.msra.mxu1 %v5346_v39  ;;  %v1153_v11 = vmax.f32 %v809_v45, 0.0  ;;  %v1155_v13 = vmax.f32 %v1002_v61, 0.0  ;;  %v1006_v14 = vadd.f32 %v1005_v9, %v6069_v62  ;;  %v5360_v50 = vld [vmem:[#allocation8 + $0x10c] ss:$16 sps:$4 sm:$0xff]   ;;  %v5358_v9 = vld [vmem:[#allocation8 + $0x108] ss:$16 sps:$4 sm:$0xff]  }
 0x1a0   : > { %v1156_v5 = vmax.f32 %v811_v48, 0.0  ;;  %2506 = vmatprep.subr.bf16.mxu1 %v5351_v43  ;;  %v1158_v16 = vmax.f32 %v1004_v7, 0.0  ;;  %v5355_v43 = vld [vmem:[#allocation8 + $0xe8] ss:$16 sps:$4 sm:$0xff]  }
 0x1a1   : > { %v1157_v12 = vmax.f32 %v813_v52, 0.0  ;;  %v1159_v18 = vmax.f32 %v1006_v14, 0.0  ;;  %v5399_v14 = vld [vmem:[#allocation9 + $0x4] ss:$8 sps:$4 sm:$0xff]  }
 0x1a2   : > { %v6139_v15 = vpack.c.bf16 %v1156_v5, %v1152_v3  ;;  %v6143_v22 = vpack.c.bf16 %v1158_v16, %v1154_v6  ;;  %3470 = vmatprep.subr.bf16.mxu0 %v5399_v14  ;;  %v5408_v14 = vld [vmem:[#allocation9 + $0x24] ss:$8 sps:$4 sm:$0xff]  }
 0x1a3   : > { %v6141_v17 = vpack.c.bf16 %v1157_v12, %v1153_v11  ;;  %v816_v19 = vpop.f32.mrb[16].mxu0  ;;  %2507 = vmatpush1.bf16.msra.mxu1 %v5349_v2  ;;  %v6146_v28 = vpack.c.bf16 %v1159_v18, %v1155_v13  ;;  %v1009_v32 = vpop.f32.mrb[16].mxu1  ;;  %v5363_v13 = vld [vmem:[#allocation8 + $0x12c] ss:$16 sps:$4 sm:$0xff]  }
 0x1a4   : > { %v817_v24 = vadd.f32 %v816_v19, %v6058_v58  ;;  %v818_v25 = vpop.f32.mrb[17].mxu0  ;;  %2508 = vmatprep.subr.bf16.mxu1 %v5354_v10  ;;  %v1010_v35 = vadd.f32 %v1009_v32, %v6065_v60  ;;  %v1011_v38 = vpop.f32.mrb[17].mxu1 }
 0x1a5   : > { %v819_v29 = vadd.f32 %v818_v25, %v6061_v59  ;;  %v820_v30 = vpop.f32.mrb[18].mxu0  ;;  %2172 = vmatprep.mubr.bf16.mxu1 %v6141_v17  ;;  %v1012_v41 = vadd.f32 %v1011_v38, %v6069_v62  ;;  %v1013_v42 = vpop.f32.mrb[18].mxu1  ;;  %2365 = vmatprep.mubr.bf16.mxu0 %v6146_v28  ;;  %v5402_v38 = vld [vmem:[#allocation9 + $0x14] ss:$8 sps:$4 sm:$0xff]  }
 0x1a6   : > { %v821_v33 = vadd.f32 %v820_v30, %v6058_v58  ;;  %v822_v37 = vpop.f32.mrb[19].mxu0  ;;  %2173 = vmatmul.mubr.bf16.gmra.mrb[76].mxu1 %v6139_v15  ;;  %v1160_v45 = vmax.f32 %v817_v24, 0.0  ;;  %v1162_v47 = vmax.f32 %v1010_v35, 0.0  ;;  %v1014_v48 = vadd.f32 %v1013_v42, %v6065_v60  ;;  %v1015_v49 = vpop.f32.mrb[19].mxu1  ;;  %2366 = vmatmul.mubr.bf16.gmra.mrb[76].mxu0 %v6143_v22  ;;  %v5397_v24 = vld [vmem:[#allocation9] ss:$8 sps:$4 sm:$0xff]  }
 0x1a7   : > { %v823_v39 = vadd.f32 %v822_v37, %v6061_v59  ;;  %2509 = vmatpush1.bf16.msra.mxu1 %v5352_v20  ;;  %v1161_v51 = vmax.f32 %v819_v29, 0.0  ;;  %v1163_v61 = vmax.f32 %v1012_v41, 0.0  ;;  %v1016_v0 = vadd.f32 %v1015_v49, %v6069_v62  ;;  %v5361_v37 = vld [vmem:[#allocation8 + $0x128] ss:$16 sps:$4 sm:$0xff]   ;;  %3471 = vmatpush1.bf16.msra.mxu0 %v5397_v24 }
 0x1a8   : > { %v1164_v46 = vmax.f32 %v821_v33, 0.0  ;;  %2510 = vmatprep.subr.bf16.mxu1 %v5357_v26  ;;  %v1166_v3 = vmax.f32 %v1014_v48, 0.0  ;;  %3472 = vmatprep.subr.bf16.mxu0 %v5402_v38  ;;  %v5367_v38 = vld [vmem:[#allocation8 + $0x168] ss:$16 sps:$4 sm:$0xff]  }
 0x1a9   : > { %v1165_v52 = vmax.f32 %v823_v39, 0.0  ;;  %v1167_v6 = vmax.f32 %v1016_v0, 0.0 }
 0x1aa   : > { %v6159_v2 = vpack.c.bf16 %v1164_v46, %v1160_v45  ;;  %v6163_v10 = vpack.c.bf16 %v1166_v3, %v1162_v47  ;;  %v5366_v46 = vld [vmem:[#allocation8 + $0x14c] ss:$16 sps:$4 sm:$0xff]  }
 0x1ab   : > { %v6161_v5 = vpack.c.bf16 %v1165_v52, %v1161_v51  ;;  %v826_v7 = vpop.f32.mrb[20].mxu0  ;;  %2511 = vmatpush1.bf16.msra.mxu1 %v5355_v43  ;;  %v6166_v16 = vpack.c.bf16 %v1167_v6, %v1163_v61  ;;  %v1019_v20 = vpop.f32.mrb[20].mxu1  ;;  %v5400_v51 = vld [vmem:[#allocation9 + $0x10] ss:$8 sps:$4 sm:$0xff]  }
 0x1ac   : > { %6929 = vst [vmem:[#allocation19_spill] sm:$0xff] %v6163_v10  ;;  %v827_v11 = vadd.f32 %v826_v7, %v6058_v58  ;;  %v828_v12 = vpop.f32.mrb[21].mxu0  ;;  %2512 = vmatprep.subr.bf16.mxu1 %v5360_v50  ;;  %v1020_v26 = vadd.f32 %v1019_v20, %v6065_v60  ;;  %v1021_v30 = vpop.f32.mrb[21].mxu1  ;;  %v5364_v7 = vld [vmem:[#allocation8 + $0x148] ss:$16 sps:$4 sm:$0xff]   ;;  %3473 = vmatpush1.bf16.msra.mxu0 %v5400_v51 }
 0x1ad   : > { %6930 = vst [vmem:[#allocation20_spill] sm:$0xff] %v6166_v16  ;;  %v829_v18 = vadd.f32 %v828_v12, %v6061_v59  ;;  %v830_v19 = vpop.f32.mrb[22].mxu0  ;;  %2182 = vmatprep.mubr.bf16.mxu1 %v6161_v5  ;;  %v1022_v33 = vadd.f32 %v1021_v30, %v6069_v62  ;;  %v1023_v35 = vpop.f32.mrb[22].mxu1  ;;  %2375 = vmatprep.mubr.bf16.mxu0 %v6166_v16 }
 0x1ae   : > { %v831_v25 = vadd.f32 %v830_v19, %v6058_v58  ;;  %v832_v29 = vpop.f32.mrb[23].mxu0  ;;  %2183 = vmatmul.mubr.bf16.gmra.mrb[80].mxu1 %v6159_v2  ;;  %v1168_v39 = vmax.f32 %v827_v11, 0.0  ;;  %v1170_v42 = vmax.f32 %v1020_v26, 0.0  ;;  %v1024_v43 = vadd.f32 %v1023_v35, %v6065_v60  ;;  %v1025_v45 = vpop.f32.mrb[23].mxu1  ;;  %2376 = vmatmul.mubr.bf16.gmra.mrb[80].mxu0 %v6163_v10 }
 0x1af   : > { %v833_v32 = vadd.f32 %v832_v29, %v6061_v59  ;;  %2513 = vmatpush1.bf16.msra.mxu1 %v5358_v9  ;;  %v1169_v47 = vmax.f32 %v829_v18, 0.0  ;;  %v1171_v49 = vmax.f32 %v1022_v33, 0.0  ;;  %v1026_v50 = vadd.f32 %v1025_v45, %v6069_v62  ;;  %3474 = vmatprep.subr.bf16.mxu0 %v5408_v14  ;;  %v5370_v14 = vld [vmem:[#allocation8 + $0x188] ss:$16 sps:$4 sm:$0xff]  }
 0x1b0   : > { %v1172_v41 = vmax.f32 %v831_v25, 0.0  ;;  %2514 = vmatprep.subr.bf16.mxu1 %v5363_v13  ;;  %v1174_v61 = vmax.f32 %v1024_v43, 0.0  ;;  %v5369_v13 = vld [vmem:[#allocation8 + $0x16c] ss:$16 sps:$4 sm:$0xff]   ;;  %v5406_v25 = vld [vmem:[#allocation9 + $0x20] ss:$8 sps:$4 sm:$0xff]  }
 0x1b1   : > { %v1173_v48 = vmax.f32 %v833_v32, 0.0  ;;  %v1175_v3 = vmax.f32 %v1026_v50, 0.0  ;;  %3475 = vmatpush1.bf16.msra.mxu0 %v5406_v25 }
 0x1b2   : > { %v6179_v52 = vpack.c.bf16 %v1172_v41, %v1168_v39  ;;  %v6183_v9 = vpack.c.bf16 %v1174_v61, %v1170_v42  ;;  %v5411_v39 = vld [vmem:[#allocation9 + $0x34] ss:$8 sps:$4 sm:$0xff]   ;;  %v5409_v61 = vld [vmem:[#allocation9 + $0x30] ss:$8 sps:$4 sm:$0xff]  }
 0x1b3   : > { %v6181_v0 = vpack.c.bf16 %v1173_v48, %v1169_v47  ;;  %v836_v6 = vpop.f32.mrb[24].mxu0  ;;  %2515 = vmatpush1.bf16.msra.mxu1 %v5361_v37  ;;  %v6186_v18 = vpack.c.bf16 %v1175_v3, %v1171_v49  ;;  %v1029_v24 = vpop.f32.mrb[24].mxu1  ;;  %v5372_v47 = vld [vmem:[#allocation8 + $0x18c] ss:$16 sps:$4 sm:$0xff]   ;;  %3476 = vmatprep.subr.bf16.mxu0 %v5411_v39 }
 0x1b4   : > { %6931 = vst [vmem:[#allocation21_spill] sm:$0xff] %v6183_v9  ;;  %v837_v11 = vadd.f32 %v836_v6, %v6058_v58  ;;  %v838_v12 = vpop.f32.mrb[25].mxu0  ;;  %2516 = vmatprep.subr.bf16.mxu1 %v5366_v46  ;;  %v1030_v29 = vadd.f32 %v1029_v24, %v6065_v60  ;;  %v1031_v32 = vpop.f32.mrb[25].mxu1  ;;  %v5375_v24 = vld [vmem:[#allocation8 + $0x1ac] ss:$16 sps:$4 sm:$0xff]  }
 0x1b5   : > { %6932 = vst [vmem:[#allocation22_spill] sm:$0xff] %v6186_v18  ;;  %v839_v19 = vadd.f32 %v838_v12, %v6061_v59  ;;  %v840_v20 = vpop.f32.mrb[26].mxu0  ;;  %2192 = vmatprep.mubr.bf16.mxu1 %v6181_v0  ;;  %v1032_v35 = vadd.f32 %v1031_v32, %v6069_v62  ;;  %v1033_v37 = vpop.f32.mrb[26].mxu1  ;;  %2385 = vmatprep.mubr.bf16.mxu0 %v6186_v18 }
 0x1b6   : > { %v841_v26 = vadd.f32 %v840_v20, %v6058_v58  ;;  %v842_v30 = vpop.f32.mrb[27].mxu0  ;;  %2193 = vmatmul.mubr.bf16.gmra.mrb[84].mxu1 %v6179_v52  ;;  %v1176_v41 = vmax.f32 %v837_v11, 0.0  ;;  %v1178_v43 = vmax.f32 %v1030_v29, 0.0  ;;  %v1034_v45 = vadd.f32 %v1033_v37, %v6065_v60  ;;  %v1035_v46 = vpop.f32.mrb[27].mxu1  ;;  %2386 = vmatmul.mubr.bf16.gmra.mrb[84].mxu0 %v6183_v9 }
 0x1b7   : > { %v843_v33 = vadd.f32 %v842_v30, %v6061_v59  ;;  %2517 = vmatpush1.bf16.msra.mxu1 %v5364_v7  ;;  %v1177_v48 = vmax.f32 %v839_v19, 0.0  ;;  %v1179_v50 = vmax.f32 %v1032_v35, 0.0  ;;  %v1036_v51 = vadd.f32 %v1035_v46, %v6069_v62  ;;  %3477 = vmatpush1.bf16.msra.mxu0 %v5409_v61  ;;  %v5420_v46 = vld [vmem:[#allocation9 + $0x54] ss:$8 sps:$4 sm:$0xff]  }
 0x1b8   : > { %v1180_v42 = vmax.f32 %v841_v26, 0.0  ;;  %2518 = vmatprep.subr.bf16.mxu1 %v5369_v13  ;;  %v1182_v6 = vmax.f32 %v1034_v45, 0.0  ;;  %v5417_v26 = vld [vmem:[#allocation9 + $0x44] ss:$8 sps:$4 sm:$0xff]   ;;  %v5373_v45 = vld [vmem:[#allocation8 + $0x1a8] ss:$16 sps:$4 sm:$0xff]  }
 0x1b9   : > { %v1181_v49 = vmax.f32 %v843_v33, 0.0  ;;  %v1183_v11 = vmax.f32 %v1036_v51, 0.0  ;;  %v5415_v33 = vld [vmem:[#allocation9 + $0x40] ss:$8 sps:$4 sm:$0xff]   ;;  %3478 = vmatprep.subr.bf16.mxu0 %v5417_v26  ;;  %v5378_v61 = vld [vmem:[#allocation8 + $0x1cc] ss:$16 sps:$4 sm:$0xff]  }
 0x1ba   : > { %v6199_v3 = vpack.c.bf16 %v1180_v42, %v1176_v41  ;;  %v6203_v20 = vpack.c.bf16 %v1182_v6, %v1178_v43  ;;  %v5418_v26 = vld [vmem:[#allocation9 + $0x50] ss:$8 sps:$4 sm:$0xff]  }
 0x1bb   : > { %v6201_v7 = vpack.c.bf16 %v1181_v49, %v1177_v48  ;;  %v846_v12 = vpop.f32.mrb[28].mxu0  ;;  %2519 = vmatpush1.bf16.msra.mxu1 %v5367_v38  ;;  %v6206_v25 = vpack.c.bf16 %v1183_v11, %v1179_v50  ;;  %v1039_v32 = vpop.f32.mrb[28].mxu1  ;;  %3479 = vmatpush1.bf16.msra.mxu0 %v5415_v33 }
 0x1bc   : > { %6933 = vst [vmem:[#allocation23_spill] sm:$0xff] %v6203_v20  ;;  %v847_v13 = vadd.f32 %v846_v12, %v6058_v58  ;;  %v848_v19 = vpop.f32.mrb[29].mxu0  ;;  %2520 = vmatprep.subr.bf16.mxu1 %v5372_v47  ;;  %v1040_v37 = vadd.f32 %v1039_v32, %v6065_v60  ;;  %v1041_v39 = vpop.f32.mrb[29].mxu1  ;;  %3480 = vmatprep.subr.bf16.mxu0 %v5420_v46 }
 0x1bd   : > { %6934 = vst [vmem:[#allocation24_spill] sm:$0xff] %v6206_v25  ;;  %v849_v29 = vadd.f32 %v848_v19, %v6061_v59  ;;  %v850_v30 = vpop.f32.mrb[30].mxu0  ;;  %2202 = vmatprep.mubr.bf16.mxu1 %v6201_v7  ;;  %v1042_v42 = vadd.f32 %v1041_v39, %v6069_v62  ;;  %v1043_v43 = vpop.f32.mrb[30].mxu1  ;;  %2395 = vmatprep.mubr.bf16.mxu0 %v6206_v25  ;;  %v5381_v39 = vld [vmem:[#allocation8 + $0x1ec] ss:$16 sps:$4 sm:$0xff]  }
 0x1be   : > { %v851_v35 = vadd.f32 %v850_v30, %v6058_v58  ;;  %v852_v38 = vpop.f32.mrb[31].mxu0  ;;  %2203 = vmatmul.mubr.bf16.gmra.mrb[88].mxu1 %v6199_v3  ;;  %v1184_v47 = vmax.f32 %v847_v13, 0.0  ;;  %v1186_v49 = vmax.f32 %v1040_v37, 0.0  ;;  %v1044_v50 = vadd.f32 %v1043_v43, %v6065_v60  ;;  %v1045_v51 = vpop.f32.mrb[31].mxu1  ;;  %2396 = vmatmul.mubr.bf16.gmra.mrb[88].mxu0 %v6203_v20  ;;  %v5376_v37 = vld [vmem:[#allocation8 + $0x1c8] ss:$16 sps:$4 sm:$0xff]  }
 0x1bf   : > { %v853_v41 = vadd.f32 %v852_v38, %v6061_v59  ;;  %2521 = vmatpush1.bf16.msra.mxu1 %v5370_v14  ;;  %v1185_v6 = vmax.f32 %v849_v29, 0.0  ;;  %v1187_v12 = vmax.f32 %v1042_v42, 0.0  ;;  %v1046_v19 = vadd.f32 %v1045_v51, %v6069_v62  ;;  %3481 = vmatpush1.bf16.msra.mxu0 %v5418_v26 }
 0x1c0   : > { %v1188_v48 = vmax.f32 %v851_v35, 0.0  ;;  %2522 = vmatprep.subr.bf16.mxu1 %v5375_v24  ;;  %v1190_v30 = vmax.f32 %v1044_v50, 0.0 }
 0x1c1   : > { %v1189_v11 = vmax.f32 %v853_v41, 0.0  ;;  %v1191_v32 = vmax.f32 %v1046_v19, 0.0  ;;  %v5426_v41 = vld [vmem:[#allocation9 + $0x64] ss:$8 sps:$4 sm:$0xff]  }
 0x1c2   : > { %v6219_v14 = vpack.c.bf16 %v1188_v48, %v1184_v47  ;;  %v6223_v38 = vpack.c.bf16 %v1190_v30, %v1186_v49  ;;  %v5424_v47 = vld [vmem:[#allocation9 + $0x60] ss:$8 sps:$4 sm:$0xff]   ;;  %3482 = vmatprep.subr.bf16.mxu0 %v5426_v41 }
 0x1c3   : > { %v6221_v13 = vpack.c.bf16 %v1189_v11, %v1185_v6  ;;  %v856_v35 = vpop.f32.mrb[32].mxu0  ;;  %2523 = vmatpush1.bf16.msra.mxu1 %v5373_v45  ;;  %v6226_v33 = vpack.c.bf16 %v1191_v32, %v1187_v12  ;;  %v1049_v46 = vpop.f32.mrb[32].mxu1  ;;  %v5379_v11 = vld [vmem:[#allocation8 + $0x1e8] ss:$16 sps:$4 sm:$0xff]   ;;  %v5429_v12 = vld [vmem:[#allocation9 + $0x74] ss:$8 sps:$4 sm:$0xff]   ;;  %3483 = vmatpush1.bf16.msra.mxu0 %v5424_v47 }
 0x1c4   : > { %6935 = vst [vmem:[#allocation25_spill] sm:$0xff] %v6223_v38  ;;  %v857_v24 = vadd.f32 %v856_v35, %v6058_v58  ;;  %v858_v29 = vpop.f32.mrb[33].mxu0  ;;  %2524 = vmatprep.subr.bf16.mxu1 %v5378_v61  ;;  %v1050_v48 = vadd.f32 %v1049_v46, %v6065_v60  ;;  %v1051_v50 = vpop.f32.mrb[33].mxu1  ;;  %3484 = vmatprep.subr.bf16.mxu0 %v5429_v12  ;;  %v5433_v12 = vld [vmem:[#allocation9 + $0x80] ss:$8 sps:$4 sm:$0xff]  }
 0x1c5   : > { %6936 = vst [vmem:[#allocation26_spill] sm:$0xff] %v6226_v33  ;;  %v859_v42 = vadd.f32 %v858_v29, %v6061_v59  ;;  %v860_v43 = vpop.f32.mrb[34].mxu0  ;;  %2212 = vmatprep.mubr.bf16.mxu1 %v6221_v13  ;;  %v1052_v61 = vadd.f32 %v1051_v50, %v6069_v62  ;;  %v1053_v6 = vpop.f32.mrb[34].mxu1  ;;  %2405 = vmatprep.mubr.bf16.mxu0 %v6226_v33  ;;  %v5384_v29 = vld [vmem:[#allocation8 + $0x20c] ss:$16 sps:$4 sm:$0xff]  }
 0x1c6   : > { %v861_v45 = vadd.f32 %v860_v43, %v6058_v58  ;;  %v862_v49 = vpop.f32.mrb[35].mxu0  ;;  %2213 = vmatmul.mubr.bf16.gmra.mrb[92].mxu1 %v6219_v14  ;;  %v1192_v19 = vmax.f32 %v857_v24, 0.0  ;;  %v1194_v30 = vmax.f32 %v1050_v48, 0.0  ;;  %v1054_v32 = vadd.f32 %v1053_v6, %v6065_v60  ;;  %v1055_v35 = vpop.f32.mrb[35].mxu1  ;;  %2406 = vmatmul.mubr.bf16.gmra.mrb[92].mxu0 %v6223_v38  ;;  %v5427_v50 = vld [vmem:[#allocation9 + $0x70] ss:$8 sps:$4 sm:$0xff]  }
 0x1c7   : > { %v863_v51 = vadd.f32 %v862_v49, %v6061_v59  ;;  %2525 = vmatpush1.bf16.msra.mxu1 %v5376_v37  ;;  %v1193_v41 = vmax.f32 %v859_v42, 0.0  ;;  %v1195_v46 = vmax.f32 %v1052_v61, 0.0  ;;  %v1056_v49 = vadd.f32 %v1055_v35, %v6069_v62  ;;  %3485 = vmatpush1.bf16.msra.mxu0 %v5427_v50 }
 0x1c8   : > { %v1196_v26 = vmax.f32 %v861_v45, 0.0  ;;  %2526 = vmatprep.subr.bf16.mxu1 %v5381_v39  ;;  %v1198_v1 = vmax.f32 %v1054_v32, 0.0 }
 0x1c9   : > { %v1197_v43 = vmax.f32 %v863_v51, 0.0  ;;  %v1199_v45 = vmax.f32 %v1056_v49, 0.0  ;;  %v5435_v51 = vld [vmem:[#allocation9 + $0x84] ss:$8 sps:$4 sm:$0xff]  }
 0x1ca   : > { %v6239_v37 = vpack.c.bf16 %v1196_v26, %v1192_v19  ;;  %v6243_v6 = vpack.c.bf16 %v1198_v1, %v1194_v30  ;;  %3486 = vmatprep.subr.bf16.mxu0 %v5435_v51 }
 0x1cb   : > { %v6241_v24 = vpack.c.bf16 %v1197_v43, %v1193_v41  ;;  %v866_v48 = vpop.f32.mrb[36].mxu0  ;;  %2527 = vmatpush1.bf16.msra.mxu1 %v5379_v11  ;;  %v6246_v61 = vpack.c.bf16 %v1199_v45, %v1195_v46  ;;  %v1059_v26 = vpop.f32.mrb[36].mxu1  ;;  %v5438_v43 = vld [vmem:[#allocation9 + $0x94] ss:$8 sps:$4 sm:$0xff]   ;;  %3487 = vmatpush1.bf16.msra.mxu0 %v5433_v12 }
 0x1cc   : > { %6937 = vst [vmem:[#allocation27_spill] sm:$0xff] %v6243_v6  ;;  %v867_v39 = vadd.f32 %v866_v48, %v6058_v58  ;;  %v868_v42 = vpop.f32.mrb[37].mxu0  ;;  %2689 = vmatprep.subr.bf16.mxu1 %v5384_v29  ;;  %v1060_v1 = vadd.f32 %v1059_v26, %v6065_v60  ;;  %v1061_v30 = vpop.f32.mrb[37].mxu1  ;;  %3488 = vmatprep.subr.bf16.mxu0 %v5438_v43  ;;  %v5442_v43 = vld [vmem:[#allocation9 + $0xa0] ss:$8 sps:$4 sm:$0xff]  }
 0x1cd   : > { %6938 = vst [vmem:[#allocation28_spill] sm:$0xff] %v6246_v61  ;;  %v869_v47 = vadd.f32 %v868_v42, %v6061_v59  ;;  %v870_v19 = vpop.f32.mrb[38].mxu0  ;;  %2222 = vmatprep.mubr.bf16.mxu1 %v6241_v24  ;;  %v1062_v29 = vadd.f32 %v1061_v30, %v6069_v62  ;;  %v1063_v41 = vpop.f32.mrb[38].mxu1  ;;  %2415 = vmatprep.mubr.bf16.mxu0 %v6246_v61 }
 0x1ce   : > { %v871_v32 = vadd.f32 %v870_v19, %v6058_v58  ;;  %v872_v11 = vpop.f32.mrb[39].mxu0  ;;  %2223 = vmatmul.mubr.bf16.gmra.mrb[96].mxu1 %v6239_v37  ;;  %v1200_v46 = vmax.f32 %v867_v39, 0.0  ;;  %v1202_v50 = vmax.f32 %v1060_v1, 0.0  ;;  %v1064_v45 = vadd.f32 %v1063_v41, %v6065_v60  ;;  %v1065_v48 = vpop.f32.mrb[39].mxu1  ;;  %2416 = vmatmul.mubr.bf16.gmra.mrb[96].mxu0 %v6243_v6 }
 0x1cf   : > { %v873_v35 = vadd.f32 %v872_v11, %v6061_v59  ;;  %v1201_v42 = vmax.f32 %v869_v47, 0.0  ;;  %v1203_v26 = vmax.f32 %v1062_v29, 0.0  ;;  %v1066_v51 = vadd.f32 %v1065_v48, %v6069_v62  ;;  %v5436_v11 = vld [vmem:[#allocation9 + $0x90] ss:$8 sps:$4 sm:$0xff]   ;;  %v5444_v47 = vld [vmem:[#allocation9 + $0xa4] ss:$8 sps:$4 sm:$0xff]  }
 0x1d0   : > { %v1204_v49 = vmax.f32 %v871_v32, 0.0  ;;  %v1206_v57 = vmax.f32 %v1064_v45, 0.0  ;;  %3489 = vmatpush1.bf16.msra.mxu0 %v5436_v11 }
 0x1d1   : > { %v1205_v19 = vmax.f32 %v873_v35, 0.0  ;;  %v1207_v39 = vmax.f32 %v1066_v51, 0.0  ;;  %3490 = vmatprep.subr.bf16.mxu0 %v5444_v47 }
 0x1d2   : > { %v6259_v30 = vpack.c.bf16 %v1204_v49, %v1200_v46  ;;  %v6263_v1 = vpack.c.bf16 %v1206_v57, %v1202_v50 }
 0x1d3   : > { %v6261_v53 = vpack.c.bf16 %v1205_v19, %v1201_v42  ;;  %v876_v32 = vpop.f32.mrb[40].mxu0  ;;  %v6266_v35 = vpack.c.bf16 %v1207_v39, %v1203_v26  ;;  %v1069_v48 = vpop.f32.mrb[40].mxu1  ;;  %v5447_v19 = vld [vmem:[#allocation9 + $0xb4] ss:$8 sps:$4 sm:$0xff]  }
 0x1d4   : > { %6939 = vst [vmem:[#allocation29_spill] sm:$0xff] %v6263_v1  ;;  %v877_v41 = vadd.f32 %v876_v32, %v6058_v58  ;;  %v878_v6 = vpop.f32.mrb[41].mxu0  ;;  %v1070_v49 = vadd.f32 %v1069_v48, %v6065_v60  ;;  %v1071_v50 = vpop.f32.mrb[41].mxu1  ;;  %3491 = vmatpush1.bf16.msra.mxu0 %v5442_v43 }
 0x1d5   : > { %6940 = vst [vmem:[#allocation30_spill] sm:$0xff] %v6266_v35  ;;  %v879_v29 = vadd.f32 %v878_v6, %v6061_v59  ;;  %v880_v12 = vpop.f32.mrb[42].mxu0  ;;  %2232 = vmatprep.mubr.bf16.mxu1 %v6261_v53  ;;  %v1072_v42 = vadd.f32 %v1071_v50, %v6069_v62  ;;  %v1073_v6 = vpop.f32.mrb[42].mxu1  ;;  %2425 = vmatprep.mubr.bf16.mxu0 %v6266_v35 }
 0x1d6   : > { %v881_v46 = vadd.f32 %v880_v12, %v6058_v58  ;;  %v882_v57 = vpop.f32.mrb[43].mxu0  ;;  %2233 = vmatmul.mubr.bf16.gmra.mrb[100].mxu1 %v6259_v30  ;;  %v1208_v26 = vmax.f32 %v877_v41, 0.0  ;;  %v1210_v11 = vmax.f32 %v1070_v49, 0.0  ;;  %v1074_v39 = vadd.f32 %v1073_v6, %v6065_v60  ;;  %v1075_v32 = vpop.f32.mrb[43].mxu1  ;;  %2426 = vmatmul.mubr.bf16.gmra.mrb[100].mxu0 %v6263_v1 }
 0x1d7   : > { %v883_v45 = vadd.f32 %v882_v57, %v6061_v59  ;;  %v1209_v12 = vmax.f32 %v879_v29, 0.0  ;;  %v1211_v61 = vmax.f32 %v1072_v42, 0.0  ;;  %v1076_v47 = vadd.f32 %v1075_v32, %v6069_v62  ;;  %v5445_v57 = vld [vmem:[#allocation9 + $0xb0] ss:$8 sps:$4 sm:$0xff]   ;;  %3492 = vmatprep.subr.bf16.mxu0 %v5447_v19  ;;  %v5453_v29 = vld [vmem:[#allocation9 + $0xc4] ss:$8 sps:$4 sm:$0xff]  }
 0x1d8   : > { %v1212_v51 = vmax.f32 %v881_v46, 0.0  ;;  %v1214_v38 = vmax.f32 %v1074_v39, 0.0  ;;  %3493 = vmatpush1.bf16.msra.mxu0 %v5445_v57  ;;  %v5451_v19 = vld [vmem:[#allocation9 + $0xc0] ss:$8 sps:$4 sm:$0xff]  }
 0x1d9   : > { %v1213_v48 = vmax.f32 %v883_v45, 0.0  ;;  %v1215_v41 = vmax.f32 %v1076_v47, 0.0  ;;  %3494 = vmatprep.subr.bf16.mxu0 %v5453_v29 }
 0x1da   : > { %v6279_v50 = vpack.c.bf16 %v1212_v51, %v1208_v26  ;;  %v6283_v49 = vpack.c.bf16 %v1214_v38, %v1210_v11 }
 0x1db   : > { %v6281_v35 = vpack.c.bf16 %v1213_v48, %v1209_v12  ;;  %v886_v46 = vpop.f32.mrb[44].mxu0  ;;  %v6286_v45 = vpack.c.bf16 %v1215_v41, %v1211_v61  ;;  %v1079_v32 = vpop.f32.mrb[44].mxu1 }
 0x1dc   : > { %6941 = vst [vmem:[#allocation31_spill] sm:$0xff] %v6283_v49  ;;  %v887_v6 = vadd.f32 %v886_v46, %v6058_v58  ;;  %v888_v1 = vpop.f32.mrb[45].mxu0  ;;  %v1080_v51 = vadd.f32 %v1079_v32, %v6065_v60  ;;  %v1081_v11 = vpop.f32.mrb[45].mxu1  ;;  %v5456_v46 = vld [vmem:[#allocation9 + $0xd4] ss:$8 sps:$4 sm:$0xff]   ;;  %3495 = vmatpush1.bf16.msra.mxu0 %v5451_v19 }
 0x1dd   : > { %6942 = vst [vmem:[#allocation32_spill] sm:$0xff] %v6286_v45  ;;  %v889_v42 = vadd.f32 %v888_v1, %v6061_v59  ;;  %v890_v43 = vpop.f32.mrb[46].mxu0  ;;  %2242 = vmatprep.mubr.bf16.mxu1 %v6281_v35  ;;  %v1082_v39 = vadd.f32 %v1081_v11, %v6069_v62  ;;  %v1083_v1 = vpop.f32.mrb[46].mxu1  ;;  %2435 = vmatprep.mubr.bf16.mxu0 %v6286_v45 }
 0x1de   : > { %v891_v26 = vadd.f32 %v890_v43, %v6058_v58  ;;  %v892_v38 = vpop.f32.mrb[47].mxu0  ;;  %2243 = vmatmul.mubr.bf16.gmra.mrb[104].mxu1 %v6279_v50  ;;  %v1216_v12 = vmax.f32 %v887_v6, 0.0  ;;  %v1218_v47 = vmax.f32 %v1080_v51, 0.0  ;;  %v1084_v57 = vadd.f32 %v1083_v1, %v6065_v60  ;;  %v1085_v41 = vpop.f32.mrb[47].mxu1  ;;  %2436 = vmatmul.mubr.bf16.gmra.mrb[104].mxu0 %v6283_v49 }
 0x1df   : > { %v893_v61 = vadd.f32 %v892_v38, %v6061_v59  ;;  %v1217_v43 = vmax.f32 %v889_v42, 0.0  ;;  %v1219_v33 = vmax.f32 %v1082_v39, 0.0  ;;  %v1086_v29 = vadd.f32 %v1085_v41, %v6069_v62  ;;  %v5454_v38 = vld [vmem:[#allocation9 + $0xd0] ss:$8 sps:$4 sm:$0xff]   ;;  %3496 = vmatprep.subr.bf16.mxu0 %v5456_v46  ;;  %v5462_v42 = vld [vmem:[#allocation9 + $0xe4] ss:$8 sps:$4 sm:$0xff]  }
 0x1e0   : > { %v1220_v48 = vmax.f32 %v891_v26, 0.0  ;;  %v1222_v20 = vmax.f32 %v1084_v57, 0.0  ;;  %3497 = vmatpush1.bf16.msra.mxu0 %v5454_v38 }
 0x1e1   : > { %v1221_v32 = vmax.f32 %v893_v61, 0.0  ;;  %v1223_v26 = vmax.f32 %v1086_v29, 0.0  ;;  %3498 = vmatprep.subr.bf16.mxu0 %v5462_v42 }
 0x1e2   : > { %v6299_v11 = vpack.c.bf16 %v1220_v48, %v1216_v12  ;;  %v6303_v1 = vpack.c.bf16 %v1222_v20, %v1218_v47  ;;  %v5460_v12 = vld [vmem:[#allocation9 + $0xe0] ss:$8 sps:$4 sm:$0xff]  }
 0x1e3   : > { %v6301_v6 = vpack.c.bf16 %v1221_v32, %v1217_v43  ;;  %v896_v51 = vpop.f32.mrb[48].mxu0  ;;  %v6306_v61 = vpack.c.bf16 %v1223_v26, %v1219_v33  ;;  %v1089_v41 = vpop.f32.mrb[48].mxu1 }
 0x1e4   : > { %6943 = vst [vmem:[#allocation33_spill] sm:$0xff] %v6303_v1  ;;  %v897_v49 = vadd.f32 %v896_v51, %v6058_v58  ;;  %v898_v45 = vpop.f32.mrb[49].mxu0  ;;  %v1090_v57 = vadd.f32 %v1089_v41, %v6065_v60  ;;  %v1091_v47 = vpop.f32.mrb[49].mxu1  ;;  %v5465_v51 = vld [vmem:[#allocation9 + $0xf4] ss:$8 sps:$4 sm:$0xff]   ;;  %3499 = vmatpush1.bf16.msra.mxu0 %v5460_v12 }
 0x1e5   : > { %6944 = vst [vmem:[#allocation34_spill] sm:$0xff] %v6306_v61  ;;  %v899_v39 = vadd.f32 %v898_v45, %v6061_v59  ;;  %v900_v19 = vpop.f32.mrb[50].mxu0  ;;  %2252 = vmatprep.mubr.bf16.mxu1 %v6301_v6  ;;  %v1092_v46 = vadd.f32 %v1091_v47, %v6069_v62  ;;  %v1093_v45 = vpop.f32.mrb[50].mxu1  ;;  %2445 = vmatprep.mubr.bf16.mxu0 %v6306_v61 }
 0x1e6   : > { %v901_v48 = vadd.f32 %v900_v19, %v6058_v58  ;;  %v902_v20 = vpop.f32.mrb[51].mxu0  ;;  %2253 = vmatmul.mubr.bf16.gmra.mrb[108].mxu1 %v6299_v11  ;;  %v1224_v43 = vmax.f32 %v897_v49, 0.0  ;;  %v1226_v29 = vmax.f32 %v1090_v57, 0.0  ;;  %v1094_v38 = vadd.f32 %v1093_v45, %v6065_v60  ;;  %v1095_v26 = vpop.f32.mrb[51].mxu1  ;;  %2446 = vmatmul.mubr.bf16.gmra.mrb[108].mxu0 %v6303_v1 }
 0x1e7   : > { %v903_v33 = vadd.f32 %v902_v20, %v6061_v59  ;;  %v1225_v19 = vmax.f32 %v899_v39, 0.0  ;;  %v1227_v25 = vmax.f32 %v1092_v46, 0.0  ;;  %v1096_v42 = vadd.f32 %v1095_v26, %v6069_v62  ;;  %v5463_v20 = vld [vmem:[#allocation9 + $0xf0] ss:$8 sps:$4 sm:$0xff]   ;;  %3500 = vmatprep.subr.bf16.mxu0 %v5465_v51 }
 0x1e8   : > { %v1228_v32 = vmax.f32 %v901_v48, 0.0  ;;  %v1230_v9 = vmax.f32 %v1094_v38, 0.0  ;;  %3501 = vmatpush1.bf16.msra.mxu0 %v5463_v20 }
 0x1e9   : > { %v1229_v41 = vmax.f32 %v903_v33, 0.0  ;;  %v1231_v48 = vmax.f32 %v1096_v42, 0.0 }
 0x1ea   : > { %v6319_v47 = vpack.c.bf16 %v1228_v32, %v1224_v43  ;;  %v6323_v45 = vpack.c.bf16 %v1230_v9, %v1226_v29 }
 0x1eb   : > { %v6321_v49 = vpack.c.bf16 %v1229_v41, %v1225_v19  ;;  %v906_v57 = vpop.f32.mrb[52].mxu0  ;;  %v6326_v39 = vpack.c.bf16 %v1231_v48, %v1227_v25  ;;  %v1099_v12 = vpop.f32.mrb[52].mxu1 }
 0x1ec   : > { %6945 = vst [vmem:[#allocation35_spill] sm:$0xff] %v6323_v45  ;;  %v907_v1 = vadd.f32 %v906_v57, %v6058_v58  ;;  %v908_v61 = vpop.f32.mrb[53].mxu0  ;;  %v1100_v32 = vadd.f32 %v1099_v12, %v6065_v60  ;;  %v1101_v26 = vpop.f32.mrb[53].mxu1 }
 0x1ed   : > { %6946 = vst [vmem:[#allocation36_spill] sm:$0xff] %v6326_v39  ;;  %v909_v33 = vadd.f32 %v908_v61, %v6061_v59  ;;  %v910_v46 = vpop.f32.mrb[54].mxu0  ;;  %2262 = vmatprep.mubr.bf16.mxu1 %v6321_v49  ;;  %v1102_v25 = vadd.f32 %v1101_v26, %v6069_v62  ;;  %v1103_v29 = vpop.f32.mrb[54].mxu1  ;;  %2455 = vmatprep.mubr.bf16.mxu0 %v6326_v39 }
 0x1ee   : > { %v911_v43 = vadd.f32 %v910_v46, %v6058_v58  ;;  %v912_v38 = vpop.f32.mrb[55].mxu0  ;;  %2263 = vmatmul.mubr.bf16.gmra.mrb[112].mxu1 %v6319_v47  ;;  %v1232_v61 = vmax.f32 %v907_v1, 0.0  ;;  %v1234_v19 = vmax.f32 %v1100_v32, 0.0  ;;  %v1104_v41 = vadd.f32 %v1103_v29, %v6065_v60  ;;  %v1105_v42 = vpop.f32.mrb[55].mxu1  ;;  %2456 = vmatmul.mubr.bf16.gmra.mrb[112].mxu0 %v6323_v45 }
 0x1ef   : > { %v913_v9 = vadd.f32 %v912_v38, %v6061_v59  ;;  %v1233_v20 = vmax.f32 %v909_v33, 0.0  ;;  %v1235_v57 = vmax.f32 %v1102_v25, 0.0  ;;  %v1106_v46 = vadd.f32 %v1105_v42, %v6069_v62 }
 0x1f0   : > { %v1236_v51 = vmax.f32 %v911_v43, 0.0  ;;  %v1238_v38 = vmax.f32 %v1104_v41, 0.0 }
 0x1f1   : > { %v1237_v48 = vmax.f32 %v913_v9, 0.0  ;;  %v1239_v18 = vmax.f32 %v1106_v46, 0.0 }
 0x1f2   : > { %v6339_v12 = vpack.c.bf16 %v1236_v51, %v1232_v61  ;;  %v6343_v1 = vpack.c.bf16 %v1238_v38, %v1234_v19 }
 0x1f3   : > { %v6341_v26 = vpack.c.bf16 %v1237_v48, %v1233_v20  ;;  %v916_v39 = vpop.f32.mrb[56].mxu0  ;;  %v6346_v29 = vpack.c.bf16 %v1239_v18, %v1235_v57  ;;  %v1109_v25 = vpop.f32.mrb[56].mxu1 }
 0x1f4   : > { %6947 = vst [vmem:[#allocation37_spill] sm:$0xff] %v6343_v1  ;;  %v917_v43 = vadd.f32 %v916_v39, %v6058_v58  ;;  %v918_v32 = vpop.f32.mrb[57].mxu0  ;;  %v1110_v51 = vadd.f32 %v1109_v25, %v6065_v60  ;;  %v1111_v42 = vpop.f32.mrb[57].mxu1 }
 0x1f5   : > { %6948 = vst [vmem:[#allocation38_spill] sm:$0xff] %v6346_v29  ;;  %v919_v33 = vadd.f32 %v918_v32, %v6061_v59  ;;  %v920_v9 = vpop.f32.mrb[58].mxu0  ;;  %2272 = vmatprep.mubr.bf16.mxu1 %v6341_v26  ;;  %v1112_v39 = vadd.f32 %v1111_v42, %v6069_v62  ;;  %v1113_v18 = vpop.f32.mrb[58].mxu1  ;;  %2465 = vmatprep.mubr.bf16.mxu0 %v6346_v29 }
 0x1f6   : > { %v921_v61 = vadd.f32 %v920_v9, %v6058_v58  ;;  %v922_v41 = vpop.f32.mrb[59].mxu0  ;;  %2273 = vmatmul.mubr.bf16.gmra.mrb[116].mxu1 %v6339_v12  ;;  %v1240_v20 = vmax.f32 %v917_v43, 0.0  ;;  %v1242_v57 = vmax.f32 %v1110_v51, 0.0  ;;  %v1114_v46 = vadd.f32 %v1113_v18, %v6065_v60  ;;  %v1115_v38 = vpop.f32.mrb[59].mxu1  ;;  %2466 = vmatmul.mubr.bf16.gmra.mrb[116].mxu0 %v6343_v1 }
 0x1f7   : > { %v923_v19 = vadd.f32 %v922_v41, %v6061_v59  ;;  %v1241_v32 = vmax.f32 %v919_v33, 0.0  ;;  %v1243_v25 = vmax.f32 %v1112_v39, 0.0  ;;  %v1116_v45 = vadd.f32 %v1115_v38, %v6069_v62 }
 0x1f8   : > { %v1244_v48 = vmax.f32 %v921_v61, 0.0  ;;  %v1246_v41 = vmax.f32 %v1114_v46, 0.0 }
 0x1f9   : > { %v1245_v9 = vmax.f32 %v923_v19, 0.0  ;;  %v1247_v16 = vmax.f32 %v1116_v45, 0.0 }
 0x1fa   : > { %v6359_v10 = vpack.c.bf16 %v1244_v48, %v1240_v20  ;;  %v6363_v43 = vpack.c.bf16 %v1246_v41, %v1242_v57 }
 0x1fb   : > { %v6361_v42 = vpack.c.bf16 %v1245_v9, %v1241_v32  ;;  %v926_v29 = vpop.f32.mrb[60].mxu0  ;;  %v6366_v18 = vpack.c.bf16 %v1247_v16, %v1243_v25  ;;  %v1119_v39 = vpop.f32.mrb[60].mxu1 }
 0x1fc   : > { %v927_v61 = vadd.f32 %v926_v29, %v6058_v58  ;;  %v928_v51 = vpop.f32.mrb[61].mxu0  ;;  %v1120_v48 = vadd.f32 %v1119_v39, %v6065_v60  ;;  %v1121_v45 = vpop.f32.mrb[61].mxu1 }
 0x1fd   : > { %6949 = vst [vmem:[#allocation39_spill] sm:$0xff] %v6366_v18  ;;  %v929_v33 = vadd.f32 %v928_v51, %v6061_v59  ;;  %v930_v19 = vpop.f32.mrb[62].mxu0  ;;  %2282 = vmatprep.mubr.bf16.mxu1 %v6361_v42  ;;  %v1122_v29 = vadd.f32 %v1121_v45, %v6069_v62  ;;  %v1123_v16 = vpop.f32.mrb[62].mxu1  ;;  %2475 = vmatprep.mubr.bf16.mxu0 %v6366_v18 }
 0x1fe   : > { %v931_v20 = vadd.f32 %v930_v19, %v6058_v58  ;;  %v932_v46 = vpop.f32.mrb[63].mxu0  ;;  %2283 = vmatmul.mubr.bf16.gmra.mrb[120].mxu1 %v6359_v10  ;;  %v1248_v38 = vmax.f32 %v927_v61, 0.0  ;;  %v1250_v9 = vmax.f32 %v1120_v48, 0.0  ;;  %v1124_v25 = vadd.f32 %v1123_v16, %v6065_v60  ;;  %v1125_v41 = vpop.f32.mrb[63].mxu1  ;;  %2476 = vmatmul.mubr.bf16.gmra.mrb[120].mxu0 %v6363_v43  ;;  %v5382_v60 = vld [vmem:[#allocation8 + $0x208] ss:$16 sps:$4 sm:$0xff]  }
 0x1ff   : > { %v933_v57 = vadd.f32 %v932_v46, %v6061_v59  ;;  %v1249_v58 = vmax.f32 %v929_v33, 0.0  ;;  %v1251_v19 = vmax.f32 %v1122_v29, 0.0  ;;  %v1126_v39 = vadd.f32 %v1125_v41, %v6069_v62  ;;  %v5387_v62 = vld [vmem:[#allocation8 + $0x22c] ss:$16 sps:$4 sm:$0xff]   ;;  %v5385_v33 = vld [vmem:[#allocation8 + $0x228] ss:$16 sps:$4 sm:$0xff]  }
 0x200   : > { %v1252_v32 = vmax.f32 %v931_v20, 0.0  ;;  %v1254_v59 = vmax.f32 %v1124_v25, 0.0  ;;  %v5390_v20 = vld [vmem:[#allocation8 + $0x24c] ss:$16 sps:$4 sm:$0xff]   ;;  %v5388_v48 = vld [vmem:[#allocation8 + $0x248] ss:$16 sps:$4 sm:$0xff]  }
 0x201   : > { %v1253_v51 = vmax.f32 %v933_v57, 0.0  ;;  %v1255_v45 = vmax.f32 %v1126_v39, 0.0  ;;  %v5393_v57 = vld [vmem:[#allocation8 + $0x26c] ss:$16 sps:$4 sm:$0xff]   ;;  %v5439_v25 = vld [vmem:[#allocation8 + $0x328] ss:$16 sps:$4 sm:$0xff]  }
 0x202   : > { %v6379_v1 = vpack.c.bf16 %v1252_v32, %v1248_v38  ;;  %v6383_v18 = vpack.c.bf16 %v1254_v59, %v1250_v9  ;;  %v5396_v29 = vld [vmem:[#allocation8 + $0x28c] ss:$16 sps:$4 sm:$0xff]   ;;  %v5421_v32 = vld [vmem:[#allocation8 + $0x2e8] ss:$16 sps:$4 sm:$0xff]  }
 0x203   : > { %v6381_v46 = vpack.c.bf16 %v1253_v51, %v1249_v58  ;;  %v6385_v61 = vpack.c.bf16 %v1255_v45, %v1251_v19  ;;  %v5405_v16 = vld [vmem:[#allocation8 + $0x2ac] ss:$16 sps:$4 sm:$0xff]   ;;  %v5457_v58 = vld [vmem:[#allocation8 + $0x368] ss:$16 sps:$4 sm:$0xff]  }
 0x204   : > { %v5414_v38 = vld [vmem:[#allocation8 + $0x2cc] ss:$16 sps:$4 sm:$0xff]   ;;  %v5469_v19 = vld [vmem:[#allocation8 + $0x3a8] ss:$16 sps:$4 sm:$0xff]  }
 0x205   : > { %2292 = vmatprep.mubr.bf16.mxu1 %v6381_v46  ;;  %2485 = vmatprep.mubr.bf16.mxu0 %v6385_v61  ;;  %v5432_v9 = vld [vmem:[#allocation8 + $0x30c] ss:$16 sps:$4 sm:$0xff]   ;;  %v5475_v59 = vld [vmem:[#allocation8 + $0x3e8] ss:$16 sps:$4 sm:$0xff]  }
 0x206   : > { %2293 = vmatmul.mubr.bf16.gmra.mrb[124].mxu1 %v6379_v1  ;;  %2486 = vmatmul.mubr.bf16.gmra.mrb[124].mxu0 %v6383_v18  ;;  %v5450_v41 = vld [vmem:[#allocation8 + $0x34c] ss:$16 sps:$4 sm:$0xff]  }
 0x207   : > { %2528 = vmatprep.mubr.bf16.mxu1 %v6081_v23  ;;  %v5391_v23 = vld [vmem:[#allocation8 + $0x268] ss:$16 sps:$4 sm:$0xff]   ;;  %v5468_v51 = vld [vmem:[#allocation8 + $0x38c] ss:$16 sps:$4 sm:$0xff]  }
 0x208   : > { %v5474_v39 = vld [vmem:[#allocation8 + $0x3cc] ss:$16 sps:$4 sm:$0xff]  }
 0x20e   : > { %2529 = vmatmul.mubr.bf16.vlgmr.msra.gmra.mrb[128].mxu1 %v6079_v21  ;;  %v5394_v21 = vld [vmem:[#allocation8 + $0x288] ss:$16 sps:$4 sm:$0xff]  }
 0x20f   : > { %2690 = vmatpush1.bf16.msra.mxu1 %v5382_v60  ;;  %2538 = vmatprep.mubr.bf16.mxu1 %v6101_v63  ;;  %v5403_v63 = vld [vmem:[#allocation8 + $0x2a8] ss:$16 sps:$4 sm:$0xff]  }
 0x210   : > { %2691 = vmatprep.subr.bf16.mxu1 %v5387_v62 }
 0x213   : > { %2692 = vmatpush1.bf16.msra.mxu1 %v5385_v33 }
 0x214   : > { %2693 = vmatprep.subr.bf16.mxu1 %v5390_v20 }
 0x216   : > { %2539 = vmatmul.mubr.bf16.gmra.mrb[132].mxu1 %v6099_v55  ;;  %v5412_v55 = vld [vmem:[#allocation8 + $0x2c8] ss:$16 sps:$4 sm:$0xff]  }
 0x217   : > { %2548 = vmatprep.mubr.bf16.mxu1 %v6121_v36  ;;  %2694 = vmatpush1.bf16.msra.mxu1 %v5388_v48  ;;  %v5423_v36 = vld [vmem:[#allocation8 + $0x2ec] ss:$16 sps:$4 sm:$0xff]  }
 0x218   : > { %2695 = vmatprep.subr.bf16.mxu1 %v5393_v57 }
 0x21b   : > { %2696 = vmatpush1.bf16.msra.mxu1 %v5391_v23 }
 0x21c   : > { %2697 = vmatprep.subr.bf16.mxu1 %v5396_v29 }
 0x21e   : > { %2549 = vmatmul.mubr.bf16.gmra.mrb[136].mxu1 %v6119_v34  ;;  %v5430_v34 = vld [vmem:[#allocation8 + $0x308] ss:$16 sps:$4 sm:$0xff]  }
 0x21f   : > { %2558 = vmatprep.mubr.bf16.mxu1 %v6141_v17  ;;  %2698 = vmatpush1.bf16.msra.mxu1 %v5394_v21  ;;  %v5441_v17 = vld [vmem:[#allocation8 + $0x32c] ss:$16 sps:$4 sm:$0xff]  }
 0x220   : > { %2699 = vmatprep.subr.bf16.mxu1 %v5405_v16  ;;  %v5480_v21 = vld [vmem:[#allocation9 + $0x104] ss:$8 sps:$4 sm:$0xff]  }
 0x221   : > { %3663 = vmatprep.subr.bf16.mxu0 %v5480_v21 }
 0x223   : > { %2700 = vmatpush1.bf16.msra.mxu1 %v5403_v63 }
 0x224   : > { %2701 = vmatprep.subr.bf16.mxu1 %v5414_v38 }
 0x226   : > { %2559 = vmatmul.mubr.bf16.gmra.mrb[140].mxu1 %v6139_v15  ;;  %v5448_v15 = vld [vmem:[#allocation8 + $0x348] ss:$16 sps:$4 sm:$0xff]  }
 0x227   : > { %2568 = vmatprep.mubr.bf16.mxu1 %v6161_v5  ;;  %2702 = vmatpush1.bf16.msra.mxu1 %v5412_v55  ;;  %v5459_v5 = vld [vmem:[#allocation8 + $0x36c] ss:$16 sps:$4 sm:$0xff]  }
 0x228   : > { %2703 = vmatprep.subr.bf16.mxu1 %v5423_v36 }
 0x22b   : > { %2704 = vmatpush1.bf16.msra.mxu1 %v5421_v32 }
 0x22c   : > { %2705 = vmatprep.subr.bf16.mxu1 %v5432_v9 }
 0x22e   : > { %2569 = vmatmul.mubr.bf16.gmra.mrb[144].mxu1 %v6159_v2  ;;  %v5466_v2 = vld [vmem:[#allocation8 + $0x388] ss:$16 sps:$4 sm:$0xff]  }
 0x22f   : > { %2578 = vmatprep.mubr.bf16.mxu1 %v6181_v0  ;;  %2706 = vmatpush1.bf16.msra.mxu1 %v5430_v34  ;;  %v5471_v0 = vld [vmem:[#allocation8 + $0x3ac] ss:$16 sps:$4 sm:$0xff]  }
 0x230   : > { %2707 = vmatprep.subr.bf16.mxu1 %v5441_v17 }
 0x233   : > { %2708 = vmatpush1.bf16.msra.mxu1 %v5439_v25 }
 0x234   : > { %2709 = vmatprep.subr.bf16.mxu1 %v5450_v41 }
 0x236   : > { %2579 = vmatmul.mubr.bf16.gmra.mrb[148].mxu1 %v6179_v52  ;;  %v5472_v52 = vld [vmem:[#allocation8 + $0x3c8] ss:$16 sps:$4 sm:$0xff]  }
 0x237   : > { %2588 = vmatprep.mubr.bf16.mxu1 %v6201_v7  ;;  %2710 = vmatpush1.bf16.msra.mxu1 %v5448_v15  ;;  %v5477_v7 = vld [vmem:[#allocation8 + $0x3ec] ss:$16 sps:$4 sm:$0xff]  }
 0x238   : > { %2711 = vmatprep.subr.bf16.mxu1 %v5459_v5 }
 0x23b   : > { %2712 = vmatpush1.bf16.msra.mxu1 %v5457_v58 }
 0x23c   : > { %2713 = vmatprep.subr.bf16.mxu1 %v5468_v51 }
 0x23e   : > { %2589 = vmatmul.mubr.bf16.gmra.mrb[152].mxu1 %v6199_v3  ;;  %v6415_v3 = vld [vmem:[%s6876_s4] sm:$0xf] }
 0x23f   : > { %2598 = vmatprep.mubr.bf16.mxu1 %v6221_v13  ;;  %2714 = vmatpush1.bf16.msra.mxu1 %v5466_v2 }
 0x240   : > { %2715 = vmatprep.subr.bf16.mxu1 %v5471_v0 }
 0x243   : > { %2716 = vmatpush1.bf16.msra.mxu1 %v5469_v19 }
 0x244   : > { %2717 = vmatprep.subr.bf16.mxu1 %v5474_v39 }
 0x246   : > { %2599 = vmatmul.mubr.bf16.gmra.mrb[156].mxu1 %v6219_v14  ;;  %v6420_v14 = vrot.slane %v6415_v3, %v6047_v54 }
 0x247   : > { %2608 = vmatprep.mubr.bf16.mxu1 %v6241_v24  ;;  %2718 = vmatpush1.bf16.msra.mxu1 %v5472_v52 }
 0x248   : > { %2719 = vmatprep.subr.bf16.mxu1 %v5477_v7 }
 0x24b   : > { %2720 = vmatpush1.bf16.msra.mxu1 %v5475_v59  ;;  %v5481_v59 = vld [vmem:[#allocation9 + $0x110] ss:$8 sps:$4 sm:$0xff]  }
 0x24e   : > { %2609 = vmatmul.mubr.bf16.gmra.mrb[160].mxu1 %v6239_v37 }
 0x24f   : > { %2618 = vmatprep.mubr.bf16.mxu1 %v6261_v53  ;;  %v6425_v53 = vrot.slane %v6415_v3, %v6053_v56 }
 0x256   : > { %2619 = vmatmul.mubr.bf16.gmra.mrb[164].mxu1 %v6259_v30 }
 0x257   : > { %2628 = vmatprep.mubr.bf16.mxu1 %v6281_v35 }
 0x25e   : > { %2629 = vmatmul.mubr.bf16.gmra.mrb[168].mxu1 %v6279_v50 }
 0x25f   : > { %2638 = vmatprep.mubr.bf16.mxu1 %v6301_v6 }
 0x261   : > { %v2144_v13 = vpop.f32.mrb[64].mxu1  ;;  %v2337_v45 = vpop.f32.mrb[64].mxu0 }
 0x262   : > { %v2145_v37 = vadd.f32 %v2144_v13, %v6420_v14  ;;  %v2146_v24 = vpop.f32.mrb[65].mxu1  ;;  %v2339_v33 = vpop.f32.mrb[65].mxu0  ;;  %v5483_v13 = vld [vmem:[#allocation9 + $0x114] ss:$8 sps:$4 sm:$0xff]  }
 0x263   : > { %v2147_v30 = vadd.f32 %v2146_v24, %v6425_v53  ;;  %v2148_v35 = vpop.f32.mrb[66].mxu1  ;;  %v2341_v48 = vpop.f32.mrb[66].mxu0 }
 0x264   : > { %v2149_v50 = vadd.f32 %v2148_v35, %v6420_v14  ;;  %v2338_v60 = vadd.f32 %v2337_v45, %v2145_v37  ;;  %v2150_v62 = vpop.f32.mrb[67].mxu1  ;;  %v2343_v23 = vpop.f32.mrb[67].mxu0 }
 0x265   : > { %v2151_v20 = vadd.f32 %v2150_v62, %v6425_v53  ;;  %v2340_v6 = vadd.f32 %v2339_v33, %v2147_v30 }
 0x266   : > { %v2342_v57 = vadd.f32 %v2341_v48, %v2149_v50  ;;  %2639 = vmatmul.mubr.bf16.gmra.mrb[172].mxu1 %v6299_v11  ;;  %v2882_v16 = vmax.f32 %v2338_v60, 0.0  ;;  %v5478_v11 = vld [vmem:[#allocation9 + $0x100] ss:$8 sps:$4 sm:$0xff]  }
 0x267   : > { %v2344_v29 = vadd.f32 %v2343_v23, %v2151_v20  ;;  %2648 = vmatprep.mubr.bf16.mxu1 %v6321_v49  ;;  %v2883_v38 = vmax.f32 %v2340_v6, 0.0 }
 0x268   : > { %v2886_v63 = vmax.f32 %v2342_v57, 0.0 }
 0x269   : > { %v2887_v55 = vmax.f32 %v2344_v29, 0.0  ;;  %v2154_v36 = vpop.f32.mrb[68].mxu1  ;;  %v2347_v15 = vpop.f32.mrb[68].mxu0 }
 0x26a   : > { %v3010_v32 = vpack.c.bf16 %v2886_v63, %v2882_v16  ;;  %v2155_v9 = vadd.f32 %v2154_v36, %v6420_v14  ;;  %v2156_v34 = vpop.f32.mrb[69].mxu1  ;;  %v2349_v51 = vpop.f32.mrb[69].mxu0  ;;  %v5484_v36 = vld [vmem:[#allocation9 + $0x120] ss:$8 sps:$4 sm:$0xff]  }
 0x26b   : > { %v3011_v17 = vpack.c.bf16 %v2887_v55, %v2883_v38  ;;  %v2157_v25 = vadd.f32 %v2156_v34, %v6425_v53  ;;  %v2158_v41 = vpop.f32.mrb[70].mxu1  ;;  %v2351_v19 = vpop.f32.mrb[70].mxu0 }
 0x26c   : > { %v2159_v5 = vadd.f32 %v2158_v41, %v6420_v14  ;;  %v2348_v49 = vadd.f32 %v2347_v15, %v2155_v9  ;;  %v2160_v58 = vpop.f32.mrb[71].mxu1  ;;  %v2353_v52 = vpop.f32.mrb[71].mxu0 }
 0x26d   : > { %v2161_v2 = vadd.f32 %v2160_v58, %v6425_v53  ;;  %v2350_v0 = vadd.f32 %v2349_v51, %v2157_v25  ;;  %3502 = vmatprep.mubr.bf16.mxu0 %v3011_v17 }
 0x26e   : > { %v2352_v39 = vadd.f32 %v2351_v19, %v2159_v5  ;;  %2649 = vmatmul.mubr.bf16.gmra.mrb[176].mxu1 %v6319_v47  ;;  %3503 = vmatmul.mubr.bf16.vlgmr.msra.gmra.mrb[128].mxu0 %v3010_v32  ;;  %v2890_v37 = vmax.f32 %v2348_v49, 0.0  ;;  %v5486_v32 = vld [vmem:[#allocation9 + $0x124] ss:$8 sps:$4 sm:$0xff]  }
 0x26f   : > { %v2354_v7 = vadd.f32 %v2353_v52, %v2161_v2  ;;  %2658 = vmatprep.mubr.bf16.mxu1 %v6341_v26  ;;  %3664 = vmatpush1.bf16.msra.mxu0 %v5478_v11  ;;  %v2891_v30 = vmax.f32 %v2350_v0, 0.0 }
 0x270   : > { %v2894_v24 = vmax.f32 %v2352_v39, 0.0  ;;  %3665 = vmatprep.subr.bf16.mxu0 %v5483_v13 }
 0x271   : > { %v2895_v35 = vmax.f32 %v2354_v7, 0.0  ;;  %v2164_v45 = vpop.f32.mrb[72].mxu1  ;;  %v2357_v6 = vpop.f32.mrb[72].mxu0 }
 0x272   : > { %v3014_v50 = vpack.c.bf16 %v2894_v24, %v2890_v37  ;;  %v2165_v60 = vadd.f32 %v2164_v45, %v6420_v14  ;;  %v2166_v62 = vpop.f32.mrb[73].mxu1  ;;  %v2359_v23 = vpop.f32.mrb[73].mxu0  ;;  %v5487_v24 = vld [vmem:[#allocation9 + $0x130] ss:$8 sps:$4 sm:$0xff]  }
 0x273   : > { %v3015_v33 = vpack.c.bf16 %v2895_v35, %v2891_v30  ;;  %v2167_v47 = vadd.f32 %v2166_v62, %v6425_v53  ;;  %v2168_v20 = vpop.f32.mrb[74].mxu1  ;;  %3666 = vmatpush1.bf16.msra.mxu0 %v5481_v59  ;;  %v2361_v16 = vpop.f32.mrb[74].mxu0  ;;  %v5489_v30 = vld [vmem:[#allocation9 + $0x134] ss:$8 sps:$4 sm:$0xff]  }
 0x274   : > { %v2169_v26 = vadd.f32 %v2168_v20, %v6420_v14  ;;  %v2358_v48 = vadd.f32 %v2357_v6, %v2165_v60  ;;  %v2170_v57 = vpop.f32.mrb[75].mxu1  ;;  %v2363_v38 = vpop.f32.mrb[75].mxu0  ;;  %3667 = vmatprep.subr.bf16.mxu0 %v5486_v32  ;;  %v5492_v32 = vld [vmem:[#allocation9 + $0x144] ss:$8 sps:$4 sm:$0xff]  }
 0x275   : > { %v2171_v29 = vadd.f32 %v2170_v57, %v6425_v53  ;;  %v2360_v21 = vadd.f32 %v2359_v23, %v2167_v47  ;;  %3512 = vmatprep.mubr.bf16.mxu0 %v3015_v33 }
 0x276   : > { %v2362_v63 = vadd.f32 %v2361_v16, %v2169_v26  ;;  %2659 = vmatmul.mubr.bf16.gmra.mrb[180].mxu1 %v6339_v12  ;;  %3513 = vmatmul.mubr.bf16.gmra.mrb[132].mxu0 %v3014_v50  ;;  %v2898_v9 = vmax.f32 %v2358_v48, 0.0 }
 0x277   : > { %v2364_v55 = vadd.f32 %v2363_v38, %v2171_v29  ;;  %2668 = vmatprep.mubr.bf16.mxu1 %v6361_v42  ;;  %v2899_v17 = vmax.f32 %v2360_v21, 0.0  ;;  %3668 = vmatpush1.bf16.msra.mxu0 %v5484_v36  ;;  %v5490_v36 = vld [vmem:[#allocation9 + $0x140] ss:$8 sps:$4 sm:$0xff]  }
 0x278   : > { %v2902_v34 = vmax.f32 %v2362_v63, 0.0  ;;  %3669 = vmatprep.subr.bf16.mxu0 %v5489_v30 }
 0x279   : > { %v2903_v25 = vmax.f32 %v2364_v55, 0.0  ;;  %v2174_v41 = vpop.f32.mrb[76].mxu1  ;;  %v2367_v51 = vpop.f32.mrb[76].mxu0 }
 0x27a   : > { %v3018_v15 = vpack.c.bf16 %v2902_v34, %v2898_v9  ;;  %v2175_v11 = vadd.f32 %v2174_v41, %v6420_v14  ;;  %v2176_v5 = vpop.f32.mrb[77].mxu1  ;;  %v2369_v19 = vpop.f32.mrb[77].mxu0  ;;  %v5495_v34 = vld [vmem:[#allocation9 + $0x154] ss:$8 sps:$4 sm:$0xff]  }
 0x27b   : > { %v3019_v49 = vpack.c.bf16 %v2903_v25, %v2899_v17  ;;  %v2177_v12 = vadd.f32 %v2176_v5, %v6425_v53  ;;  %v2178_v58 = vpop.f32.mrb[78].mxu1  ;;  %v2371_v7 = vpop.f32.mrb[78].mxu0  ;;  %3670 = vmatpush1.bf16.msra.mxu0 %v5487_v24  ;;  %v5493_v5 = vld [vmem:[#allocation9 + $0x150] ss:$8 sps:$4 sm:$0xff]  }
 0x27c   : > { %v2179_v42 = vadd.f32 %v2178_v58, %v6420_v14  ;;  %v2368_v2 = vadd.f32 %v2367_v51, %v2175_v11  ;;  %v2180_v0 = vpop.f32.mrb[79].mxu1  ;;  %v2373_v13 = vpop.f32.mrb[79].mxu0  ;;  %3671 = vmatprep.subr.bf16.mxu0 %v5492_v32 }
 0x27d   : > { %v2181_v39 = vadd.f32 %v2180_v0, %v6425_v53  ;;  %v2370_v52 = vadd.f32 %v2369_v19, %v2177_v12  ;;  %3522 = vmatprep.mubr.bf16.mxu0 %v3019_v49 }
 0x27e   : > { %v2372_v59 = vadd.f32 %v2371_v7, %v2179_v42  ;;  %2669 = vmatmul.mubr.bf16.gmra.mrb[184].mxu1 %v6359_v10  ;;  %3523 = vmatmul.mubr.bf16.gmra.mrb[136].mxu0 %v3018_v15  ;;  %v2906_v35 = vmax.f32 %v2368_v2, 0.0 }
 0x27f   : > { %v2374_v37 = vadd.f32 %v2373_v13, %v2181_v39  ;;  %2678 = vmatprep.mubr.bf16.mxu1 %v6381_v46  ;;  %v2907_v50 = vmax.f32 %v2370_v52, 0.0  ;;  %3672 = vmatpush1.bf16.msra.mxu0 %v5490_v36  ;;  %v5502_v36 = vld [vmem:[#allocation9 + $0x180] ss:$8 sps:$4 sm:$0xff]  }
 0x280   : > { %v2910_v45 = vmax.f32 %v2372_v59, 0.0  ;;  %3673 = vmatprep.subr.bf16.mxu0 %v5495_v34  ;;  %v5507_v34 = vld [vmem:[#allocation9 + $0x194] ss:$8 sps:$4 sm:$0xff]  }
 0x281   : > { %v2911_v60 = vmax.f32 %v2374_v37, 0.0  ;;  %v2184_v62 = vpop.f32.mrb[80].mxu1  ;;  %v2377_v48 = vpop.f32.mrb[80].mxu0  ;;  %v5496_v37 = vld [vmem:[#allocation9 + $0x160] ss:$8 sps:$4 sm:$0xff]  }
 0x282   : > { %v3022_v33 = vpack.c.bf16 %v2910_v45, %v2906_v35  ;;  %v2185_v47 = vadd.f32 %v2184_v62, %v6420_v14  ;;  %v2186_v20 = vpop.f32.mrb[81].mxu1  ;;  %v2379_v29 = vpop.f32.mrb[81].mxu0  ;;  %v5501_v35 = vld [vmem:[#allocation9 + $0x174] ss:$8 sps:$4 sm:$0xff]  }
 0x283   : > { %v3023_v6 = vpack.c.bf16 %v2911_v60, %v2907_v50  ;;  %v2187_v10 = vadd.f32 %v2186_v20, %v6425_v53  ;;  %v2188_v26 = vpop.f32.mrb[82].mxu1  ;;  %v2381_v63 = vpop.f32.mrb[82].mxu0  ;;  %3674 = vmatpush1.bf16.msra.mxu0 %v5493_v5  ;;  %v5499_v20 = vld [vmem:[#allocation9 + $0x170] ss:$8 sps:$4 sm:$0xff]  }
 0x284   : > { %v2189_v46 = vadd.f32 %v2188_v26, %v6420_v14  ;;  %v2378_v57 = vadd.f32 %v2377_v48, %v2185_v47  ;;  %v2190_v23 = vpop.f32.mrb[83].mxu1  ;;  %v2383_v55 = vpop.f32.mrb[83].mxu0 }
 0x285   : > { %v2191_v21 = vadd.f32 %v2190_v23, %v6425_v53  ;;  %v2380_v16 = vadd.f32 %v2379_v29, %v2187_v10  ;;  %3532 = vmatprep.mubr.bf16.mxu0 %v3023_v6  ;;  %v5504_v23 = vld [vmem:[#allocation9 + $0x184] ss:$8 sps:$4 sm:$0xff]  }
 0x286   : > { %v2382_v38 = vadd.f32 %v2381_v63, %v2189_v46  ;;  %2679 = vmatmul.mubr.bf16.gmra.mrb[188].mxu1 %v6379_v1  ;;  %3533 = vmatmul.mubr.bf16.gmra.mrb[140].mxu0 %v3022_v33  ;;  %v2914_v17 = vmax.f32 %v2378_v57, 0.0 }
 0x287   : > { %v2384_v9 = vadd.f32 %v2383_v55, %v2191_v21  ;;  %2721 = vmatprep.mubr.bf16.mxu1 %v6086_v31  ;;  %v2915_v41 = vmax.f32 %v2380_v16, 0.0  ;;  %v5498_v31 = vld [vmem:[#allocation9 + $0x164] ss:$8 sps:$4 sm:$0xff]  }
 0x288   : > { %v2918_v25 = vmax.f32 %v2382_v38, 0.0  ;;  %3675 = vmatprep.subr.bf16.mxu0 %v5498_v31  ;;  %v5510_v31 = vld [vmem:[#allocation9 + $0x1a4] ss:$8 sps:$4 sm:$0xff]  }
 0x289   : > { %v2919_v15 = vmax.f32 %v2384_v9, 0.0  ;;  %v2194_v11 = vpop.f32.mrb[84].mxu1  ;;  %v2387_v2 = vpop.f32.mrb[84].mxu0  ;;  %3676 = vmatpush1.bf16.msra.mxu0 %v5496_v37 }
 0x28a   : > { %v3026_v49 = vpack.c.bf16 %v2918_v25, %v2914_v17  ;;  %v2195_v12 = vadd.f32 %v2194_v11, %v6420_v14  ;;  %v2196_v58 = vpop.f32.mrb[85].mxu1  ;;  %v2389_v52 = vpop.f32.mrb[85].mxu0  ;;  %3677 = vmatprep.subr.bf16.mxu0 %v5501_v35 }
 0x28b   : > { %v3027_v1 = vpack.c.bf16 %v2919_v15, %v2915_v41  ;;  %v2197_v51 = vadd.f32 %v2196_v58, %v6425_v53  ;;  %v2198_v42 = vpop.f32.mrb[86].mxu1  ;;  %v2391_v13 = vpop.f32.mrb[86].mxu0 }
 0x28c   : > { %v2199_v0 = vadd.f32 %v2198_v42, %v6420_v14  ;;  %v2388_v19 = vadd.f32 %v2387_v2, %v2195_v12  ;;  %v2200_v39 = vpop.f32.mrb[87].mxu1  ;;  %v2393_v30 = vpop.f32.mrb[87].mxu0 }
 0x28d   : > { %v2201_v7 = vadd.f32 %v2200_v39, %v6425_v53  ;;  %v2390_v59 = vadd.f32 %v2389_v52, %v2197_v51  ;;  %3542 = vmatprep.mubr.bf16.mxu0 %v3027_v1  ;;  %3678 = vmatpush1.bf16.msra.mxu0 %v5499_v20 }
 0x28e   : > { %v2392_v24 = vadd.f32 %v2391_v13, %v2199_v0  ;;  %2722 = vmatmul.mubr.bf16.vlgmr.msra.gmra.mrb[128].mxu1 %v6083_v27  ;;  %3543 = vmatmul.mubr.bf16.gmra.mrb[144].mxu0 %v3026_v49  ;;  %v2922_v50 = vmax.f32 %v2388_v19, 0.0  ;;  %v5505_v49 = vld [vmem:[#allocation9 + $0x190] ss:$8 sps:$4 sm:$0xff]   ;;  %v5508_v13 = vld [vmem:[#allocation9 + $0x1a0] ss:$8 sps:$4 sm:$0xff]  }
 0x28f   : > { %v2394_v45 = vadd.f32 %v2393_v30, %v2201_v7  ;;  %2731 = vmatprep.mubr.bf16.mxu1 %v6106_v8  ;;  %v2923_v62 = vmax.f32 %v2390_v59, 0.0  ;;  %3679 = vmatprep.subr.bf16.mxu0 %v5504_v23  ;;  %v5513_v30 = vld [vmem:[#allocation9 + $0x1b4] ss:$8 sps:$4 sm:$0xff]  }
 0x290   : > { %v2926_v60 = vmax.f32 %v2392_v24, 0.0 }
 0x291   : > { %v2927_v33 = vmax.f32 %v2394_v45, 0.0  ;;  %v2204_v47 = vpop.f32.mrb[88].mxu1  ;;  %v2397_v57 = vpop.f32.mrb[88].mxu0  ;;  %3680 = vmatpush1.bf16.msra.mxu0 %v5502_v36  ;;  %v5519_v36 = vld [vmem:[#allocation9 + $0x1d4] ss:$8 sps:$4 sm:$0xff]  }
 0x292   : > { %v3030_v6 = vpack.c.bf16 %v2926_v60, %v2922_v50  ;;  %v2205_v10 = vadd.f32 %v2204_v47, %v6420_v14  ;;  %v2206_v26 = vpop.f32.mrb[89].mxu1  ;;  %v2399_v16 = vpop.f32.mrb[89].mxu0  ;;  %3681 = vmatprep.subr.bf16.mxu0 %v5507_v34  ;;  %v5511_v47 = vld [vmem:[#allocation9 + $0x1b0] ss:$8 sps:$4 sm:$0xff]  }
 0x293   : > { %v3031_v48 = vpack.c.bf16 %v2927_v33, %v2923_v62  ;;  %v2207_v27 = vadd.f32 %v2206_v26, %v6425_v53  ;;  %v2208_v46 = vpop.f32.mrb[90].mxu1  ;;  %v2401_v55 = vpop.f32.mrb[90].mxu0 }
 0x294   : > { %v2209_v8 = vadd.f32 %v2208_v46, %v6420_v14  ;;  %v2398_v29 = vadd.f32 %v2397_v57, %v2205_v10  ;;  %v2210_v21 = vpop.f32.mrb[91].mxu1  ;;  %v2403_v9 = vpop.f32.mrb[91].mxu0  ;;  %v5516_v46 = vld [vmem:[#allocation9 + $0x1c4] ss:$8 sps:$4 sm:$0xff]  }
 0x295   : > { %v2211_v63 = vadd.f32 %v2210_v21, %v6425_v53  ;;  %v2400_v38 = vadd.f32 %v2399_v16, %v2207_v27  ;;  %3552 = vmatprep.mubr.bf16.mxu0 %v3031_v48  ;;  %3682 = vmatpush1.bf16.msra.mxu0 %v5505_v49 }
 0x296   : > { %v2402_v32 = vadd.f32 %v2401_v55, %v2209_v8  ;;  %2732 = vmatmul.mubr.bf16.gmra.mrb[132].mxu1 %v6103_v4  ;;  %3553 = vmatmul.mubr.bf16.gmra.mrb[148].mxu0 %v3030_v6  ;;  %v2930_v25 = vmax.f32 %v2398_v29, 0.0 }
 0x297   : > { %v2404_v17 = vadd.f32 %v2403_v9, %v2211_v63  ;;  %2741 = vmatprep.mubr.bf16.mxu1 %v6126_v44  ;;  %v2931_v15 = vmax.f32 %v2400_v38, 0.0  ;;  %3683 = vmatprep.subr.bf16.mxu0 %v5510_v31  ;;  %v5514_v63 = vld [vmem:[#allocation9 + $0x1c0] ss:$8 sps:$4 sm:$0xff]   ;;  %v6950_v9 = vld [vmem:[#allocation20_spill] sm:$0xff] }
 0x298   : > { %v2934_v41 = vmax.f32 %v2402_v32, 0.0 }
 0x299   : > { %v2935_v11 = vmax.f32 %v2404_v17, 0.0  ;;  %v2214_v5 = vpop.f32.mrb[92].mxu1  ;;  %v2407_v2 = vpop.f32.mrb[92].mxu0  ;;  %3684 = vmatpush1.bf16.msra.mxu0 %v5508_v13  ;;  %v6951_v13 = vld [vmem:[#allocation19_spill] sm:$0xff] }
 0x29a   : > { %v3034_v12 = vpack.c.bf16 %v2934_v41, %v2930_v25  ;;  %v2215_v58 = vadd.f32 %v2214_v5, %v6420_v14  ;;  %v2216_v1 = vpop.f32.mrb[93].mxu1  ;;  %v2409_v39 = vpop.f32.mrb[93].mxu0  ;;  %3685 = vmatprep.subr.bf16.mxu0 %v5513_v30 }
 0x29b   : > { %v3035_v51 = vpack.c.bf16 %v2935_v11, %v2931_v15  ;;  %v2217_v4 = vadd.f32 %v2216_v1, %v6425_v53  ;;  %v2218_v42 = vpop.f32.mrb[94].mxu1  ;;  %v2411_v59 = vpop.f32.mrb[94].mxu0  ;;  %v5517_v11 = vld [vmem:[#allocation9 + $0x1d0] ss:$8 sps:$4 sm:$0xff]  }
 0x29c   : > { %v2219_v44 = vadd.f32 %v2218_v42, %v6420_v14  ;;  %v2408_v0 = vadd.f32 %v2407_v2, %v2215_v58  ;;  %v2220_v19 = vpop.f32.mrb[95].mxu1  ;;  %v2413_v24 = vpop.f32.mrb[95].mxu0 }
 0x29d   : > { %v2221_v52 = vadd.f32 %v2220_v19, %v6425_v53  ;;  %v2410_v7 = vadd.f32 %v2409_v39, %v2217_v4  ;;  %3562 = vmatprep.mubr.bf16.mxu0 %v3035_v51  ;;  %3686 = vmatpush1.bf16.msra.mxu0 %v5511_v47  ;;  %v5522_v4 = vld [vmem:[#allocation9 + $0x1e4] ss:$8 sps:$4 sm:$0xff]  }
 0x29e   : > { %v2412_v37 = vadd.f32 %v2411_v59, %v2219_v44  ;;  %2742 = vmatmul.mubr.bf16.gmra.mrb[136].mxu1 %v6123_v40  ;;  %3563 = vmatmul.mubr.bf16.gmra.mrb[152].mxu0 %v3034_v12  ;;  %v2938_v45 = vmax.f32 %v2408_v0, 0.0 }
 0x29f   : > { %v2414_v35 = vadd.f32 %v2413_v24, %v2221_v52  ;;  %2751 = vmatprep.mubr.bf16.mxu1 %v6146_v28  ;;  %v2939_v60 = vmax.f32 %v2410_v7, 0.0  ;;  %3687 = vmatprep.subr.bf16.mxu0 %v5516_v46  ;;  %v5520_v52 = vld [vmem:[#allocation9 + $0x1e0] ss:$8 sps:$4 sm:$0xff]  }
 0x2a0   : > { %v2942_v50 = vmax.f32 %v2412_v37, 0.0  ;;  %v6952_v24 = vld [vmem:[#allocation22_spill] sm:$0xff] }
 0x2a1   : > { %v2943_v62 = vmax.f32 %v2414_v35, 0.0  ;;  %v2224_v33 = vpop.f32.mrb[96].mxu1  ;;  %v2417_v27 = vpop.f32.mrb[96].mxu0  ;;  %3688 = vmatpush1.bf16.msra.mxu0 %v5514_v63  ;;  %v6954_v63 = vld [vmem:[#allocation24_spill] sm:$0xff] }
 0x2a2   : > { %v3038_v20 = vpack.c.bf16 %v2942_v50, %v2938_v45  ;;  %v2225_v6 = vadd.f32 %v2224_v33, %v6420_v14  ;;  %v2226_v10 = vpop.f32.mrb[97].mxu1  ;;  %v2419_v8 = vpop.f32.mrb[97].mxu0  ;;  %3689 = vmatprep.subr.bf16.mxu0 %v5519_v36 }
 0x2a3   : > { %v3039_v26 = vpack.c.bf16 %v2943_v62, %v2939_v60  ;;  %v2227_v40 = vadd.f32 %v2226_v10, %v6425_v53  ;;  %v2228_v48 = vpop.f32.mrb[98].mxu1  ;;  %v2421_v16 = vpop.f32.mrb[98].mxu0 }
 0x2a4   : > { %v2229_v28 = vadd.f32 %v2228_v48, %v6420_v14  ;;  %v2418_v57 = vadd.f32 %v2417_v27, %v2225_v6  ;;  %v2230_v23 = vpop.f32.mrb[99].mxu1  ;;  %v2423_v55 = vpop.f32.mrb[99].mxu0 }
 0x2a5   : > { %v2231_v29 = vadd.f32 %v2230_v23, %v6425_v53  ;;  %v2420_v21 = vadd.f32 %v2419_v8, %v2227_v40  ;;  %3572 = vmatprep.mubr.bf16.mxu0 %v3039_v26  ;;  %3690 = vmatpush1.bf16.msra.mxu0 %v5517_v11 }
 0x2a6   : > { %v2422_v38 = vadd.f32 %v2421_v16, %v2229_v28  ;;  %2752 = vmatmul.mubr.bf16.gmra.mrb[140].mxu1 %v6143_v22  ;;  %3573 = vmatmul.mubr.bf16.gmra.mrb[156].mxu0 %v3038_v20  ;;  %v2946_v34 = vmax.f32 %v2418_v57, 0.0 }
 0x2a7   : > { %v2424_v32 = vadd.f32 %v2423_v55, %v2231_v29  ;;  %2761 = vmatprep.mubr.bf16.mxu1 %v6950_v9  ;;  %v2947_v25 = vmax.f32 %v2420_v21, 0.0  ;;  %3691 = vmatprep.subr.bf16.mxu0 %v5522_v4  ;;  %v6953_v21 = vld [vmem:[#allocation21_spill] sm:$0xff] }
 0x2a8   : > { %v2950_v17 = vmax.f32 %v2422_v38, 0.0 }
 0x2a9   : > { %v2951_v41 = vmax.f32 %v2424_v32, 0.0  ;;  %v2234_v15 = vpop.f32.mrb[100].mxu1  ;;  %v2427_v51 = vpop.f32.mrb[100].mxu0  ;;  %3692 = vmatpush1.bf16.msra.mxu0 %v5520_v52 }
 0x2aa   : > { %v3042_v5 = vpack.c.bf16 %v2950_v17, %v2946_v34  ;;  %v2235_v49 = vadd.f32 %v2234_v15, %v6420_v14  ;;  %v2236_v12 = vpop.f32.mrb[101].mxu1  ;;  %v2429_v44 = vpop.f32.mrb[101].mxu0 }
 0x2ab   : > { %v3043_v58 = vpack.c.bf16 %v2951_v41, %v2947_v25  ;;  %v2237_v22 = vadd.f32 %v2236_v12, %v6425_v53  ;;  %v2238_v1 = vpop.f32.mrb[102].mxu1  ;;  %v2431_v39 = vpop.f32.mrb[102].mxu0 }
 0x2ac   : > { %v2239_v42 = vadd.f32 %v2238_v1, %v6420_v14  ;;  %v2428_v2 = vadd.f32 %v2427_v51, %v2235_v49  ;;  %v2240_v31 = vpop.f32.mrb[103].mxu1  ;;  %v2433_v59 = vpop.f32.mrb[103].mxu0 }
 0x2ad   : > { %v2241_v0 = vadd.f32 %v2240_v31, %v6425_v53  ;;  %v2430_v19 = vadd.f32 %v2429_v44, %v2237_v22  ;;  %3582 = vmatprep.mubr.bf16.mxu0 %v3043_v58  ;;  %v6955_v31 = vld [vmem:[#allocation23_spill] sm:$0xff] }
 0x2ae   : > { %v2432_v7 = vadd.f32 %v2431_v39, %v2239_v42  ;;  %2762 = vmatmul.mubr.bf16.gmra.mrb[144].mxu1 %v6951_v13  ;;  %3583 = vmatmul.mubr.bf16.gmra.mrb[160].mxu0 %v3042_v5  ;;  %v2954_v30 = vmax.f32 %v2428_v2, 0.0 }
 0x2af   : > { %v2434_v37 = vadd.f32 %v2433_v59, %v2241_v0  ;;  %2771 = vmatprep.mubr.bf16.mxu1 %v6952_v24  ;;  %v2955_v45 = vmax.f32 %v2430_v19, 0.0  ;;  %v6956_v0 = vld [vmem:[#allocation26_spill] sm:$0xff] }
 0x2b0   : > { %v2958_v35 = vmax.f32 %v2432_v7, 0.0 }
 0x2b1   : > { %v2959_v50 = vmax.f32 %v2434_v37, 0.0  ;;  %v2244_v60 = vpop.f32.mrb[104].mxu1  ;;  %v2437_v26 = vpop.f32.mrb[104].mxu0 }
 0x2b2   : > { %v3046_v62 = vpack.c.bf16 %v2958_v35, %v2954_v30  ;;  %v2245_v33 = vadd.f32 %v2244_v60, %v6420_v14  ;;  %v2246_v47 = vpop.f32.mrb[105].mxu1  ;;  %v2439_v46 = vpop.f32.mrb[105].mxu0 }
 0x2b3   : > { %v3047_v20 = vpack.c.bf16 %v2959_v50, %v2955_v45  ;;  %v2247_v6 = vadd.f32 %v2246_v47, %v6425_v53  ;;  %v2248_v10 = vpop.f32.mrb[106].mxu1  ;;  %v2441_v23 = vpop.f32.mrb[106].mxu0 }
 0x2b4   : > { %v2249_v40 = vadd.f32 %v2248_v10, %v6420_v14  ;;  %v2438_v48 = vadd.f32 %v2437_v26, %v2245_v33  ;;  %v2250_v27 = vpop.f32.mrb[107].mxu1  ;;  %v2443_v29 = vpop.f32.mrb[107].mxu0 }
 0x2b5   : > { %v2251_v28 = vadd.f32 %v2250_v27, %v6425_v53  ;;  %v2440_v57 = vadd.f32 %v2439_v46, %v2247_v6  ;;  %3592 = vmatprep.mubr.bf16.mxu0 %v3047_v20  ;;  %v6958_v46 = vld [vmem:[#allocation28_spill] sm:$0xff] }
 0x2b6   : > { %v2442_v8 = vadd.f32 %v2441_v23, %v2249_v40  ;;  %2772 = vmatmul.mubr.bf16.gmra.mrb[148].mxu1 %v6953_v21  ;;  %3593 = vmatmul.mubr.bf16.gmra.mrb[164].mxu0 %v3046_v62  ;;  %v2962_v38 = vmax.f32 %v2438_v48, 0.0  ;;  %v6957_v48 = vld [vmem:[#allocation25_spill] sm:$0xff] }
 0x2b7   : > { %v2444_v16 = vadd.f32 %v2443_v29, %v2251_v28  ;;  %2781 = vmatprep.mubr.bf16.mxu1 %v6954_v63  ;;  %v2963_v36 = vmax.f32 %v2440_v57, 0.0 }
 0x2b8   : > { %v2966_v55 = vmax.f32 %v2442_v8, 0.0 }
 0x2b9   : > { %v2967_v32 = vmax.f32 %v2444_v16, 0.0  ;;  %v2254_v9 = vpop.f32.mrb[108].mxu1  ;;  %v2447_v5 = vpop.f32.mrb[108].mxu0 }
 0x2ba   : > { %v3050_v34 = vpack.c.bf16 %v2966_v55, %v2962_v38  ;;  %v2255_v17 = vadd.f32 %v2254_v9, %v6420_v14  ;;  %v2256_v25 = vpop.f32.mrb[109].mxu1  ;;  %v2449_v22 = vpop.f32.mrb[109].mxu0 }
 0x2bb   : > { %v3051_v41 = vpack.c.bf16 %v2967_v32, %v2963_v36  ;;  %v2257_v15 = vadd.f32 %v2256_v25, %v6425_v53  ;;  %v2258_v11 = vpop.f32.mrb[110].mxu1  ;;  %v2451_v4 = vpop.f32.mrb[110].mxu0 }
 0x2bc   : > { %v2259_v49 = vadd.f32 %v2258_v11, %v6420_v14  ;;  %v2448_v12 = vadd.f32 %v2447_v5, %v2255_v17  ;;  %v2260_v58 = vpop.f32.mrb[111].mxu1  ;;  %v2453_v2 = vpop.f32.mrb[111].mxu0 }
 0x2bd   : > { %v2261_v1 = vadd.f32 %v2260_v58, %v6425_v53  ;;  %v2450_v51 = vadd.f32 %v2449_v22, %v2257_v15  ;;  %3602 = vmatprep.mubr.bf16.mxu0 %v3051_v41  ;;  %v6960_v22 = vld [vmem:[#allocation30_spill] sm:$0xff] }
 0x2be   : > { %v2452_v42 = vadd.f32 %v2451_v4, %v2259_v49  ;;  %2782 = vmatmul.mubr.bf16.gmra.mrb[152].mxu1 %v6955_v31  ;;  %3603 = vmatmul.mubr.bf16.gmra.mrb[168].mxu0 %v3050_v34  ;;  %v2970_v19 = vmax.f32 %v2448_v12, 0.0  ;;  %v6959_v12 = vld [vmem:[#allocation27_spill] sm:$0xff] }
 0x2bf   : > { %v2454_v44 = vadd.f32 %v2453_v2, %v2261_v1  ;;  %2791 = vmatprep.mubr.bf16.mxu1 %v6956_v0  ;;  %v2971_v52 = vmax.f32 %v2450_v51, 0.0 }
 0x2c0   : > { %v2974_v39 = vmax.f32 %v2452_v42, 0.0 }
 0x2c1   : > { %v2975_v7 = vmax.f32 %v2454_v44, 0.0  ;;  %v2264_v59 = vpop.f32.mrb[112].mxu1  ;;  %v2457_v50 = vpop.f32.mrb[112].mxu0 }
 0x2c2   : > { %v3054_v13 = vpack.c.bf16 %v2974_v39, %v2970_v19  ;;  %v2265_v37 = vadd.f32 %v2264_v59, %v6420_v14  ;;  %v2266_v24 = vpop.f32.mrb[113].mxu1  ;;  %v2459_v47 = vpop.f32.mrb[113].mxu0 }
 0x2c3   : > { %v3055_v30 = vpack.c.bf16 %v2975_v7, %v2971_v52  ;;  %v2267_v35 = vadd.f32 %v2266_v24, %v6425_v53  ;;  %v2268_v45 = vpop.f32.mrb[114].mxu1  ;;  %v2461_v10 = vpop.f32.mrb[114].mxu0 }
 0x2c4   : > { %v2269_v60 = vadd.f32 %v2268_v45, %v6420_v14  ;;  %v2458_v62 = vadd.f32 %v2457_v50, %v2265_v37  ;;  %v2270_v33 = vpop.f32.mrb[115].mxu1  ;;  %v2463_v40 = vpop.f32.mrb[115].mxu0 }
 0x2c5   : > { %v2271_v20 = vadd.f32 %v2270_v33, %v6425_v53  ;;  %v2460_v6 = vadd.f32 %v2459_v47, %v2267_v35  ;;  %3612 = vmatprep.mubr.bf16.mxu0 %v3055_v30  ;;  %v6962_v47 = vld [vmem:[#allocation32_spill] sm:$0xff] }
 0x2c6   : > { %v2462_v26 = vadd.f32 %v2461_v10, %v2269_v60  ;;  %2792 = vmatmul.mubr.bf16.gmra.mrb[156].mxu1 %v6957_v48  ;;  %3613 = vmatmul.mubr.bf16.gmra.mrb[172].mxu0 %v3054_v13  ;;  %v2978_v28 = vmax.f32 %v2458_v62, 0.0  ;;  %v6961_v62 = vld [vmem:[#allocation29_spill] sm:$0xff] }
 0x2c7   : > { %v2464_v27 = vadd.f32 %v2463_v40, %v2271_v20  ;;  %2801 = vmatprep.mubr.bf16.mxu1 %v6958_v46  ;;  %v2979_v23 = vmax.f32 %v2460_v6, 0.0 }
 0x2c8   : > { %v2982_v57 = vmax.f32 %v2462_v26, 0.0 }
 0x2c9   : > { %v2983_v8 = vmax.f32 %v2464_v27, 0.0  ;;  %v2274_v29 = vpop.f32.mrb[116].mxu1  ;;  %v2467_v32 = vpop.f32.mrb[116].mxu0 }
 0x2ca   : > { %v3058_v21 = vpack.c.bf16 %v2982_v57, %v2978_v28  ;;  %v2275_v16 = vadd.f32 %v2274_v29, %v6420_v14  ;;  %v2276_v63 = vpop.f32.mrb[117].mxu1  ;;  %v2469_v25 = vpop.f32.mrb[117].mxu0 }
 0x2cb   : > { %v3059_v38 = vpack.c.bf16 %v2983_v8, %v2979_v23  ;;  %v2277_v55 = vadd.f32 %v2276_v63, %v6425_v53  ;;  %v2278_v36 = vpop.f32.mrb[118].mxu1  ;;  %v2471_v11 = vpop.f32.mrb[118].mxu0 }
 0x2cc   : > { %v2279_v9 = vadd.f32 %v2278_v36, %v6420_v14  ;;  %v2468_v34 = vadd.f32 %v2467_v32, %v2275_v16  ;;  %v2280_v17 = vpop.f32.mrb[119].mxu1  ;;  %v2473_v49 = vpop.f32.mrb[119].mxu0 }
 0x2cd   : > { %v2281_v41 = vadd.f32 %v2280_v17, %v6425_v53  ;;  %v2470_v15 = vadd.f32 %v2469_v25, %v2277_v55  ;;  %3622 = vmatprep.mubr.bf16.mxu0 %v3059_v38  ;;  %v6964_v25 = vld [vmem:[#allocation34_spill] sm:$0xff] }
 0x2ce   : > { %v2472_v5 = vadd.f32 %v2471_v11, %v2279_v9  ;;  %2802 = vmatmul.mubr.bf16.gmra.mrb[160].mxu1 %v6959_v12  ;;  %3623 = vmatmul.mubr.bf16.gmra.mrb[176].mxu0 %v3058_v21  ;;  %v2986_v1 = vmax.f32 %v2468_v34, 0.0  ;;  %v6963_v34 = vld [vmem:[#allocation31_spill] sm:$0xff]  ;;  %v6965_v12 = vld [vmem:[#allocation33_spill] sm:$0xff] }
 0x2cf   : > { %v2474_v58 = vadd.f32 %v2473_v49, %v2281_v41  ;;  %2811 = vmatprep.mubr.bf16.mxu1 %v6960_v22  ;;  %v2987_v4 = vmax.f32 %v2470_v15, 0.0  ;;  %v5523_v22 = vld [vmem:[#allocation9 + $0x1f0] ss:$8 sps:$4 sm:$0xff]  }
 0x2d0   : > { %v2990_v51 = vmax.f32 %v2472_v5, 0.0 }
 0x2d1   : > { %v2991_v42 = vmax.f32 %v2474_v58, 0.0  ;;  %v2284_v2 = vpop.f32.mrb[120].mxu1  ;;  %v2477_v7 = vpop.f32.mrb[120].mxu0  ;;  %v6966_v58 = vld [vmem:[#allocation36_spill] sm:$0xff] }
 0x2d2   : > { %v3062_v31 = vpack.c.bf16 %v2990_v51, %v2986_v1  ;;  %v2285_v44 = vadd.f32 %v2284_v2, %v6420_v14  ;;  %v2286_v0 = vpop.f32.mrb[121].mxu1  ;;  %v2479_v24 = vpop.f32.mrb[121].mxu0  ;;  %v6967_v1 = vld [vmem:[#allocation35_spill] sm:$0xff]  ;;  %v6968_v51 = vld [vmem:[#allocation38_spill] sm:$0xff] }
 0x2d3   : > { %v3063_v19 = vpack.c.bf16 %v2991_v42, %v2987_v4  ;;  %v2287_v39 = vadd.f32 %v2286_v0, %v6425_v53  ;;  %v2288_v52 = vpop.f32.mrb[122].mxu1  ;;  %v2481_v45 = vpop.f32.mrb[122].mxu0  ;;  %v6969_v4 = vld [vmem:[#allocation37_spill] sm:$0xff]  ;;  %v6970_v42 = vld [vmem:[#allocation39_spill] sm:$0xff]  ;;  %v6971_v2 = vld [vmem:[#allocation18_spill] sm:$0xff] }
 0x2d4   : > { %v2289_v59 = vadd.f32 %v2288_v52, %v6420_v14  ;;  %v2478_v13 = vadd.f32 %v2477_v7, %v2285_v44  ;;  %v2290_v37 = vpop.f32.mrb[123].mxu1  ;;  %v2483_v60 = vpop.f32.mrb[123].mxu0  ;;  %v6973_v0 = vsub.s32 3, %v6971_v2 }
 0x2d5   : > { %v2291_v30 = vadd.f32 %v2290_v37, %v6425_v53  ;;  %v2480_v35 = vadd.f32 %v2479_v24, %v2287_v39  ;;  %3632 = vmatprep.mubr.bf16.mxu0 %v3063_v19 }
 0x2d6   : > { %v2482_v50 = vadd.f32 %v2481_v45, %v2289_v59  ;;  %2812 = vmatmul.mubr.bf16.gmra.mrb[164].mxu1 %v6961_v62  ;;  %3633 = vmatmul.mubr.bf16.gmra.mrb[180].mxu0 %v3062_v31  ;;  %v2994_v20 = vmax.f32 %v2478_v13, 0.0  ;;  %v6972_v31 = vsub.s32 2, %v6971_v2  ;;  %v6540_v19 = vrot.slane %v6415_v3, %v6973_v0 }
 0x2d7   : > { %v2484_v33 = vadd.f32 %v2483_v60, %v2291_v30  ;;  %2821 = vmatprep.mubr.bf16.mxu1 %v6962_v47  ;;  %v2995_v10 = vmax.f32 %v2480_v35, 0.0 }
 0x2d8   : > { %v2998_v6 = vmax.f32 %v2482_v50, 0.0  ;;  %v6535_v44 = vrot.slane %v6415_v3, %v6972_v31 }
 0x2d9   : > { %v2999_v26 = vmax.f32 %v2484_v33, 0.0  ;;  %v2294_v40 = vpop.f32.mrb[124].mxu1  ;;  %v2487_v8 = vpop.f32.mrb[124].mxu0 }
 0x2da   : > { %v3066_v48 = vpack.c.bf16 %v2998_v6, %v2994_v20  ;;  %v2295_v27 = vadd.f32 %v2294_v40, %v6420_v14  ;;  %v2296_v46 = vpop.f32.mrb[125].mxu1  ;;  %v2489_v63 = vpop.f32.mrb[125].mxu0 }
 0x2db   : > { %v3067_v28 = vpack.c.bf16 %v2999_v26, %v2995_v10  ;;  %v2297_v57 = vadd.f32 %v2296_v46, %v6425_v53  ;;  %v2298_v23 = vpop.f32.mrb[126].mxu1  ;;  %v2491_v36 = vpop.f32.mrb[126].mxu0 }
 0x2dc   : > { %v2299_v29 = vadd.f32 %v2298_v23, %v6420_v14  ;;  %v2488_v21 = vadd.f32 %v2487_v8, %v2295_v27  ;;  %v2300_v16 = vpop.f32.mrb[127].mxu1  ;;  %v2493_v9 = vpop.f32.mrb[127].mxu0 }
 0x2dd   : > { %v2301_v38 = vadd.f32 %v2300_v16, %v6425_v53  ;;  %v2490_v55 = vadd.f32 %v2489_v63, %v2297_v57  ;;  %3642 = vmatprep.mubr.bf16.mxu0 %v3067_v28  ;;  %v5525_v53 = vld [vmem:[#allocation9 + $0x1f4] ss:$8 sps:$4 sm:$0xff]  }
 0x2de   : > { %v2492_v32 = vadd.f32 %v2491_v36, %v2299_v29  ;;  %2822 = vmatmul.mubr.bf16.gmra.mrb[168].mxu1 %v6963_v34  ;;  %3643 = vmatmul.mubr.bf16.gmra.mrb[184].mxu0 %v3066_v48  ;;  %v3002_v41 = vmax.f32 %v2488_v21, 0.0 }
 0x2df   : > { %v2494_v17 = vadd.f32 %v2493_v9, %v2301_v38  ;;  %2831 = vmatprep.mubr.bf16.mxu1 %v6964_v25  ;;  %v3003_v11 = vmax.f32 %v2490_v55, 0.0  ;;  %3693 = vmatprep.subr.bf16.mxu0 %v5525_v53 }
 0x2e0   : > { %v3006_v15 = vmax.f32 %v2492_v32, 0.0  ;;  %3694 = vmatpush1.bf16.msra.mxu0 %v5523_v22 }
 0x2e1   : > { %v3007_v14 = vmax.f32 %v2494_v17, 0.0 }
 0x2e2   : > { %v3070_v5 = vpack.c.bf16 %v3006_v15, %v3002_v41 }
 0x2e3   : > { %v3071_v49 = vpack.c.bf16 %v3007_v14, %v3003_v11 }
 0x2e5   : > { %3652 = vmatprep.mubr.bf16.mxu0 %v3071_v49 }
 0x2e6   : > { %2832 = vmatmul.mubr.bf16.gmra.mrb[172].mxu1 %v6965_v12  ;;  %3653 = vmatmul.mubr.bf16.gmra.mrb[188].mxu0 %v3070_v5 }
 0x2e7   : > { %2841 = vmatprep.mubr.bf16.mxu1 %v6966_v58 }
 0x2ee   : > { %2842 = vmatmul.mubr.bf16.gmra.mrb[176].mxu1 %v6967_v1 }
 0x2ef   : > { %2851 = vmatprep.mubr.bf16.mxu1 %v6968_v51 }
 0x2f6   : > { %2852 = vmatmul.mubr.bf16.gmra.mrb[180].mxu1 %v6969_v4 }
 0x2f7   : > { %2861 = vmatprep.mubr.bf16.mxu1 %v6970_v42 }
 0x2fe   : > { %2862 = vmatmul.mubr.bf16.gmra.mrb[184].mxu1 %v6363_v43 }
 0x2ff   : > { %2871 = vmatprep.mubr.bf16.mxu1 %v6385_v61 }
 0x306   : > { %2872 = vmatmul.mubr.bf16.gmra.mrb[188].mxu1 %v6383_v18 }
 0x361   : > { %v2723_v39 = vpop.f32.mrb[128].mxu1 }
 0x362   : > { %v4830_v52 = vadd.f32 %v2723_v39, %v6535_v44  ;;  %v2725_v7 = vpop.f32.mrb[129].mxu1 }
 0x363   : > { %v4831_v43 = vadd.f32 %v2725_v7, %v6540_v19  ;;  %v2727_v59 = vpop.f32.mrb[130].mxu1 }
 0x364   : > { %v4832_v61 = vadd.f32 %v2727_v59, %v6535_v44  ;;  %v2729_v18 = vpop.f32.mrb[131].mxu1  ;;  %v2884_v37 = vmax.f32 %v4830_v52, 0.0 }
 0x365   : > { %v4833_v13 = vadd.f32 %v2729_v18, %v6540_v19  ;;  %v2885_v30 = vmax.f32 %v4831_v43, 0.0 }
 0x366   : > { %v2888_v24 = vmax.f32 %v4832_v61, 0.0 }
 0x367   : > { %v2889_v35 = vmax.f32 %v4833_v13, 0.0 }
 0x368   : > { %v3012_v45 = vpack.c.bf16 %v2888_v24, %v2884_v37 }
 0x369   : > { %v3013_v50 = vpack.c.bf16 %v2889_v35, %v2885_v30  ;;  %v2733_v3 = vpop.f32.mrb[132].mxu1 }
 0x36a   : > { %v4834_v60 = vadd.f32 %v2733_v3, %v6535_v44  ;;  %v2735_v62 = vpop.f32.mrb[133].mxu1 }
 0x36b   : > { %v4835_v33 = vadd.f32 %v2735_v62, %v6540_v19  ;;  %v2737_v47 = vpop.f32.mrb[134].mxu1  ;;  %3695 = vmatprep.mubr.bf16.mxu0 %v3013_v50 }
 0x36c   : > { %v4836_v20 = vadd.f32 %v2737_v47, %v6535_v44  ;;  %v2739_v6 = vpop.f32.mrb[135].mxu1  ;;  %3696 = vmatmul.mubr.bf16.vlgmr.msra.gmra.mrb[128].mxu0 %v3012_v45  ;;  %v2892_v26 = vmax.f32 %v4834_v60, 0.0 }
 0x36d   : > { %v4837_v10 = vadd.f32 %v2739_v6, %v6540_v19  ;;  %v2893_v48 = vmax.f32 %v4835_v33, 0.0 }
 0x36e   : > { %v2896_v40 = vmax.f32 %v4836_v20, 0.0 }
 0x36f   : > { %v2897_v27 = vmax.f32 %v4837_v10, 0.0 }
 0x370   : > { %v3016_v46 = vpack.c.bf16 %v2896_v40, %v2892_v26 }
 0x371   : > { %v3017_v28 = vpack.c.bf16 %v2897_v27, %v2893_v48  ;;  %v2743_v57 = vpop.f32.mrb[136].mxu1 }
 0x372   : > { %v4838_v23 = vadd.f32 %v2743_v57, %v6535_v44  ;;  %v2745_v8 = vpop.f32.mrb[137].mxu1 }
 0x373   : > { %v4839_v29 = vadd.f32 %v2745_v8, %v6540_v19  ;;  %v2747_v21 = vpop.f32.mrb[138].mxu1  ;;  %3705 = vmatprep.mubr.bf16.mxu0 %v3017_v28 }
 0x374   : > { %v4840_v16 = vadd.f32 %v2747_v21, %v6535_v44  ;;  %v2749_v63 = vpop.f32.mrb[139].mxu1  ;;  %3706 = vmatmul.mubr.bf16.gmra.mrb[132].mxu0 %v3016_v46  ;;  %v2900_v55 = vmax.f32 %v4838_v23, 0.0 }
 0x375   : > { %v4841_v38 = vadd.f32 %v2749_v63, %v6540_v19  ;;  %v2901_v32 = vmax.f32 %v4839_v29, 0.0 }
 0x376   : > { %v2904_v36 = vmax.f32 %v4840_v16, 0.0 }
 0x377   : > { %v2905_v9 = vmax.f32 %v4841_v38, 0.0 }
 0x378   : > { %v3020_v34 = vpack.c.bf16 %v2904_v36, %v2900_v55 }
 0x379   : > { %v3021_v17 = vpack.c.bf16 %v2905_v9, %v2901_v32  ;;  %v2753_v25 = vpop.f32.mrb[140].mxu1 }
 0x37a   : > { %v4842_v41 = vadd.f32 %v2753_v25, %v6535_v44  ;;  %v2755_v15 = vpop.f32.mrb[141].mxu1 }
 0x37b   : > { %v4843_v11 = vadd.f32 %v2755_v15, %v6540_v19  ;;  %v2757_v14 = vpop.f32.mrb[142].mxu1  ;;  %3715 = vmatprep.mubr.bf16.mxu0 %v3021_v17 }
 0x37c   : > { %v4844_v5 = vadd.f32 %v2757_v14, %v6535_v44  ;;  %v2759_v49 = vpop.f32.mrb[143].mxu1  ;;  %3716 = vmatmul.mubr.bf16.gmra.mrb[136].mxu0 %v3020_v34  ;;  %v2908_v53 = vmax.f32 %v4842_v41, 0.0 }
 0x37d   : > { %v4845_v12 = vadd.f32 %v2759_v49, %v6540_v19  ;;  %v2909_v22 = vmax.f32 %v4843_v11, 0.0 }
 0x37e   : > { %v2912_v58 = vmax.f32 %v4844_v5, 0.0 }
 0x37f   : > { %v2913_v1 = vmax.f32 %v4845_v12, 0.0 }
 0x380   : > { %v3024_v51 = vpack.c.bf16 %v2912_v58, %v2908_v53 }
 0x381   : > { %v3025_v4 = vpack.c.bf16 %v2913_v1, %v2909_v22  ;;  %v2763_v42 = vpop.f32.mrb[144].mxu1 }
 0x382   : > { %v4846_v2 = vadd.f32 %v2763_v42, %v6535_v44  ;;  %v2765_v31 = vpop.f32.mrb[145].mxu1 }
 0x383   : > { %v4847_v0 = vadd.f32 %v2765_v31, %v6540_v19  ;;  %v2767_v39 = vpop.f32.mrb[146].mxu1  ;;  %3725 = vmatprep.mubr.bf16.mxu0 %v3025_v4 }
 0x384   : > { %v4848_v52 = vadd.f32 %v2767_v39, %v6535_v44  ;;  %v2769_v7 = vpop.f32.mrb[147].mxu1  ;;  %3726 = vmatmul.mubr.bf16.gmra.mrb[140].mxu0 %v3024_v51  ;;  %v2916_v59 = vmax.f32 %v4846_v2, 0.0 }
 0x385   : > { %v4849_v43 = vadd.f32 %v2769_v7, %v6540_v19  ;;  %v2917_v18 = vmax.f32 %v4847_v0, 0.0 }
 0x386   : > { %v2920_v61 = vmax.f32 %v4848_v52, 0.0 }
 0x387   : > { %v2921_v13 = vmax.f32 %v4849_v43, 0.0 }
 0x388   : > { %v3028_v37 = vpack.c.bf16 %v2920_v61, %v2916_v59 }
 0x389   : > { %v3029_v24 = vpack.c.bf16 %v2921_v13, %v2917_v18  ;;  %v2773_v30 = vpop.f32.mrb[148].mxu1 }
 0x38a   : > { %v4850_v35 = vadd.f32 %v2773_v30, %v6535_v44  ;;  %v2775_v45 = vpop.f32.mrb[149].mxu1 }
 0x38b   : > { %v4851_v50 = vadd.f32 %v2775_v45, %v6540_v19  ;;  %v2777_v3 = vpop.f32.mrb[150].mxu1  ;;  %3735 = vmatprep.mubr.bf16.mxu0 %v3029_v24 }
 0x38c   : > { %v4852_v60 = vadd.f32 %v2777_v3, %v6535_v44  ;;  %v2779_v62 = vpop.f32.mrb[151].mxu1  ;;  %3736 = vmatmul.mubr.bf16.gmra.mrb[144].mxu0 %v3028_v37  ;;  %v2924_v47 = vmax.f32 %v4850_v35, 0.0 }
 0x38d   : > { %v4853_v33 = vadd.f32 %v2779_v62, %v6540_v19  ;;  %v2925_v6 = vmax.f32 %v4851_v50, 0.0 }
 0x38e   : > { %v2928_v20 = vmax.f32 %v4852_v60, 0.0 }
 0x38f   : > { %v2929_v10 = vmax.f32 %v4853_v33, 0.0 }
 0x390   : > { %v3032_v26 = vpack.c.bf16 %v2928_v20, %v2924_v47 }
 0x391   : > { %v3033_v40 = vpack.c.bf16 %v2929_v10, %v2925_v6  ;;  %v2783_v48 = vpop.f32.mrb[152].mxu1 }
 0x392   : > { %v4854_v27 = vadd.f32 %v2783_v48, %v6535_v44  ;;  %v2785_v46 = vpop.f32.mrb[153].mxu1 }
 0x393   : > { %v4855_v28 = vadd.f32 %v2785_v46, %v6540_v19  ;;  %v2787_v57 = vpop.f32.mrb[154].mxu1  ;;  %3745 = vmatprep.mubr.bf16.mxu0 %v3033_v40 }
 0x394   : > { %v4856_v23 = vadd.f32 %v2787_v57, %v6535_v44  ;;  %v2789_v8 = vpop.f32.mrb[155].mxu1  ;;  %3746 = vmatmul.mubr.bf16.gmra.mrb[148].mxu0 %v3032_v26  ;;  %v2932_v21 = vmax.f32 %v4854_v27, 0.0 }
 0x395   : > { %v4857_v29 = vadd.f32 %v2789_v8, %v6540_v19  ;;  %v2933_v63 = vmax.f32 %v4855_v28, 0.0 }
 0x396   : > { %v2936_v16 = vmax.f32 %v4856_v23, 0.0 }
 0x397   : > { %v2937_v38 = vmax.f32 %v4857_v29, 0.0 }
 0x398   : > { %v3036_v55 = vpack.c.bf16 %v2936_v16, %v2932_v21 }
 0x399   : > { %v3037_v36 = vpack.c.bf16 %v2937_v38, %v2933_v63  ;;  %v2793_v32 = vpop.f32.mrb[156].mxu1 }
 0x39a   : > { %v4858_v9 = vadd.f32 %v2793_v32, %v6535_v44  ;;  %v2795_v34 = vpop.f32.mrb[157].mxu1 }
 0x39b   : > { %v4859_v17 = vadd.f32 %v2795_v34, %v6540_v19  ;;  %v2797_v25 = vpop.f32.mrb[158].mxu1  ;;  %3755 = vmatprep.mubr.bf16.mxu0 %v3037_v36 }
 0x39c   : > { %v4860_v41 = vadd.f32 %v2797_v25, %v6535_v44  ;;  %v2799_v15 = vpop.f32.mrb[159].mxu1  ;;  %3756 = vmatmul.mubr.bf16.gmra.mrb[152].mxu0 %v3036_v55  ;;  %v2940_v14 = vmax.f32 %v4858_v9, 0.0 }
 0x39d   : > { %v4861_v11 = vadd.f32 %v2799_v15, %v6540_v19  ;;  %v2941_v49 = vmax.f32 %v4859_v17, 0.0 }
 0x39e   : > { %v2944_v5 = vmax.f32 %v4860_v41, 0.0 }
 0x39f   : > { %v2945_v12 = vmax.f32 %v4861_v11, 0.0 }
 0x3a0   : > { %v3040_v53 = vpack.c.bf16 %v2944_v5, %v2940_v14 }
 0x3a1   : > { %v3041_v58 = vpack.c.bf16 %v2945_v12, %v2941_v49  ;;  %v2803_v22 = vpop.f32.mrb[160].mxu1 }
 0x3a2   : > { %v4862_v1 = vadd.f32 %v2803_v22, %v6535_v44  ;;  %v2805_v51 = vpop.f32.mrb[161].mxu1 }
 0x3a3   : > { %v4863_v4 = vadd.f32 %v2805_v51, %v6540_v19  ;;  %v2807_v42 = vpop.f32.mrb[162].mxu1  ;;  %3765 = vmatprep.mubr.bf16.mxu0 %v3041_v58 }
 0x3a4   : > { %v4864_v2 = vadd.f32 %v2807_v42, %v6535_v44  ;;  %v2809_v31 = vpop.f32.mrb[163].mxu1  ;;  %3766 = vmatmul.mubr.bf16.gmra.mrb[156].mxu0 %v3040_v53  ;;  %v2948_v39 = vmax.f32 %v4862_v1, 0.0 }
 0x3a5   : > { %v4865_v0 = vadd.f32 %v2809_v31, %v6540_v19  ;;  %v2949_v7 = vmax.f32 %v4863_v4, 0.0 }
 0x3a6   : > { %v2952_v52 = vmax.f32 %v4864_v2, 0.0 }
 0x3a7   : > { %v2953_v43 = vmax.f32 %v4865_v0, 0.0 }
 0x3a8   : > { %v3044_v59 = vpack.c.bf16 %v2952_v52, %v2948_v39 }
 0x3a9   : > { %v3045_v61 = vpack.c.bf16 %v2953_v43, %v2949_v7  ;;  %v2813_v18 = vpop.f32.mrb[164].mxu1 }
 0x3aa   : > { %v4866_v13 = vadd.f32 %v2813_v18, %v6535_v44  ;;  %v2815_v37 = vpop.f32.mrb[165].mxu1 }
 0x3ab   : > { %v4867_v24 = vadd.f32 %v2815_v37, %v6540_v19  ;;  %v2817_v30 = vpop.f32.mrb[166].mxu1  ;;  %3775 = vmatprep.mubr.bf16.mxu0 %v3045_v61 }
 0x3ac   : > { %v4868_v35 = vadd.f32 %v2817_v30, %v6535_v44  ;;  %v2819_v45 = vpop.f32.mrb[167].mxu1  ;;  %3776 = vmatmul.mubr.bf16.gmra.mrb[160].mxu0 %v3044_v59  ;;  %v2956_v3 = vmax.f32 %v4866_v13, 0.0 }
 0x3ad   : > { %v4869_v50 = vadd.f32 %v2819_v45, %v6540_v19  ;;  %v2957_v62 = vmax.f32 %v4867_v24, 0.0 }
 0x3ae   : > { %v2960_v60 = vmax.f32 %v4868_v35, 0.0 }
 0x3af   : > { %v2961_v33 = vmax.f32 %v4869_v50, 0.0 }
 0x3b0   : > { %v3048_v47 = vpack.c.bf16 %v2960_v60, %v2956_v3 }
 0x3b1   : > { %v3049_v20 = vpack.c.bf16 %v2961_v33, %v2957_v62  ;;  %v2823_v6 = vpop.f32.mrb[168].mxu1 }
 0x3b2   : > { %v4870_v10 = vadd.f32 %v2823_v6, %v6535_v44  ;;  %v2825_v26 = vpop.f32.mrb[169].mxu1 }
 0x3b3   : > { %v4871_v40 = vadd.f32 %v2825_v26, %v6540_v19  ;;  %v2827_v48 = vpop.f32.mrb[170].mxu1  ;;  %3785 = vmatprep.mubr.bf16.mxu0 %v3049_v20 }
 0x3b4   : > { %v4872_v27 = vadd.f32 %v2827_v48, %v6535_v44  ;;  %v2829_v46 = vpop.f32.mrb[171].mxu1  ;;  %3786 = vmatmul.mubr.bf16.gmra.mrb[164].mxu0 %v3048_v47  ;;  %v2964_v57 = vmax.f32 %v4870_v10, 0.0 }
 0x3b5   : > { %v4873_v28 = vadd.f32 %v2829_v46, %v6540_v19  ;;  %v2965_v8 = vmax.f32 %v4871_v40, 0.0 }
 0x3b6   : > { %v2968_v23 = vmax.f32 %v4872_v27, 0.0 }
 0x3b7   : > { %v2969_v29 = vmax.f32 %v4873_v28, 0.0 }
 0x3b8   : > { %v3052_v21 = vpack.c.bf16 %v2968_v23, %v2964_v57 }
 0x3b9   : > { %v3053_v16 = vpack.c.bf16 %v2969_v29, %v2965_v8  ;;  %v2833_v63 = vpop.f32.mrb[172].mxu1 }
 0x3ba   : > { %v4874_v38 = vadd.f32 %v2833_v63, %v6535_v44  ;;  %v2835_v55 = vpop.f32.mrb[173].mxu1 }
 0x3bb   : > { %v4875_v36 = vadd.f32 %v2835_v55, %v6540_v19  ;;  %v2837_v32 = vpop.f32.mrb[174].mxu1  ;;  %3795 = vmatprep.mubr.bf16.mxu0 %v3053_v16 }
 0x3bc   : > { %v4876_v9 = vadd.f32 %v2837_v32, %v6535_v44  ;;  %v2839_v34 = vpop.f32.mrb[175].mxu1  ;;  %3796 = vmatmul.mubr.bf16.gmra.mrb[168].mxu0 %v3052_v21  ;;  %v2972_v25 = vmax.f32 %v4874_v38, 0.0 }
 0x3bd   : > { %v4877_v17 = vadd.f32 %v2839_v34, %v6540_v19  ;;  %v2973_v15 = vmax.f32 %v4875_v36, 0.0 }
 0x3be   : > { %v2976_v41 = vmax.f32 %v4876_v9, 0.0 }
 0x3bf   : > { %v2977_v11 = vmax.f32 %v4877_v17, 0.0 }
 0x3c0   : > { %v3056_v14 = vpack.c.bf16 %v2976_v41, %v2972_v25 }
 0x3c1   : > { %v3057_v5 = vpack.c.bf16 %v2977_v11, %v2973_v15  ;;  %v2843_v49 = vpop.f32.mrb[176].mxu1  ;;  %v3138_v15 = vld [vmem:[%s6878_s6] sm:$0x3] }
 0x3c2   : > { %v4878_v12 = vadd.f32 %v2843_v49, %v6535_v44  ;;  %v2845_v53 = vpop.f32.mrb[177].mxu1  ;;  %v6610_v11 = vrot.slane %v3138_v15, %v6047_v54 }
 0x3c3   : > { %v4879_v58 = vadd.f32 %v2845_v53, %v6540_v19  ;;  %v2847_v22 = vpop.f32.mrb[178].mxu1  ;;  %3805 = vmatprep.mubr.bf16.mxu0 %v3057_v5 }
 0x3c4   : > { %v4880_v1 = vadd.f32 %v2847_v22, %v6535_v44  ;;  %v2849_v51 = vpop.f32.mrb[179].mxu1  ;;  %3806 = vmatmul.mubr.bf16.gmra.mrb[172].mxu0 %v3056_v14  ;;  %v2980_v42 = vmax.f32 %v4878_v12, 0.0 }
 0x3c5   : > { %v4881_v4 = vadd.f32 %v2849_v51, %v6540_v19  ;;  %v2981_v31 = vmax.f32 %v4879_v58, 0.0 }
 0x3c6   : > { %v2984_v2 = vmax.f32 %v4880_v1, 0.0 }
 0x3c7   : > { %v2985_v0 = vmax.f32 %v4881_v4, 0.0 }
 0x3c8   : > { %v3060_v39 = vpack.c.bf16 %v2984_v2, %v2980_v42 }
 0x3c9   : > { %v3061_v52 = vpack.c.bf16 %v2985_v0, %v2981_v31  ;;  %v2853_v7 = vpop.f32.mrb[180].mxu1 }
 0x3ca   : > { %v4882_v43 = vadd.f32 %v2853_v7, %v6535_v44  ;;  %v2855_v59 = vpop.f32.mrb[181].mxu1 }
 0x3cb   : > { %v4883_v61 = vadd.f32 %v2855_v59, %v6540_v19  ;;  %v2857_v18 = vpop.f32.mrb[182].mxu1  ;;  %3815 = vmatprep.mubr.bf16.mxu0 %v3061_v52 }
 0x3cc   : > { %v4884_v13 = vadd.f32 %v2857_v18, %v6535_v44  ;;  %v2859_v37 = vpop.f32.mrb[183].mxu1  ;;  %3816 = vmatmul.mubr.bf16.gmra.mrb[176].mxu0 %v3060_v39  ;;  %v2988_v30 = vmax.f32 %v4882_v43, 0.0 }
 0x3cd   : > { %v4885_v24 = vadd.f32 %v2859_v37, %v6540_v19  ;;  %v2989_v45 = vmax.f32 %v4883_v61, 0.0 }
 0x3ce   : > { %v2992_v35 = vmax.f32 %v4884_v13, 0.0 }
 0x3cf   : > { %v2993_v50 = vmax.f32 %v4885_v24, 0.0 }
 0x3d0   : > { %v3064_v3 = vpack.c.bf16 %v2992_v35, %v2988_v30 }
 0x3d1   : > { %v3065_v60 = vpack.c.bf16 %v2993_v50, %v2989_v45  ;;  %v2863_v62 = vpop.f32.mrb[184].mxu1 }
 0x3d2   : > { %v4886_v33 = vadd.f32 %v2863_v62, %v6535_v44  ;;  %v2865_v47 = vpop.f32.mrb[185].mxu1 }
 0x3d3   : > { %v4887_v20 = vadd.f32 %v2865_v47, %v6540_v19  ;;  %v2867_v6 = vpop.f32.mrb[186].mxu1  ;;  %3825 = vmatprep.mubr.bf16.mxu0 %v3065_v60 }
 0x3d4   : > { %v4888_v10 = vadd.f32 %v2867_v6, %v6535_v44  ;;  %v2869_v26 = vpop.f32.mrb[187].mxu1  ;;  %3826 = vmatmul.mubr.bf16.gmra.mrb[180].mxu0 %v3064_v3  ;;  %v2996_v48 = vmax.f32 %v4886_v33, 0.0 }
 0x3d5   : > { %v4889_v40 = vadd.f32 %v2869_v26, %v6540_v19  ;;  %v2997_v46 = vmax.f32 %v4887_v20, 0.0 }
 0x3d6   : > { %v3000_v27 = vmax.f32 %v4888_v10, 0.0 }
 0x3d7   : > { %v3001_v28 = vmax.f32 %v4889_v40, 0.0 }
 0x3d8   : > { %v3068_v57 = vpack.c.bf16 %v3000_v27, %v2996_v48 }
 0x3d9   : > { %v3069_v23 = vpack.c.bf16 %v3001_v28, %v2997_v46  ;;  %v2873_v8 = vpop.f32.mrb[188].mxu1 }
 0x3da   : > { %v4890_v29 = vadd.f32 %v2873_v8, %v6535_v44  ;;  %v2875_v21 = vpop.f32.mrb[189].mxu1 }
 0x3db   : > { %v4891_v16 = vadd.f32 %v2875_v21, %v6540_v19  ;;  %v2877_v63 = vpop.f32.mrb[190].mxu1  ;;  %3835 = vmatprep.mubr.bf16.mxu0 %v3069_v23 }
 0x3dc   : > { %v4892_v38 = vadd.f32 %v2877_v63, %v6535_v44  ;;  %v2879_v55 = vpop.f32.mrb[191].mxu1  ;;  %3836 = vmatmul.mubr.bf16.gmra.mrb[184].mxu0 %v3068_v57  ;;  %v3004_v32 = vmax.f32 %v4890_v29, 0.0  ;;  %v6613_v44 = vrot.slane %v3138_v15, %v6053_v56 }
 0x3dd   : > { %v4893_v36 = vadd.f32 %v2879_v55, %v6540_v19  ;;  %v3005_v34 = vmax.f32 %v4891_v16, 0.0  ;;  %v3920_v19 = vld [vmem:[%s6879_s7] sm:$0x3] }
 0x3de   : > { %v3008_v9 = vmax.f32 %v4892_v38, 0.0  ;;  %v6620_v12 = vrot.slane %v3920_v19, %v6047_v54  ;;  %v6624_v22 = vrot.slane %v3920_v19, %v6053_v56 }
 0x3df   : > { %v3009_v17 = vmax.f32 %v4893_v36, 0.0 }
 0x3e0   : > { %v3072_v25 = vpack.c.bf16 %v3008_v9, %v3004_v32 }
 0x3e1   : > { %v3073_v41 = vpack.c.bf16 %v3009_v17, %v3005_v34 }
 0x3e3   : > { %3845 = vmatprep.mubr.bf16.mxu0 %v3073_v41 }
 0x3e4   : > { %3846 = vmatmul.mubr.bf16.gmra.mrb[188].mxu0 %v3072_v25 }
 0x43f   : > { %v3697_v14 = vpop.f32.mrb[128].mxu0 }
 0x440   : > { %v4894_v5 = vadd.f32 %v3697_v14, %v6610_v11  ;;  %v3699_v49 = vpop.f32.mrb[129].mxu0 }
 0x441   : > { %v4895_v53 = vadd.f32 %v3699_v49, %v6613_v44  ;;  %v3701_v58 = vpop.f32.mrb[130].mxu0 }
 0x442   : > { %v3856_v1 = vmax.f32 %v4894_v5, 0.0  ;;  %v4896_v51 = vadd.f32 %v3701_v58, %v6610_v11  ;;  %v3703_v4 = vpop.f32.mrb[131].mxu0 }
 0x443   : > { %v3857_v42 = vmax.f32 %v4895_v53, 0.0  ;;  %v4897_v2 = vadd.f32 %v3703_v4, %v6613_v44 }
 0x444   : > { %v3858_v31 = vmax.f32 %v4896_v51, 0.0  ;;  %v3932_v0 = vmul.f32 %v6620_v12, %v3856_v1 }
 0x445   : > { %v3859_v39 = vmax.f32 %v4897_v2, 0.0  ;;  %v3933_v54 = vmul.f32 %v6624_v22, %v3857_v42 }
 0x446   : > { %v3934_v52 = vmul.f32 %v6620_v12, %v3858_v31 }
 0x447   : > { %v3935_v7 = vmul.f32 %v6624_v22, %v3859_v39  ;;  %v3707_v43 = vpop.f32.mrb[132].mxu0  ;;  %v3996_v56 = vadd.f32 %v3933_v54, %v3932_v0 }
 0x448   : > { %v4898_v59 = vadd.f32 %v3707_v43, %v6610_v11  ;;  %v3709_v61 = vpop.f32.mrb[133].mxu0 }
 0x449   : > { %v4899_v18 = vadd.f32 %v3709_v61, %v6613_v44  ;;  %v3711_v13 = vpop.f32.mrb[134].mxu0  ;;  %3997 = vadd.xlane.f32.xlu0 %v3996_v56  ;;  %v3999_v37 = vadd.f32 %v3935_v7, %v3934_v52 }
 0x44a   : > { %v3860_v24 = vmax.f32 %v4898_v59, 0.0  ;;  %v4900_v30 = vadd.f32 %v3711_v13, %v6610_v11  ;;  %v3713_v35 = vpop.f32.mrb[135].mxu0 }
 0x44b   : > { %v3861_v45 = vmax.f32 %v4899_v18, 0.0  ;;  %v4901_v50 = vadd.f32 %v3713_v35, %v6613_v44 }
 0x44c   : > { %v3862_v3 = vmax.f32 %v4900_v30, 0.0  ;;  %v3936_v60 = vmul.f32 %v6620_v12, %v3860_v24 }
 0x44d   : > { %v3863_v62 = vmax.f32 %v4901_v50, 0.0  ;;  %4000 = vadd.xlane.f32.xlu0 %v3999_v37  ;;  %v3937_v33 = vmul.f32 %v6624_v22, %v3861_v45 }
 0x44e   : > { %v3938_v47 = vmul.f32 %v6620_v12, %v3862_v3 }
 0x44f   : > { %v3939_v20 = vmul.f32 %v6624_v22, %v3863_v62  ;;  %v3717_v6 = vpop.f32.mrb[136].mxu0  ;;  %v4002_v10 = vadd.f32 %v3937_v33, %v3936_v60 }
 0x450   : > { %v4902_v26 = vadd.f32 %v3717_v6, %v6610_v11  ;;  %v3719_v40 = vpop.f32.mrb[137].mxu0 }
 0x451   : > { %v4903_v48 = vadd.f32 %v3719_v40, %v6613_v44  ;;  %v3721_v27 = vpop.f32.mrb[138].mxu0  ;;  %4003 = vadd.xlane.f32.xlu1 %v4002_v10  ;;  %v4005_v46 = vadd.f32 %v3939_v20, %v3938_v47 }
 0x452   : > { %v3864_v28 = vmax.f32 %v4902_v26, 0.0  ;;  %v4904_v57 = vadd.f32 %v3721_v27, %v6610_v11  ;;  %v3723_v23 = vpop.f32.mrb[139].mxu0 }
 0x453   : > { %v3865_v8 = vmax.f32 %v4903_v48, 0.0  ;;  %v4905_v29 = vadd.f32 %v3723_v23, %v6613_v44 }
 0x454   : > { %v3940_v21 = vmul.f32 %v6620_v12, %v3864_v28  ;;  %v3866_v16 = vmax.f32 %v4904_v57, 0.0 }
 0x455   : > { %v3941_v63 = vmul.f32 %v6624_v22, %v3865_v8  ;;  %v3867_v38 = vmax.f32 %v4905_v29, 0.0  ;;  %4006 = vadd.xlane.f32.xlu1 %v4005_v46 }
 0x456   : > { %v3942_v55 = vmul.f32 %v6620_v12, %v3866_v16 }
 0x457   : > { %v3943_v36 = vmul.f32 %v6624_v22, %v3867_v38  ;;  %v3727_v32 = vpop.f32.mrb[140].mxu0  ;;  %v4008_v9 = vadd.f32 %v3941_v63, %v3940_v21 }
 0x458   : > { %v4906_v34 = vadd.f32 %v3727_v32, %v6610_v11  ;;  %v3729_v17 = vpop.f32.mrb[141].mxu0 }
 0x459   : > { %v4907_v25 = vadd.f32 %v3729_v17, %v6613_v44  ;;  %v3731_v41 = vpop.f32.mrb[142].mxu0  ;;  %4009 = vadd.xlane.f32.xlu0 %v4008_v9  ;;  %v4011_v15 = vadd.f32 %v3943_v36, %v3942_v55 }
 0x45a   : > { %v3868_v19 = vmax.f32 %v4906_v34, 0.0  ;;  %v4908_v14 = vadd.f32 %v3731_v41, %v6610_v11  ;;  %v3733_v5 = vpop.f32.mrb[143].mxu0 }
 0x45b   : > { %v3869_v49 = vmax.f32 %v4907_v25, 0.0  ;;  %v4909_v53 = vadd.f32 %v3733_v5, %v6613_v44  ;;  %4012 = vadd.xlane.f32.xlu1 %v4011_v15 }
 0x45c   : > { %v3944_v58 = vmul.f32 %v6620_v12, %v3868_v19  ;;  %v3870_v1 = vmax.f32 %v4908_v14, 0.0 }
 0x45d   : > { %v3945_v51 = vmul.f32 %v6624_v22, %v3869_v49  ;;  %v3871_v4 = vmax.f32 %v4909_v53, 0.0 }
 0x45e   : > { %v3946_v42 = vmul.f32 %v6620_v12, %v3870_v1 }
 0x45f   : > { %v3947_v2 = vmul.f32 %v6624_v22, %v3871_v4  ;;  %v3737_v31 = vpop.f32.mrb[144].mxu0  ;;  %v4014_v0 = vadd.f32 %v3945_v51, %v3944_v58 }
 0x460   : > { %v4910_v39 = vadd.f32 %v3737_v31, %v6610_v11  ;;  %v3739_v54 = vpop.f32.mrb[145].mxu0 }
 0x461   : > { %v4911_v52 = vadd.f32 %v3739_v54, %v6613_v44  ;;  %v3741_v7 = vpop.f32.mrb[146].mxu0  ;;  %4015 = vadd.xlane.f32.xlu0 %v4014_v0  ;;  %v4017_v43 = vadd.f32 %v3947_v2, %v3946_v42 }
 0x462   : > { %v3872_v56 = vmax.f32 %v4910_v39, 0.0  ;;  %v4912_v59 = vadd.f32 %v3741_v7, %v6610_v11  ;;  %v3743_v61 = vpop.f32.mrb[147].mxu0 }
 0x463   : > { %v3873_v18 = vmax.f32 %v4911_v52, 0.0  ;;  %v4913_v13 = vadd.f32 %v3743_v61, %v6613_v44  ;;  %4018 = vadd.xlane.f32.xlu1 %v4017_v43 }
 0x464   : > { %v3948_v37 = vmul.f32 %v6620_v12, %v3872_v56  ;;  %v3874_v24 = vmax.f32 %v4912_v59, 0.0 }
 0x465   : > { %v3949_v30 = vmul.f32 %v6624_v22, %v3873_v18  ;;  %v3875_v35 = vmax.f32 %v4913_v13, 0.0 }
 0x466   : > { %v3950_v45 = vmul.f32 %v6620_v12, %v3874_v24 }
 0x467   : > { %v3951_v50 = vmul.f32 %v6624_v22, %v3875_v35  ;;  %v3747_v3 = vpop.f32.mrb[148].mxu0  ;;  %v4020_v60 = vadd.f32 %v3949_v30, %v3948_v37 }
 0x468   : > { %v4914_v62 = vadd.f32 %v3747_v3, %v6610_v11  ;;  %v3749_v33 = vpop.f32.mrb[149].mxu0 }
 0x469   : > { %v4915_v47 = vadd.f32 %v3749_v33, %v6613_v44  ;;  %v3751_v20 = vpop.f32.mrb[150].mxu0  ;;  %4021 = vadd.xlane.f32.xlu0 %v4020_v60  ;;  %v4023_v6 = vadd.f32 %v3951_v50, %v3950_v45 }
 0x46a   : > { %v3876_v10 = vmax.f32 %v4914_v62, 0.0  ;;  %v4916_v26 = vadd.f32 %v3751_v20, %v6610_v11  ;;  %v3753_v40 = vpop.f32.mrb[151].mxu0 }
 0x46b   : > { %v3877_v48 = vmax.f32 %v4915_v47, 0.0  ;;  %v4917_v27 = vadd.f32 %v3753_v40, %v6613_v44  ;;  %4024 = vadd.xlane.f32.xlu1 %v4023_v6 }
 0x46c   : > { %v3952_v46 = vmul.f32 %v6620_v12, %v3876_v10  ;;  %v3878_v28 = vmax.f32 %v4916_v26, 0.0 }
 0x46d   : > { %v3953_v57 = vmul.f32 %v6624_v22, %v3877_v48  ;;  %v3879_v23 = vmax.f32 %v4917_v27, 0.0 }
 0x46e   : > { %v3954_v8 = vmul.f32 %v6620_v12, %v3878_v28 }
 0x46f   : > { %v3955_v29 = vmul.f32 %v6624_v22, %v3879_v23  ;;  %v3757_v21 = vpop.f32.mrb[152].mxu0  ;;  %v4026_v16 = vadd.f32 %v3953_v57, %v3952_v46 }
 0x470   : > { %v4918_v63 = vadd.f32 %v3757_v21, %v6610_v11  ;;  %v3759_v38 = vpop.f32.mrb[153].mxu0 }
 0x471   : > { %v4919_v55 = vadd.f32 %v3759_v38, %v6613_v44  ;;  %v3761_v36 = vpop.f32.mrb[154].mxu0  ;;  %4027 = vadd.xlane.f32.xlu0 %v4026_v16  ;;  %v4029_v32 = vadd.f32 %v3955_v29, %v3954_v8 }
 0x472   : > { %v3880_v9 = vmax.f32 %v4918_v63, 0.0  ;;  %v4920_v34 = vadd.f32 %v3761_v36, %v6610_v11  ;;  %v3763_v17 = vpop.f32.mrb[155].mxu0 }
 0x473   : > { %v3881_v25 = vmax.f32 %v4919_v55, 0.0  ;;  %v4921_v41 = vadd.f32 %v3763_v17, %v6613_v44  ;;  %4030 = vadd.xlane.f32.xlu1 %v4029_v32 }
 0x474   : > { %v3956_v15 = vmul.f32 %v6620_v12, %v3880_v9  ;;  %v3882_v19 = vmax.f32 %v4920_v34, 0.0 }
 0x475   : > { %v3957_v14 = vmul.f32 %v6624_v22, %v3881_v25  ;;  %v3883_v5 = vmax.f32 %v4921_v41, 0.0 }
 0x476   : > { %v3958_v49 = vmul.f32 %v6620_v12, %v3882_v19 }
 0x477   : > { %v3959_v53 = vmul.f32 %v6624_v22, %v3883_v5  ;;  %v3767_v58 = vpop.f32.mrb[156].mxu0  ;;  %v4032_v1 = vadd.f32 %v3957_v14, %v3956_v15 }
 0x478   : > { %v4922_v51 = vadd.f32 %v3767_v58, %v6610_v11  ;;  %v3769_v4 = vpop.f32.mrb[157].mxu0 }
 0x479   : > { %v4923_v42 = vadd.f32 %v3769_v4, %v6613_v44  ;;  %v3771_v2 = vpop.f32.mrb[158].mxu0  ;;  %4033 = vadd.xlane.f32.xlu0 %v4032_v1  ;;  %v4035_v31 = vadd.f32 %v3959_v53, %v3958_v49 }
 0x47a   : > { %v3884_v0 = vmax.f32 %v4922_v51, 0.0  ;;  %v4924_v39 = vadd.f32 %v3771_v2, %v6610_v11  ;;  %v3773_v54 = vpop.f32.mrb[159].mxu0 }
 0x47b   : > { %v3885_v52 = vmax.f32 %v4923_v42, 0.0  ;;  %v4925_v7 = vadd.f32 %v3773_v54, %v6613_v44  ;;  %4036 = vadd.xlane.f32.xlu1 %v4035_v31 }
 0x47c   : > { %v3960_v43 = vmul.f32 %v6620_v12, %v3884_v0  ;;  %v3886_v56 = vmax.f32 %v4924_v39, 0.0 }
 0x47d   : > { %v3961_v59 = vmul.f32 %v6624_v22, %v3885_v52  ;;  %v3887_v61 = vmax.f32 %v4925_v7, 0.0 }
 0x47e   : > { %v3962_v18 = vmul.f32 %v6620_v12, %v3886_v56 }
 0x47f   : > { %v3963_v13 = vmul.f32 %v6624_v22, %v3887_v61  ;;  %v3777_v37 = vpop.f32.mrb[160].mxu0  ;;  %v4038_v24 = vadd.f32 %v3961_v59, %v3960_v43 }
 0x480   : > { %v4926_v30 = vadd.f32 %v3777_v37, %v6610_v11  ;;  %v3779_v35 = vpop.f32.mrb[161].mxu0 }
 0x481   : > { %v4927_v45 = vadd.f32 %v3779_v35, %v6613_v44  ;;  %v3781_v50 = vpop.f32.mrb[162].mxu0  ;;  %4039 = vadd.xlane.f32.xlu0 %v4038_v24  ;;  %v4041_v3 = vadd.f32 %v3963_v13, %v3962_v18 }
 0x482   : > { %v3888_v60 = vmax.f32 %v4926_v30, 0.0  ;;  %v4928_v62 = vadd.f32 %v3781_v50, %v6610_v11  ;;  %v3783_v33 = vpop.f32.mrb[163].mxu0 }
 0x483   : > { %v3889_v47 = vmax.f32 %v4927_v45, 0.0  ;;  %v4929_v20 = vadd.f32 %v3783_v33, %v6613_v44  ;;  %4042 = vadd.xlane.f32.xlu1 %v4041_v3 }
 0x484   : > { %v3964_v6 = vmul.f32 %v6620_v12, %v3888_v60  ;;  %v3890_v10 = vmax.f32 %v4928_v62, 0.0 }
 0x485   : > { %v3965_v26 = vmul.f32 %v6624_v22, %v3889_v47  ;;  %v3891_v40 = vmax.f32 %v4929_v20, 0.0 }
 0x486   : > { %v3966_v48 = vmul.f32 %v6620_v12, %v3890_v10 }
 0x487   : > { %v3967_v27 = vmul.f32 %v6624_v22, %v3891_v40  ;;  %v3787_v46 = vpop.f32.mrb[164].mxu0  ;;  %v4044_v28 = vadd.f32 %v3965_v26, %v3964_v6 }
 0x488   : > { %v4930_v57 = vadd.f32 %v3787_v46, %v6610_v11  ;;  %v3789_v23 = vpop.f32.mrb[165].mxu0 }
 0x489   : > { %v4931_v8 = vadd.f32 %v3789_v23, %v6613_v44  ;;  %v3791_v29 = vpop.f32.mrb[166].mxu0  ;;  %4045 = vadd.xlane.f32.xlu0 %v4044_v28  ;;  %v4047_v21 = vadd.f32 %v3967_v27, %v3966_v48 }
 0x48a   : > { %v3892_v16 = vmax.f32 %v4930_v57, 0.0  ;;  %v4932_v63 = vadd.f32 %v3791_v29, %v6610_v11  ;;  %v3793_v38 = vpop.f32.mrb[167].mxu0 }
 0x48b   : > { %v3893_v55 = vmax.f32 %v4931_v8, 0.0  ;;  %v4933_v36 = vadd.f32 %v3793_v38, %v6613_v44  ;;  %4048 = vadd.xlane.f32.xlu1 %v4047_v21 }
 0x48c   : > { %v3968_v32 = vmul.f32 %v6620_v12, %v3892_v16  ;;  %v3894_v9 = vmax.f32 %v4932_v63, 0.0 }
 0x48d   : > { %v3969_v34 = vmul.f32 %v6624_v22, %v3893_v55  ;;  %v3895_v17 = vmax.f32 %v4933_v36, 0.0 }
 0x48e   : > { %v3970_v25 = vmul.f32 %v6620_v12, %v3894_v9 }
 0x48f   : > { %v3971_v41 = vmul.f32 %v6624_v22, %v3895_v17  ;;  %v3797_v15 = vpop.f32.mrb[168].mxu0  ;;  %v4050_v19 = vadd.f32 %v3969_v34, %v3968_v32 }
 0x490   : > { %v4934_v14 = vadd.f32 %v3797_v15, %v6610_v11  ;;  %v3799_v5 = vpop.f32.mrb[169].mxu0 }
 0x491   : > { %v4935_v49 = vadd.f32 %v3799_v5, %v6613_v44  ;;  %v3801_v53 = vpop.f32.mrb[170].mxu0  ;;  %4051 = vadd.xlane.f32.xlu0 %v4050_v19  ;;  %v4053_v58 = vadd.f32 %v3971_v41, %v3970_v25 }
 0x492   : > { %v3896_v1 = vmax.f32 %v4934_v14, 0.0  ;;  %v4936_v51 = vadd.f32 %v3801_v53, %v6610_v11  ;;  %v3803_v4 = vpop.f32.mrb[171].mxu0 }
 0x493   : > { %v3897_v42 = vmax.f32 %v4935_v49, 0.0  ;;  %v4937_v2 = vadd.f32 %v3803_v4, %v6613_v44  ;;  %4054 = vadd.xlane.f32.xlu1 %v4053_v58 }
 0x494   : > { %v3972_v31 = vmul.f32 %v6620_v12, %v3896_v1  ;;  %v3898_v0 = vmax.f32 %v4936_v51, 0.0 }
 0x495   : > { %v3973_v39 = vmul.f32 %v6624_v22, %v3897_v42  ;;  %v3899_v54 = vmax.f32 %v4937_v2, 0.0 }
 0x496   : > { %v3974_v52 = vmul.f32 %v6620_v12, %v3898_v0 }
 0x497   : > { %v3975_v7 = vmul.f32 %v6624_v22, %v3899_v54  ;;  %v3807_v43 = vpop.f32.mrb[172].mxu0  ;;  %v4056_v56 = vadd.f32 %v3973_v39, %v3972_v31 }
 0x498   : > { %v4938_v59 = vadd.f32 %v3807_v43, %v6610_v11  ;;  %v3809_v61 = vpop.f32.mrb[173].mxu0 }
 0x499   : > { %v4939_v18 = vadd.f32 %v3809_v61, %v6613_v44  ;;  %v3811_v13 = vpop.f32.mrb[174].mxu0  ;;  %4057 = vadd.xlane.f32.xlu0 %v4056_v56  ;;  %v4059_v37 = vadd.f32 %v3975_v7, %v3974_v52 }
 0x49a   : > { %v3900_v24 = vmax.f32 %v4938_v59, 0.0  ;;  %v4940_v30 = vadd.f32 %v3811_v13, %v6610_v11  ;;  %v3813_v35 = vpop.f32.mrb[175].mxu0 }
 0x49b   : > { %v3901_v45 = vmax.f32 %v4939_v18, 0.0  ;;  %v4941_v50 = vadd.f32 %v3813_v35, %v6613_v44  ;;  %4060 = vadd.xlane.f32.xlu1 %v4059_v37 }
 0x49c   : > { %v3976_v3 = vmul.f32 %v6620_v12, %v3900_v24  ;;  %v3902_v60 = vmax.f32 %v4940_v30, 0.0 }
 0x49d   : > { %v3977_v62 = vmul.f32 %v6624_v22, %v3901_v45  ;;  %v3903_v33 = vmax.f32 %v4941_v50, 0.0 }
 0x49e   : > { %v3978_v47 = vmul.f32 %v6620_v12, %v3902_v60 }
 0x49f   : > { %v3979_v20 = vmul.f32 %v6624_v22, %v3903_v33  ;;  %v3817_v6 = vpop.f32.mrb[176].mxu0  ;;  %v4062_v10 = vadd.f32 %v3977_v62, %v3976_v3 }
 0x4a0   : > { %v4942_v26 = vadd.f32 %v3817_v6, %v6610_v11  ;;  %v3819_v40 = vpop.f32.mrb[177].mxu0 }
 0x4a1   : > { %v4943_v48 = vadd.f32 %v3819_v40, %v6613_v44  ;;  %v3821_v27 = vpop.f32.mrb[178].mxu0  ;;  %4063 = vadd.xlane.f32.xlu0 %v4062_v10  ;;  %v4065_v46 = vadd.f32 %v3979_v20, %v3978_v47 }
 0x4a2   : > { %v3904_v28 = vmax.f32 %v4942_v26, 0.0  ;;  %v4944_v57 = vadd.f32 %v3821_v27, %v6610_v11  ;;  %v3823_v23 = vpop.f32.mrb[179].mxu0 }
 0x4a3   : > { %v3905_v8 = vmax.f32 %v4943_v48, 0.0  ;;  %v4945_v29 = vadd.f32 %v3823_v23, %v6613_v44  ;;  %4066 = vadd.xlane.f32.xlu1 %v4065_v46 }
 0x4a4   : > { %v3980_v21 = vmul.f32 %v6620_v12, %v3904_v28  ;;  %v3906_v16 = vmax.f32 %v4944_v57, 0.0 }
 0x4a5   : > { %v3981_v63 = vmul.f32 %v6624_v22, %v3905_v8  ;;  %v3907_v38 = vmax.f32 %v4945_v29, 0.0 }
 0x4a6   : > { %v3982_v55 = vmul.f32 %v6620_v12, %v3906_v16 }
 0x4a7   : > { %v3983_v36 = vmul.f32 %v6624_v22, %v3907_v38  ;;  %v3827_v32 = vpop.f32.mrb[180].mxu0  ;;  %v4068_v9 = vadd.f32 %v3981_v63, %v3980_v21 }
 0x4a8   : > { %v4946_v34 = vadd.f32 %v3827_v32, %v6610_v11  ;;  %v3829_v17 = vpop.f32.mrb[181].mxu0 }
 0x4a9   : > { %v4947_v25 = vadd.f32 %v3829_v17, %v6613_v44  ;;  %v3831_v41 = vpop.f32.mrb[182].mxu0  ;;  %4069 = vadd.xlane.f32.xlu0 %v4068_v9  ;;  %v4071_v15 = vadd.f32 %v3983_v36, %v3982_v55 }
 0x4aa   : > { %v3908_v19 = vmax.f32 %v4946_v34, 0.0  ;;  %v4948_v14 = vadd.f32 %v3831_v41, %v6610_v11  ;;  %v3833_v5 = vpop.f32.mrb[183].mxu0 }
 0x4ab   : > { %v3909_v49 = vmax.f32 %v4947_v25, 0.0  ;;  %v4949_v53 = vadd.f32 %v3833_v5, %v6613_v44  ;;  %4072 = vadd.xlane.f32.xlu1 %v4071_v15 }
 0x4ac   : > { %v3984_v58 = vmul.f32 %v6620_v12, %v3908_v19  ;;  %v3910_v1 = vmax.f32 %v4948_v14, 0.0 }
 0x4ad   : > { %v3985_v51 = vmul.f32 %v6624_v22, %v3909_v49  ;;  %v3911_v4 = vmax.f32 %v4949_v53, 0.0 }
 0x4ae   : > { %v3986_v42 = vmul.f32 %v6620_v12, %v3910_v1 }
 0x4af   : > { %v3987_v2 = vmul.f32 %v6624_v22, %v3911_v4  ;;  %v3837_v31 = vpop.f32.mrb[184].mxu0  ;;  %v4074_v0 = vadd.f32 %v3985_v51, %v3984_v58 }
 0x4b0   : > { %v4950_v39 = vadd.f32 %v3837_v31, %v6610_v11  ;;  %v3839_v54 = vpop.f32.mrb[185].mxu0 }
 0x4b1   : > { %v4951_v52 = vadd.f32 %v3839_v54, %v6613_v44  ;;  %v3841_v7 = vpop.f32.mrb[186].mxu0  ;;  %4075 = vadd.xlane.f32.xlu0 %v4074_v0  ;;  %v4077_v43 = vadd.f32 %v3987_v2, %v3986_v42 }
 0x4b2   : > { %v3912_v56 = vmax.f32 %v4950_v39, 0.0  ;;  %v4952_v59 = vadd.f32 %v3841_v7, %v6610_v11  ;;  %v3843_v61 = vpop.f32.mrb[187].mxu0 }
 0x4b3   : > { %v3913_v18 = vmax.f32 %v4951_v52, 0.0  ;;  %v4953_v13 = vadd.f32 %v3843_v61, %v6613_v44  ;;  %4078 = vadd.xlane.f32.xlu1 %v4077_v43 }
 0x4b4   : > { %v3988_v37 = vmul.f32 %v6620_v12, %v3912_v56  ;;  %v3914_v24 = vmax.f32 %v4952_v59, 0.0 }
 0x4b5   : > { %v3989_v30 = vmul.f32 %v6624_v22, %v3913_v18  ;;  %v3915_v35 = vmax.f32 %v4953_v13, 0.0 }
 0x4b6   : > { %v3990_v45 = vmul.f32 %v6620_v12, %v3914_v24 }
 0x4b7   : > { %v3991_v50 = vmul.f32 %v6624_v22, %v3915_v35  ;;  %v3847_v3 = vpop.f32.mrb[188].mxu0  ;;  %v4080_v60 = vadd.f32 %v3989_v30, %v3988_v37 }
 0x4b8   : > { %v4954_v62 = vadd.f32 %v3847_v3, %v6610_v11  ;;  %v3849_v33 = vpop.f32.mrb[189].mxu0 }
 0x4b9   : > { %v4955_v47 = vadd.f32 %v3849_v33, %v6613_v44  ;;  %v3851_v20 = vpop.f32.mrb[190].mxu0  ;;  %4081 = vadd.xlane.f32.xlu0 %v4080_v60  ;;  %v4083_v6 = vadd.f32 %v3991_v50, %v3990_v45 }
 0x4ba   : > { %v3916_v10 = vmax.f32 %v4954_v62, 0.0  ;;  %v4956_v26 = vadd.f32 %v3851_v20, %v6610_v11  ;;  %v3853_v40 = vpop.f32.mrb[191].mxu0  ;;  %v6752_v11 = vld [vmem:[#allocation2] ss:$0 sm:$0xff] }
 0x4bb   : > { %v3917_v48 = vmax.f32 %v4955_v47, 0.0  ;;  %v4957_v27 = vadd.f32 %v3853_v40, %v6613_v44  ;;  %4084 = vadd.xlane.f32.xlu1 %v4083_v6 }
 0x4bc   : > { %v3992_v46 = vmul.f32 %v6620_v12, %v3916_v10  ;;  %v3918_v28 = vmax.f32 %v4956_v26, 0.0 }
 0x4bd   : > { %v3993_v57 = vmul.f32 %v6624_v22, %v3917_v48  ;;  %v3919_v23 = vmax.f32 %v4957_v27, 0.0 }
 0x4be   : > { %v3994_v8 = vmul.f32 %v6620_v12, %v3918_v28 }
 0x4bf   : > { %v3995_v29 = vmul.f32 %v6624_v22, %v3919_v23  ;;  %v4086_v21 = vadd.f32 %v3993_v57, %v3992_v46 }
 0x4c1   : > { %4087 = vadd.xlane.f32.xlu0 %v4086_v21  ;;  %v4089_v16 = vadd.f32 %v3995_v29, %v3994_v8 }
 0x4c3   : > { %4090 = vadd.xlane.f32.xlu1 %v4089_v16 }
 0x4d6   : > { %v3998_v63 = vpop.xlane.xlu0 %3997 }
 0x4d7   : > { %v4099_v44 = vadd.f32 %v6752_v11, %v3998_v63 }
 0x4d9   : > { %4133 = vperm.xlu0 %5172, %v4099_v44  }
 0x4da   : > { %v4001_v38 = vpop.xlane.xlu0 %4000 }
 0x4db   : > { %v4100_v55 = vadd.f32 %v6752_v11, %v4001_v38 }
 0x4dd   : > { %4138 = vperm.xlu1 %5173, %v4100_v55  }
 0x4de   : > { %v4004_v36 = vpop.xlane.xlu1 %4003 }
 0x4df   : > { %v4101_v32 = vadd.f32 %v6752_v11, %v4004_v36 }
 0x4e1   : > { %4143 = vperm.xlu1 %5173, %v4101_v32  }
 0x4e2   : > { %v4007_v12 = vpop.xlane.xlu1 %4006 }
 0x4e3   : > { %v4102_v22 = vadd.f32 %v6752_v11, %v4007_v12 }
 0x4e5   : > { %4148 = vperm.xlu1 %5173, %v4102_v22  }
 0x4e6   : > { %v4010_v9 = vpop.xlane.xlu0 %4009 }
 0x4e7   : > { %v4103_v34 = vadd.f32 %v6752_v11, %v4010_v9 }
 0x4e8   : > { %v4013_v17 = vpop.xlane.xlu1 %4012 }
 0x4e9   : > { %4153 = vperm.xlu1 %5173, %v4103_v34   ;;  %v4104_v25 = vadd.f32 %v6752_v11, %v4013_v17 }
 0x4ed   : > { %4158 = vperm.xlu1 %5173, %v4104_v25  }
 0x4ee   : > { %v4016_v41 = vpop.xlane.xlu0 %4015 }
 0x4ef   : > { %v4105_v15 = vadd.f32 %v6752_v11, %v4016_v41 }
 0x4f0   : > { %v4019_v19 = vpop.xlane.xlu1 %4018 }
 0x4f1   : > { %4163 = vperm.xlu1 %5173, %v4105_v15   ;;  %v4106_v14 = vadd.f32 %v6752_v11, %v4019_v19 }
 0x4f5   : > { %4168 = vperm.xlu1 %5173, %v4106_v14  }
 0x4f6   : > { %v4022_v5 = vpop.xlane.xlu0 %4021 }
 0x4f7   : > { %v4107_v49 = vadd.f32 %v6752_v11, %v4022_v5 }
 0x4f8   : > { %v4025_v53 = vpop.xlane.xlu1 %4024 }
 0x4f9   : > { %v4108_v58 = vadd.f32 %v6752_v11, %v4025_v53  ;;  %4173 = vperm.xlu1 %5173, %v4107_v49  }
 0x4fb   : > { %4178 = vperm.xlu0 %5172, %v4108_v58  }
 0x4fe   : > { %v4028_v1 = vpop.xlane.xlu0 %4027 }
 0x4ff   : > { %v4109_v51 = vadd.f32 %v6752_v11, %v4028_v1 }
 0x500   : > { %v4031_v4 = vpop.xlane.xlu1 %4030 }
 0x501   : > { %v4110_v42 = vadd.f32 %v6752_v11, %v4031_v4  ;;  %4183 = vperm.xlu1 %5173, %v4109_v51  }
 0x503   : > { %4188 = vperm.xlu0 %5172, %v4110_v42  }
 0x506   : > { %v4034_v2 = vpop.xlane.xlu0 %4033 }
 0x507   : > { %v4111_v31 = vadd.f32 %v6752_v11, %v4034_v2 }
 0x508   : > { %v4037_v0 = vpop.xlane.xlu1 %4036 }
 0x509   : > { %v4112_v39 = vadd.f32 %v6752_v11, %v4037_v0  ;;  %4193 = vperm.xlu1 %5173, %v4111_v31  }
 0x50b   : > { %4198 = vperm.xlu0 %5172, %v4112_v39  }
 0x50e   : > { %v4040_v54 = vpop.xlane.xlu0 %4039 }
 0x50f   : > { %v4113_v52 = vadd.f32 %v6752_v11, %v4040_v54 }
 0x510   : > { %v4043_v7 = vpop.xlane.xlu1 %4042 }
 0x511   : > { %v4114_v43 = vadd.f32 %v6752_v11, %v4043_v7  ;;  %4203 = vperm.xlu1 %5173, %v4113_v52  }
 0x513   : > { %4208 = vperm.xlu0 %5172, %v4114_v43  }
 0x516   : > { %v4046_v56 = vpop.xlane.xlu0 %4045 }
 0x517   : > { %v4115_v59 = vadd.f32 %v6752_v11, %v4046_v56 }
 0x518   : > { %v4049_v61 = vpop.xlane.xlu1 %4048 }
 0x519   : > { %v4116_v18 = vadd.f32 %v6752_v11, %v4049_v61  ;;  %4213 = vperm.xlu1 %5173, %v4115_v59  }
 0x51b   : > { %4218 = vperm.xlu0 %5172, %v4116_v18  }
 0x51e   : > { %v4052_v13 = vpop.xlane.xlu0 %4051 }
 0x51f   : > { %v4117_v37 = vadd.f32 %v6752_v11, %v4052_v13 }
 0x520   : > { %v4055_v24 = vpop.xlane.xlu1 %4054 }
 0x521   : > { %v4118_v30 = vadd.f32 %v6752_v11, %v4055_v24  ;;  %4223 = vperm.xlu1 %5173, %v4117_v37  }
 0x523   : > { %4228 = vperm.xlu0 %5172, %v4118_v30  }
 0x526   : > { %v4058_v35 = vpop.xlane.xlu0 %4057 }
 0x527   : > { %v4119_v45 = vadd.f32 %v6752_v11, %v4058_v35 }
 0x528   : > { %v4061_v50 = vpop.xlane.xlu1 %4060 }
 0x529   : > { %v4120_v3 = vadd.f32 %v6752_v11, %v4061_v50  ;;  %4233 = vperm.xlu1 %5173, %v4119_v45  }
 0x52b   : > { %4238 = vperm.xlu0 %5172, %v4120_v3  }
 0x52e   : > { %v4064_v60 = vpop.xlane.xlu0 %4063 }
 0x52f   : > { %v4121_v62 = vadd.f32 %v6752_v11, %v4064_v60 }
 0x530   : > { %v4067_v33 = vpop.xlane.xlu1 %4066 }
 0x531   : > { %v4122_v47 = vadd.f32 %v6752_v11, %v4067_v33  ;;  %4243 = vperm.xlu1 %5173, %v4121_v62  }
 0x533   : > { %4248 = vperm.xlu0 %5172, %v4122_v47  }
 0x536   : > { %v4070_v20 = vpop.xlane.xlu0 %4069 }
 0x537   : > { %v4123_v6 = vadd.f32 %v6752_v11, %v4070_v20 }
 0x538   : > { %v4073_v10 = vpop.xlane.xlu1 %4072 }
 0x539   : > { %v4124_v26 = vadd.f32 %v6752_v11, %v4073_v10  ;;  %4253 = vperm.xlu1 %5173, %v4123_v6  }
 0x53b   : > { %4258 = vperm.xlu0 %5172, %v4124_v26  }
 0x53e   : > { %v4076_v40 = vpop.xlane.xlu0 %4075 }
 0x53f   : > { %v4125_v48 = vadd.f32 %v6752_v11, %v4076_v40 }
 0x540   : > { %v4079_v27 = vpop.xlane.xlu1 %4078 }
 0x541   : > { %v4126_v46 = vadd.f32 %v6752_v11, %v4079_v27  ;;  %4263 = vperm.xlu1 %5173, %v4125_v48  }
 0x543   : > { %4268 = vperm.xlu0 %5172, %v4126_v46  }
 0x546   : > { %v4082_v28 = vpop.xlane.xlu0 %4081 }
 0x547   : > { %v4127_v57 = vadd.f32 %v6752_v11, %v4082_v28 }
 0x548   : > { %v4085_v23 = vpop.xlane.xlu1 %4084 }
 0x549   : > { %v4128_v8 = vadd.f32 %v6752_v11, %v4085_v23  ;;  %4273 = vperm.xlu1 %5173, %v4127_v57  }
 0x54b   : > { %4278 = vperm.xlu0 %5172, %v4128_v8  }
 0x54e   : > { %v4088_v29 = vpop.xlane.xlu0 %4087 }
 0x54f   : > { %v4129_v21 = vadd.f32 %v6752_v11, %v4088_v29 }
 0x550   : > { %v4091_v16 = vpop.xlane.xlu1 %4090 }
 0x551   : > { %v4130_v63 = vadd.f32 %v6752_v11, %v4091_v16  ;;  %4283 = vperm.xlu1 %5173, %v4129_v21  }
 0x553   : > { %4288 = vperm.xlu0 %5172, %v4130_v63  }
 0x558   : > { %v4134_v44 = vpop.permute.xlu0 %4133 }
 0x559   : > { %4291 = vst [vmem:[%s6787_s26] sm:$0xff] %v4134_v44 }
 0x55c   : > { %v4139_v38 = vpop.permute.xlu1 %4138 }
 0x55d   : > { %4292 = vst [vmem:[%s6787_s26 + $0x8] sm:$0xff] %v4139_v38 }
 0x560   : > { %v4144_v11 = vpop.permute.xlu1 %4143 }
 0x561   : > { %4293 = vst [vmem:[%s6787_s26 + $0x10] sm:$0xff] %v4144_v11 }
 0x564   : > { %v4149_v55 = vpop.permute.xlu1 %4148 }
 0x565   : > { %4294 = vst [vmem:[%s6787_s26 + $0x18] sm:$0xff] %v4149_v55 }
 0x568   : > { %v4154_v36 = vpop.permute.xlu1 %4153 }
 0x569   : > { %4295 = vst [vmem:[%s6787_s26 + $0x20] sm:$0xff] %v4154_v36 }
 0x56c   : > { %v4159_v32 = vpop.permute.xlu1 %4158 }
 0x56d   : > { %4296 = vst [vmem:[%s6787_s26 + $0x28] sm:$0xff] %v4159_v32 }
 0x570   : > { %v4164_v12 = vpop.permute.xlu1 %4163 }
 0x571   : > { %4297 = vst [vmem:[%s6787_s26 + $0x30] sm:$0xff] %v4164_v12 }
 0x574   : > { %v4169_v22 = vpop.permute.xlu1 %4168 }
 0x575   : > { %4298 = vst [vmem:[%s6787_s26 + $0x38] sm:$0xff] %v4169_v22 }
 0x578   : > { %v4174_v9 = vpop.permute.xlu1 %4173 }
 0x579   : > { %4299 = vst [vmem:[%s6787_s26 + $0x40] sm:$0xff] %v4174_v9 }
 0x57a   : > { %v4179_v34 = vpop.permute.xlu0 %4178 }
 0x57b   : > { %4300 = vst [vmem:[%s6787_s26 + $0x48] sm:$0xff] %v4179_v34 }
 0x580   : > { %v4184_v17 = vpop.permute.xlu1 %4183 }
 0x581   : > { %4301 = vst [vmem:[%s6787_s26 + $0x50] sm:$0xff] %v4184_v17 }
 0x582   : > { %v4189_v25 = vpop.permute.xlu0 %4188 }
 0x583   : > { %4302 = vst [vmem:[%s6787_s26 + $0x58] sm:$0xff] %v4189_v25 }
 0x588   : > { %v4194_v41 = vpop.permute.xlu1 %4193 }
 0x589   : > { %4303 = vst [vmem:[%s6787_s26 + $0x60] sm:$0xff] %v4194_v41 }
 0x58a   : > { %v4199_v15 = vpop.permute.xlu0 %4198 }
 0x58b   : > { %4304 = vst [vmem:[%s6787_s26 + $0x68] sm:$0xff] %v4199_v15 }
 0x590   : > { %v4204_v19 = vpop.permute.xlu1 %4203 }
 0x591   : > { %4305 = vst [vmem:[%s6787_s26 + $0x70] sm:$0xff] %v4204_v19 }
 0x592   : > { %v4209_v14 = vpop.permute.xlu0 %4208 }
 0x593   : > { %4306 = vst [vmem:[%s6787_s26 + $0x78] sm:$0xff] %v4209_v14 }
 0x598   : > { %v4214_v5 = vpop.permute.xlu1 %4213 }
 0x599   : > { %4307 = vst [vmem:[%s6787_s26 + $0x80] sm:$0xff] %v4214_v5 }
 0x59a   : > { %v4219_v49 = vpop.permute.xlu0 %4218 }
 0x59b   : > { %4308 = vst [vmem:[%s6787_s26 + $0x88] sm:$0xff] %v4219_v49 }
 0x5a0   : > { %v4224_v53 = vpop.permute.xlu1 %4223 }
 0x5a1   : > { %4309 = vst [vmem:[%s6787_s26 + $0x90] sm:$0xff] %v4224_v53 }
 0x5a2   : > { %v4229_v58 = vpop.permute.xlu0 %4228 }
 0x5a3   : > { %4310 = vst [vmem:[%s6787_s26 + $0x98] sm:$0xff] %v4229_v58 }
 0x5a8   : > { %v4234_v1 = vpop.permute.xlu1 %4233 }
 0x5a9   : > { %4311 = vst [vmem:[%s6787_s26 + $0xa0] sm:$0xff] %v4234_v1 }
 0x5aa   : > { %v4239_v51 = vpop.permute.xlu0 %4238 }
 0x5ab   : > { %4312 = vst [vmem:[%s6787_s26 + $0xa8] sm:$0xff] %v4239_v51 }
 0x5b0   : > { %v4244_v4 = vpop.permute.xlu1 %4243 }
 0x5b1   : > { %4313 = vst [vmem:[%s6787_s26 + $0xb0] sm:$0xff] %v4244_v4 }
 0x5b2   : > { %v4249_v42 = vpop.permute.xlu0 %4248 }
 0x5b3   : > { %4314 = vst [vmem:[%s6787_s26 + $0xb8] sm:$0xff] %v4249_v42 }
 0x5b8   : > { %v4254_v2 = vpop.permute.xlu1 %4253 }
 0x5b9   : > { %4315 = vst [vmem:[%s6787_s26 + $0xc0] sm:$0xff] %v4254_v2 }
 0x5ba   : > { %v4259_v31 = vpop.permute.xlu0 %4258 }
 0x5bb   : > { %4316 = vst [vmem:[%s6787_s26 + $0xc8] sm:$0xff] %v4259_v31 }
 0x5c0   : > { %v4264_v0 = vpop.permute.xlu1 %4263 }
 0x5c1   : > { %4317 = vst [vmem:[%s6787_s26 + $0xd0] sm:$0xff] %v4264_v0 }
 0x5c2   : > { %v4269_v39 = vpop.permute.xlu0 %4268 }
 0x5c3   : > { %4318 = vst [vmem:[%s6787_s26 + $0xd8] sm:$0xff] %v4269_v39 }
 0x5c8   : > { %v4274_v54 = vpop.permute.xlu1 %4273 }
 0x5c9   : > { %4319 = vst [vmem:[%s6787_s26 + $0xe0] sm:$0xff] %v4274_v54 }
 0x5ca   : > { %v4279_v52 = vpop.permute.xlu0 %4278 }
 0x5cb   : > { %4320 = vst [vmem:[%s6787_s26 + $0xe8] sm:$0xff] %v4279_v52 }
 0x5d0   : > { %v4284_v7 = vpop.permute.xlu1 %4283 }
 0x5d1   : > { %4321 = vst [vmem:[%s6787_s26 + $0xf0] sm:$0xff] %v4284_v7 }
 0x5d2   : > { %v4289_v43 = vpop.permute.xlu0 %4288 }
 0x5d3   : > { %4322 = vst [vmem:[%s6787_s26 + $0xf8] sm:$0xff] %v4289_v43 }
 0x5d4   : > { %5653 = shalt.err (!%p5650_p4)
}
 0x5d5   : > { %s5654_s24 = scalar_lea.hbm %s6824_s16, 4096  ;;  %s5658_s17 = scalar_lea.hbm %s6881_s9, 8192 }
 0x5d6   : > { %p5655_p9 = scmp.ne.s32.totalorder %s6824_s16, %s5654_s24  ;;  %p5659_p8 = scmp.lt.u32.totalorder %s6824_s16, %s6881_s9 }
 0x5d7   : > { %p5660_p13 = scmp.lt.u32.totalorder %s5658_s17, %s5654_s24  ;;  %p5662_p10 = scmp.lt.u32.totalorder %s5654_s24, %s6824_s16 }
 0x5d8   : > { %p5656_p0 = pnand %p5655_p9, %p5928_p5 }
 0x5d9   : > { %p5661_p6 = por %p5660_p13, %p5659_p8 }
 0x5da   : > { %p5657_p11 = pneg %p5656_p0 }
 0x5db   : > { %p5663_p3 = por %p5662_p10, %p5661_p6 }
 0x5dd   : > { %p5664_p7 = pnand %p5663_p3, %p5657_p11 }
 0x5df   : > { %5667 = shalt.err (!%p5664_p7)
}
 0x5e0   : > { %s5728_s15 = smov 128   ;;  %s5729_s21 = smov 8  }
 0x5e1   : > { %5100 = dma.vmem_to_hbm [thread:$0]  (%p5928_p5), %s6826_s25, 4096, %s6824_s16, %s4324_s18, %s5728_s15, %s5728_s15, %s5729_s21  }
 0x5e2 PF: > { %s6974_s22 = sld [smem:[#allocation16_spill]]  ;;  %s6975_s8 = sld [smem:[#allocation17_spill]] }
 0x5e3   : > { %p6977_p2 = scmp.ge.s32.totalorder %s5714_s14, 2 }
 0x5e8   : > { %s4352_s23 = sand.u32 1, %s6974_s22   ;;  %p6976_p12 = scmp.ne.s32.totalorder %s6975_s8, 0 }
 0x5e9   : > { %s4353_s10 = scalar_lea.sflag [#allocation5], %s4352_s23 }
 0x5ea   : > { %p5117_p1 = pnand %p6977_p2, %p6976_p12 }
 0x5ec   : > { %5697 = dma.done.wait (!%p5117_p1), %s4353_s10, 4096  }
 0x5ed   : > { %5699 = vsyncadd (!%p5117_p1), %s4353_s10, 4294963200  ;;  %s6978_s24 = smov %s5914_s11  ;;  %p26_p4 = scmp.ge.s32.totalorder %s5914_s11, 4  }
 0x5ee   : > { %s6979_s11 = smov %s5706_s12  ;;  %s6980_s12 = smov %s5710_s13 }
 0x5ef   : > { %s6981_s13 = smov %s5924_s28  ;;  %s6982_s14 = smov %s6978_s24 }
 0x5f0   :  { %28 = sbr.rel (!%p26_p4) target bundleno = 10 (0xa), region = 113 }
 0x5f7   :  { %4358 = vsyncpa [#allocation4], 1 }
 0x5f8   :  { %4360 = vsyncpa [#allocation4 + $0x1], 1 }
 0x5f9   :  { %4361 = vsyncpa [#allocation7], 1 }
 0x5fa   :  { %4362 = vsyncpa [#allocation10], 1 }
 0x5fb   :  { %4363 = vsyncpa [#allocation5], 1 }
 0x5fc   :  { %4365 = vsyncpa [#allocation5 + $0x1], 1 }

</bundles_post_ra>
